<compile_context>
chip_gen: v5e
topology: v5e:2x2
jax: 0.10.0
libtpu: 0.0.40
codegen_flags: <defaults>
</compile_context>

<pallas_src>
import jax
import jax.numpy as jnp
from jax.experimental import pallas as pl
from jax.experimental.pallas import tpu as pltpu

D_IN = 4
C1P = 8                                     # conv1 in-channels zero-padded 4 -> 8 (alignment)
H_CH = 8                                    # H in the PyTorch module
SPATIAL = 8                                 # input spatial size
POOL_SIZE = 2 * H_CH * SPATIAL * SPATIAL    # 1024
D_OUT = 13
_MAX_BT = 256                               # batch tile (lanes per grid step)


# ----------------------------- fused forward kernel --------------------------
def _net_fwd_kernel(x_ref, l1_ref, b1_ref, l2_ref, b2_ref,
                    wf1_ref, bf1_ref, wf2_ref, bf2_ref,
                    o_ref, p1_ref, p2_ref):
    bt = o_ref.shape[1]
    s = SPATIAL

    def conv3x3_relu(pad_ref, x2d, l_ref, b_ref, cin):
        # Zero only the 1-wide padding border; the interior is fully
        # overwritten each step (no program_id-gated init: megacore-safe).
        pad_ref[0:cin, :] = jnp.zeros((cin, (s + 2) * bt), jnp.float32)              # hp = 0
        pad_ref[(s + 1) * cin:(s + 2) * cin, :] = jnp.zeros((cin, (s + 2) * bt),
                                                            jnp.float32)             # hp = 9
        pad_ref[:, 0:bt] = jnp.zeros(((s + 2) * cin, bt), jnp.float32)                # wp = 0
        pad_ref[:, (s + 1) * bt:(s + 2) * bt] = jnp.zeros(((s + 2) * cin, bt),
                                                          jnp.float32)               # wp = 9
        # interior: rows hp in [1,9) -> [cin, 9*cin), lanes wp in [1,9) -> [bt, 9*bt)
        pad_ref[cin:(s + 1) * cin, bt:(s + 1) * bt] = x2d

        # 3 banded matmuls, one per kernel column dx (dy and cin folded into K=10*cin);
        # each RHS is an aligned lane window of the padded scratch.
        acc = jnp.dot(l_ref[0], pad_ref[:, 0:s * bt],
                      preferred_element_type=jnp.float32)
        acc = acc + jnp.dot(l_ref[1], pad_ref[:, bt:(s + 1) * bt],
                            preferred_element_type=jnp.float32)
        acc = acc + jnp.dot(l_ref[2], pad_ref[:, 2 * bt:(s + 2) * bt],
                            preferred_element_type=jnp.float32)
        return jnp.maximum(acc + b_ref[...], 0.0)       # (8*cout, 8*bt), rows = h*cout + o

    # conv1 + ReLU  (input rows = h*8 + c, channels 4..7 are zero padding)
    a1 = conv3x3_relu(p1_ref, x_ref[0], l1_ref, b1_ref, C1P)          # (64, 8*bt)
    # conv2 + ReLU
    a2 = conv3x3_relu(p2_ref, a1, l2_ref, b2_ref, H_CH)               # (128, 8*bt)
    # Dropout(0.5) is identity at inference time.
    # TODO(synk): training-mode dropout (pltpu.prng_* masking) not implemented.

    # fc1 as ONE (8, 1024) x (1024, bt) dot; fc_in rows = w*128 + h*16 + c, which
    # matches the host-side permutation of fc1_w.
    fc_in = jnp.concatenate([a2[:, w * bt:(w + 1) * bt] for w in range(s)], axis=0)
    h1 = jnp.dot(wf1_ref[...], fc_in, preferred_element_type=jnp.float32) + bf1_ref[...]

    # fc2 + 13 * sigmoid (exact)
    y = jnp.dot(wf2_ref[...], h1, preferred_element_type=jnp.float32) + bf2_ref[...]
    o_ref[...] = 13.0 / (1.0 + jnp.exp(-y))


def net_forward(x_nchw, pk):
    """x_nchw: (N, 4, 8, 8) f32; pk: packed (kernel-layout) params."""
    n = x_nchw.shape[0]
    n128 = -(-n // 128) * 128
    bt = min(_MAX_BT, n128)
    n_pad = -(-n // bt) * bt
    if n_pad // bt == 1 and bt > 128:       # keep >=2 grid steps for v7x megacore
        bt //= 2
    t = n_pad // bt

    # host-side repack of the input: (N,4,8,8) NCHW -> per-tile lane-dense
    # (t, h*8 + c, w*bt + n_local), channels zero-padded 4 -> 8.
    x = x_nchw.astype(jnp.float32)
    x = jnp.pad(x, ((0, n_pad - n), (0, C1P - D_IN), (0, 0), (0, 0)))
    xt = jnp.transpose(x, (2, 1, 3, 0))                       # (h, c, w, n)
    xt = xt.reshape(SPATIAL, C1P, SPATIAL, t, bt)
    xt = jnp.transpose(xt, (3, 0, 1, 2, 4))                   # (t, h, c, w, bt)
    xt = xt.reshape(t, SPATIAL * C1P, SPATIAL * bt)

    out = pl.pallas_call(
        _net_fwd_kernel,
        out_shape=jax.ShapeDtypeStruct((D_OUT, n_pad), jnp.float32),
        grid=(t,),
        in_specs=[
            pl.BlockSpec((1, SPATIAL * C1P, SPATIAL * bt), lambda i: (i, 0, 0)),
            pl.BlockSpec((3, SPATIAL * H_CH, (SPATIAL + 2) * C1P), lambda i: (0, 0, 0)),
            pl.BlockSpec((SPATIAL * H_CH, 1), lambda i: (0, 0)),
            pl.BlockSpec((3, SPATIAL * 2 * H_CH, (SPATIAL + 2) * H_CH), lambda i: (0, 0, 0)),
            pl.BlockSpec((SPATIAL * 2 * H_CH, 1), lambda i: (0, 0)),
            pl.BlockSpec((H_CH, POOL_SIZE), lambda i: (0, 0)),
            pl.BlockSpec((H_CH, 1), lambda i: (0, 0)),
            pl.BlockSpec((D_OUT, H_CH), lambda i: (0, 0)),
            pl.BlockSpec((D_OUT, 1), lambda i: (0, 0)),
        ],
        out_specs=pl.BlockSpec((D_OUT, bt), lambda i: (0, i)),
        scratch_shapes=[
            pltpu.VMEM(((SPATIAL + 2) * C1P, (SPATIAL + 2) * bt), jnp.float32),
            pltpu.VMEM(((SPATIAL + 2) * H_CH, (SPATIAL + 2) * bt), jnp.float32),
        ],
        compiler_params=pltpu.CompilerParams(
            dimension_semantics=("parallel",),
            vmem_limit_bytes=32 * 1024 * 1024),
    )(xt, pk["l1"], pk["b1"], pk["l2"], pk["b2"],
      pk["wf1"], pk["bf1"], pk["wf2"], pk["bf2"])
    return jnp.transpose(out)[:n]


# ----------------------------- parameters ------------------------------------
def init_params(key):
    """PyTorch-layout f32 parameters (deterministic)."""
    ks = jax.random.split(key, 8)

    def u(k, shape, fan_in):
        bound = 1.0 / jnp.sqrt(float(fan_in))
        return jax.random.uniform(k, shape, jnp.float32, -bound, bound)

    return {
        "conv1_w": u(ks[0], (H_CH, D_IN, 3, 3), D_IN * 9),       # (Cout, Cin, kh, kw)
        "conv1_b": u(ks[1], (H_CH,), D_IN * 9),
        "conv2_w": u(ks[2], (2 * H_CH, H_CH, 3, 3), H_CH * 9),
        "conv2_b": u(ks[3], (2 * H_CH,), H_CH * 9),
        "fc1_w": u(ks[4], (H_CH, POOL_SIZE), POOL_SIZE),         # (out, in)
        "fc1_b": u(ks[5], (H_CH,), POOL_SIZE),
        "fc2_w": u(ks[6], (D_OUT, H_CH), H_CH),
        "fc2_b": u(ks[7], (D_OUT,), H_CH),
    }


def pack_params(p):
    """One-time host-side repack into banded conv matrices + permuted fc1 weights."""
    def band(w, cin_p):
        # (Cout, Cin, 3, 3) -> (3[dx], 8*Cout, 10*cin_p):
        #   L[dx, h*Cout + o, hp*cin_p + c] = w[o, c, hp - h, dx] if 0 <= hp-h <= 2 else 0
        co, ci = w.shape[0], w.shape[1]
        l = jnp.zeros((3, SPATIAL, co, SPATIAL + 2, cin_p), jnp.float32)
        for dy in range(3):
            for h in range(SPATIAL):
                l = l.at[:, h, :, h + dy, :ci].set(
                    jnp.transpose(w[:, :, dy, :], (2, 0, 1)))    # (dx, o, c)
        return l.reshape(3, SPATIAL * co, (SPATIAL + 2) * cin_p)

    # fc1: column order w*128 + h*16 + c  <->  PyTorch flatten index c*64 + h*8 + w
    wf1 = p["fc1_w"].reshape(H_CH, 2 * H_CH, SPATIAL, SPATIAL)   # (o, c, h, w)
    wf1 = jnp.transpose(wf1, (0, 3, 2, 1)).reshape(H_CH, POOL_SIZE)

    return {
        "l1": band(p["conv1_w"], C1P),
        "b1": jnp.tile(p["conv1_b"], SPATIAL).reshape(SPATIAL * H_CH, 1),
        "l2": band(p["conv2_w"], H_CH),
        "b2": jnp.tile(p["conv2_b"], SPATIAL).reshape(SPATIAL * 2 * H_CH, 1),
        "wf1": wf1,
        "bf1": p["fc1_b"].reshape(H_CH, 1),
        "wf2": p["fc2_w"],                                       # (13, 8), used as-is
        "bf2": p["fc2_b"].reshape(D_OUT, 1),
    }


# ----------------------------- pure-JAX reference -----------------------------
def reference_forward(x_nchw, p):
    dn = ("NCHW", "OIHW", "NCHW")
    h = jax.lax.conv_general_dilated(x_nchw, p["conv1_w"], (1, 1), ((1, 1), (1, 1)),
                                     dimension_numbers=dn,
                                     precision=jax.lax.Precision.HIGHEST)
    h = jnp.maximum(h + p["conv1_b"][None, :, None, None], 0.0)
    h = jax.lax.conv_general_dilated(h, p["conv2_w"], (1, 1), ((1, 1), (1, 1)),
                                     dimension_numbers=dn,
                                     precision=jax.lax.Precision.HIGHEST)
    h = jnp.maximum(h + p["conv2_b"][None, :, None, None], 0.0)
    flat = h.reshape(-1, POOL_SIZE)                              # NCHW flatten, like .view
    h1 = jnp.dot(flat, p["fc1_w"].T, precision="highest") + p["fc1_b"]
    y = jnp.dot(h1, p["fc2_w"].T, precision="highest") + p["fc2_b"]
    return 13.0 * jax.nn.sigmoid(y)


if __name__ == "__main__":
    key = jax.random.PRNGKey(0)
    kx, kp = jax.random.split(key)
    # raw input has 5 channels; `torch.index_select(x, 1, range(4))` -> static slice
    x_raw = jax.random.normal(kx, (2, 5, SPATIAL, SPATIAL), jnp.float32)
    x = x_raw[:, :D_IN]                                          # (2, 4, 8, 8) NCHW

    params = init_params(kp)
    packed = pack_params(params)

    fwd = jax.jit(net_forward)
    out = jax.block_until_ready(fwd(x, packed))
    assert out.shape == (2, D_OUT) and out.dtype == jnp.float32

    ref = reference_forward(x, params)
    max_err = float(jnp.max(jnp.abs(out - ref)))
    assert max_err < 2e-2, f"max |pallas - reference| = {max_err}"
    print("KERNEL_OK")
</pallas_src>

<mosaic_0001>
module attributes {stable_mosaic.version = 11 : i64} {
  func.func @_net_fwd_kernel(%arg0: i32, %arg1: memref<1x64x1024xf32, #tpu.memory_space<vmem>>, %arg2: memref<3x64x80xf32, #tpu.memory_space<vmem>>, %arg3: memref<64x1xf32, #tpu.memory_space<vmem>>, %arg4: memref<3x128x80xf32, #tpu.memory_space<vmem>>, %arg5: memref<128x1xf32, #tpu.memory_space<vmem>>, %arg6: memref<8x1024xf32, #tpu.memory_space<vmem>>, %arg7: memref<8x1xf32, #tpu.memory_space<vmem>>, %arg8: memref<13x8xf32, #tpu.memory_space<vmem>>, %arg9: memref<13x1xf32, #tpu.memory_space<vmem>>, %arg10: memref<13x128xf32, #tpu.memory_space<vmem>>, %arg11: memref<80x1280xf32, #tpu.memory_space<vmem>>, %arg12: memref<80x1280xf32, #tpu.memory_space<vmem>>) attributes {dimension_semantics = [#tpu.dimension_semantics<parallel>], iteration_bounds = array<i64: 1>, scalar_prefetch = 0 : i64, scratch_operands = 2 : i64, tpu.core_type = #tpu.core_type<tc>, window_params = [{transform_indices = @transform_0, window_bounds = array<i64: 1, 64, 1024>}, {pipeline_mode = #tpu.pipeline_mode<synchronous>, transform_indices = @transform_1, window_bounds = array<i64: 3, 64, 80>}, {pipeline_mode = #tpu.pipeline_mode<synchronous>, transform_indices = @transform_2, window_bounds = array<i64: 64, 1>}, {pipeline_mode = #tpu.pipeline_mode<synchronous>, transform_indices = @transform_3, window_bounds = array<i64: 3, 128, 80>}, {pipeline_mode = #tpu.pipeline_mode<synchronous>, transform_indices = @transform_4, window_bounds = array<i64: 128, 1>}, {pipeline_mode = #tpu.pipeline_mode<synchronous>, transform_indices = @transform_5, window_bounds = array<i64: 8, 1024>}, {pipeline_mode = #tpu.pipeline_mode<synchronous>, transform_indices = @transform_6, window_bounds = array<i64: 8, 1>}, {pipeline_mode = #tpu.pipeline_mode<synchronous>, transform_indices = @transform_7, window_bounds = array<i64: 13, 8>}, {pipeline_mode = #tpu.pipeline_mode<synchronous>, transform_indices = @transform_8, window_bounds = array<i64: 13, 1>}, {transform_indices = @transform_9, window_bounds = array<i64: 13, 128>}]} {
    %c0 = arith.constant 0 : index
    %c0_0 = arith.constant 0 : index
    %c0_1 = arith.constant 0 : index
    %0 = vector.load %arg1[%c0, %c0_0, %c0_1] : memref<1x64x1024xf32, #tpu.memory_space<vmem>>, vector<1x64x1024xf32>
    %1 = vector.shape_cast %0 : vector<1x64x1024xf32> to vector<64x1024xf32>
    %cst = arith.constant 0.000000e+00 : f32
    %2 = vector.broadcast %cst : f32 to vector<8x1280xf32>
    %c0_2 = arith.constant 0 : index
    %c0_3 = arith.constant 0 : index
    %3 = vector.load %arg11[%c0_2, %c0_3] : memref<80x1280xf32, #tpu.memory_space<vmem>>, vector<8x1280xf32>
    tpu.vector_store %arg11[%c0_2, %c0_3], %2 {strides = array<i32>} : memref<80x1280xf32, #tpu.memory_space<vmem>>, vector<8x1280xf32>,
    %cst_4 = arith.constant 0.000000e+00 : f32
    %4 = vector.broadcast %cst_4 : f32 to vector<8x1280xf32>
    %c72 = arith.constant 72 : index
    %c0_5 = arith.constant 0 : index
    %5 = vector.load %arg11[%c72, %c0_5] : memref<80x1280xf32, #tpu.memory_space<vmem>>, vector<8x1280xf32>
    tpu.vector_store %arg11[%c72, %c0_5], %4 {strides = array<i32>} : memref<80x1280xf32, #tpu.memory_space<vmem>>, vector<8x1280xf32>,
    %cst_6 = arith.constant 0.000000e+00 : f32
    %6 = vector.broadcast %cst_6 : f32 to vector<80x128xf32>
    %c0_7 = arith.constant 0 : index
    %c0_8 = arith.constant 0 : index
    %7 = vector.load %arg11[%c0_7, %c0_8] : memref<80x1280xf32, #tpu.memory_space<vmem>>, vector<80x128xf32>
    tpu.vector_store %arg11[%c0_7, %c0_8], %6 {strides = array<i32>} : memref<80x1280xf32, #tpu.memory_space<vmem>>, vector<80x128xf32>,
    %cst_9 = arith.constant 0.000000e+00 : f32
    %8 = vector.broadcast %cst_9 : f32 to vector<80x128xf32>
    %c0_10 = arith.constant 0 : index
    %c1152 = arith.constant 1152 : index
    %9 = vector.load %arg11[%c0_10, %c1152] : memref<80x1280xf32, #tpu.memory_space<vmem>>, vector<80x128xf32>
    tpu.vector_store %arg11[%c0_10, %c1152], %8 {strides = array<i32>} : memref<80x1280xf32, #tpu.memory_space<vmem>>, vector<80x128xf32>,
    %c8 = arith.constant 8 : index
    %c128 = arith.constant 128 : index
    %10 = vector.load %arg11[%c8, %c128] : memref<80x1280xf32, #tpu.memory_space<vmem>>, vector<64x1024xf32>
    tpu.vector_store %arg11[%c8, %c128], %1 {strides = array<i32>} : memref<80x1280xf32, #tpu.memory_space<vmem>>, vector<64x1024xf32>,
    %c0_11 = arith.constant 0 : index
    %c0_12 = arith.constant 0 : index
    %c0_13 = arith.constant 0 : index
    %11 = vector.load %arg2[%c0_11, %c0_12, %c0_13] : memref<3x64x80xf32, #tpu.memory_space<vmem>>, vector<1x64x80xf32>
    %12 = vector.shape_cast %11 : vector<1x64x80xf32> to vector<64x80xf32>
    %c0_14 = arith.constant 0 : index
    %c0_15 = arith.constant 0 : index
    %13 = vector.load %arg11[%c0_14, %c0_15] : memref<80x1280xf32, #tpu.memory_space<vmem>>, vector<80x1024xf32>
    %cst_16 = arith.constant dense<0.000000e+00> : vector<64x1024xf32>
    %14 = tpu.matmul %12, %13, %cst_16 {dimension_numbers = #tpu.dot_dimension_numbers<[1], [0], [0], [1], [0, 0, 1, 1], [], []>} : vector<64x80xf32>, vector<80x1024xf32>, vector<64x1024xf32> -> vector<64x1024xf32>
    %c1 = arith.constant 1 : index
    %c0_17 = arith.constant 0 : index
    %c0_18 = arith.constant 0 : index
    %15 = vector.load %arg2[%c1, %c0_17, %c0_18] : memref<3x64x80xf32, #tpu.memory_space<vmem>>, vector<1x64x80xf32>
    %16 = vector.shape_cast %15 : vector<1x64x80xf32> to vector<64x80xf32>
    %c0_19 = arith.constant 0 : index
    %c128_20 = arith.constant 128 : index
    %17 = vector.load %arg11[%c0_19, %c128_20] : memref<80x1280xf32, #tpu.memory_space<vmem>>, vector<80x1024xf32>
    %cst_21 = arith.constant dense<0.000000e+00> : vector<64x1024xf32>
    %18 = tpu.matmul %16, %17, %cst_21 {dimension_numbers = #tpu.dot_dimension_numbers<[1], [0], [0], [1], [0, 0, 1, 1], [], []>} : vector<64x80xf32>, vector<80x1024xf32>, vector<64x1024xf32> -> vector<64x1024xf32>
    %19 = arith.addf %14, %18 : vector<64x1024xf32>
    %c2 = arith.constant 2 : index
    %c0_22 = arith.constant 0 : index
    %c0_23 = arith.constant 0 : index
    %20 = vector.load %arg2[%c2, %c0_22, %c0_23] : memref<3x64x80xf32, #tpu.memory_space<vmem>>, vector<1x64x80xf32>
    %21 = vector.shape_cast %20 : vector<1x64x80xf32> to vector<64x80xf32>
    %c0_24 = arith.constant 0 : index
    %c256 = arith.constant 256 : index
    %22 = vector.load %arg11[%c0_24, %c256] : memref<80x1280xf32, #tpu.memory_space<vmem>>, vector<80x1024xf32>
    %cst_25 = arith.constant dense<0.000000e+00> : vector<64x1024xf32>
    %23 = tpu.matmul %21, %22, %cst_25 {dimension_numbers = #tpu.dot_dimension_numbers<[1], [0], [0], [1], [0, 0, 1, 1], [], []>} : vector<64x80xf32>, vector<80x1024xf32>, vector<64x1024xf32> -> vector<64x1024xf32>
    %24 = arith.addf %19, %23 : vector<64x1024xf32>
    %c0_26 = arith.constant 0 : index
    %c0_27 = arith.constant 0 : index
    %25 = vector.load %arg3[%c0_26, %c0_27] : memref<64x1xf32, #tpu.memory_space<vmem>>, vector<64x1xf32>
    %26 = vector.broadcast %25 : vector<64x1xf32> to vector<64x1024xf32>
    %27 = arith.addf %24, %26 : vector<64x1024xf32>
    %cst_28 = arith.constant 0.000000e+00 : f32
    %28 = vector.broadcast %cst_28 : f32 to vector<64x1024xf32>
    %29 = arith.maximumf %27, %28 : vector<64x1024xf32>
    %cst_29 = arith.constant 0.000000e+00 : f32
    %30 = vector.broadcast %cst_29 : f32 to vector<8x1280xf32>
    %c0_30 = arith.constant 0 : index
    %c0_31 = arith.constant 0 : index
    %31 = vector.load %arg12[%c0_30, %c0_31] : memref<80x1280xf32, #tpu.memory_space<vmem>>, vector<8x1280xf32>
    tpu.vector_store %arg12[%c0_30, %c0_31], %30 {strides = array<i32>} : memref<80x1280xf32, #tpu.memory_space<vmem>>, vector<8x1280xf32>,
    %cst_32 = arith.constant 0.000000e+00 : f32
    %32 = vector.broadcast %cst_32 : f32 to vector<8x1280xf32>
    %c72_33 = arith.constant 72 : index
    %c0_34 = arith.constant 0 : index
    %33 = vector.load %arg12[%c72_33, %c0_34] : memref<80x1280xf32, #tpu.memory_space<vmem>>, vector<8x1280xf32>
    tpu.vector_store %arg12[%c72_33, %c0_34], %32 {strides = array<i32>} : memref<80x1280xf32, #tpu.memory_space<vmem>>, vector<8x1280xf32>,
    %cst_35 = arith.constant 0.000000e+00 : f32
    %34 = vector.broadcast %cst_35 : f32 to vector<80x128xf32>
    %c0_36 = arith.constant 0 : index
    %c0_37 = arith.constant 0 : index
    %35 = vector.load %arg12[%c0_36, %c0_37] : memref<80x1280xf32, #tpu.memory_space<vmem>>, vector<80x128xf32>
    tpu.vector_store %arg12[%c0_36, %c0_37], %34 {strides = array<i32>} : memref<80x1280xf32, #tpu.memory_space<vmem>>, vector<80x128xf32>,
    %cst_38 = arith.constant 0.000000e+00 : f32
    %36 = vector.broadcast %cst_38 : f32 to vector<80x128xf32>
    %c0_39 = arith.constant 0 : index
    %c1152_40 = arith.constant 1152 : index
    %37 = vector.load %arg12[%c0_39, %c1152_40] : memref<80x1280xf32, #tpu.memory_space<vmem>>, vector<80x128xf32>
    tpu.vector_store %arg12[%c0_39, %c1152_40], %36 {strides = array<i32>} : memref<80x1280xf32, #tpu.memory_space<vmem>>, vector<80x128xf32>,
    %c8_41 = arith.constant 8 : index
    %c128_42 = arith.constant 128 : index
    %38 = vector.load %arg12[%c8_41, %c128_42] : memref<80x1280xf32, #tpu.memory_space<vmem>>, vector<64x1024xf32>
    tpu.vector_store %arg12[%c8_41, %c128_42], %29 {strides = array<i32>} : memref<80x1280xf32, #tpu.memory_space<vmem>>, vector<64x1024xf32>,
    %c0_43 = arith.constant 0 : index
    %c0_44 = arith.constant 0 : index
    %c0_45 = arith.constant 0 : index
    %39 = vector.load %arg4[%c0_43, %c0_44, %c0_45] : memref<3x128x80xf32, #tpu.memory_space<vmem>>, vector<1x128x80xf32>
    %40 = vector.shape_cast %39 : vector<1x128x80xf32> to vector<128x80xf32>
    %c0_46 = arith.constant 0 : index
    %c0_47 = arith.constant 0 : index
    %41 = vector.load %arg12[%c0_46, %c0_47] : memref<80x1280xf32, #tpu.memory_space<vmem>>, vector<80x1024xf32>
    %cst_48 = arith.constant dense<0.000000e+00> : vector<128x1024xf32>
    %42 = tpu.matmul %40, %41, %cst_48 {dimension_numbers = #tpu.dot_dimension_numbers<[1], [0], [0], [1], [0, 0, 1, 1], [], []>} : vector<128x80xf32>, vector<80x1024xf32>, vector<128x1024xf32> -> vector<128x1024xf32>
    %c1_49 = arith.constant 1 : index
    %c0_50 = arith.constant 0 : index
    %c0_51 = arith.constant 0 : index
    %43 = vector.load %arg4[%c1_49, %c0_50, %c0_51] : memref<3x128x80xf32, #tpu.memory_space<vmem>>, vector<1x128x80xf32>
    %44 = vector.shape_cast %43 : vector<1x128x80xf32> to vector<128x80xf32>
    %c0_52 = arith.constant 0 : index
    %c128_53 = arith.constant 128 : index
    %45 = vector.load %arg12[%c0_52, %c128_53] : memref<80x1280xf32, #tpu.memory_space<vmem>>, vector<80x1024xf32>
    %cst_54 = arith.constant dense<0.000000e+00> : vector<128x1024xf32>
    %46 = tpu.matmul %44, %45, %cst_54 {dimension_numbers = #tpu.dot_dimension_numbers<[1], [0], [0], [1], [0, 0, 1, 1], [], []>} : vector<128x80xf32>, vector<80x1024xf32>, vector<128x1024xf32> -> vector<128x1024xf32>
    %47 = arith.addf %42, %46 : vector<128x1024xf32>
    %c2_55 = arith.constant 2 : index
    %c0_56 = arith.constant 0 : index
    %c0_57 = arith.constant 0 : index
    %48 = vector.load %arg4[%c2_55, %c0_56, %c0_57] : memref<3x128x80xf32, #tpu.memory_space<vmem>>, vector<1x128x80xf32>
    %49 = vector.shape_cast %48 : vector<1x128x80xf32> to vector<128x80xf32>
    %c0_58 = arith.constant 0 : index
    %c256_59 = arith.constant 256 : index
    %50 = vector.load %arg12[%c0_58, %c256_59] : memref<80x1280xf32, #tpu.memory_space<vmem>>, vector<80x1024xf32>
    %cst_60 = arith.constant dense<0.000000e+00> : vector<128x1024xf32>
    %51 = tpu.matmul %49, %50, %cst_60 {dimension_numbers = #tpu.dot_dimension_numbers<[1], [0], [0], [1], [0, 0, 1, 1], [], []>} : vector<128x80xf32>, vector<80x1024xf32>, vector<128x1024xf32> -> vector<128x1024xf32>
    %52 = arith.addf %47, %51 : vector<128x1024xf32>
    %c0_61 = arith.constant 0 : index
    %c0_62 = arith.constant 0 : index
    %53 = vector.load %arg5[%c0_61, %c0_62] : memref<128x1xf32, #tpu.memory_space<vmem>>, vector<128x1xf32>
    %54 = vector.broadcast %53 : vector<128x1xf32> to vector<128x1024xf32>
    %55 = arith.addf %52, %54 : vector<128x1024xf32>
    %cst_63 = arith.constant 0.000000e+00 : f32
    %56 = vector.broadcast %cst_63 : f32 to vector<128x1024xf32>
    %57 = arith.maximumf %55, %56 : vector<128x1024xf32>
    %58 = vector.extract_strided_slice %57 {offsets = [0, 0], sizes = [128, 128], strides = [1, 1]} : vector<128x1024xf32> to vector<128x128xf32>
    %59 = vector.extract_strided_slice %57 {offsets = [0, 128], sizes = [128, 128], strides = [1, 1]} : vector<128x1024xf32> to vector<128x128xf32>
    %60 = vector.extract_strided_slice %57 {offsets = [0, 256], sizes = [128, 128], strides = [1, 1]} : vector<128x1024xf32> to vector<128x128xf32>
    %61 = vector.extract_strided_slice %57 {offsets = [0, 384], sizes = [128, 128], strides = [1, 1]} : vector<128x1024xf32> to vector<128x128xf32>
    %62 = vector.extract_strided_slice %57 {offsets = [0, 512], sizes = [128, 128], strides = [1, 1]} : vector<128x1024xf32> to vector<128x128xf32>
    %63 = vector.extract_strided_slice %57 {offsets = [0, 640], sizes = [128, 128], strides = [1, 1]} : vector<128x1024xf32> to vector<128x128xf32>
    %64 = vector.extract_strided_slice %57 {offsets = [0, 768], sizes = [128, 128], strides = [1, 1]} : vector<128x1024xf32> to vector<128x128xf32>
    %65 = vector.extract_strided_slice %57 {offsets = [0, 896], sizes = [128, 128], strides = [1, 1]} : vector<128x1024xf32> to vector<128x128xf32>
    %66 = tpu.concatenate %58, %59, %60, %61, %62, %63, %64, %65 in 0 : vector<128x128xf32>, vector<128x128xf32>, vector<128x128xf32>, vector<128x128xf32>, vector<128x128xf32>, vector<128x128xf32>, vector<128x128xf32>, vector<128x128xf32> -> vector<1024x128xf32>
    %c0_64 = arith.constant 0 : index
    %c0_65 = arith.constant 0 : index
    %67 = vector.load %arg6[%c0_64, %c0_65] : memref<8x1024xf32, #tpu.memory_space<vmem>>, vector<8x1024xf32>
    %cst_66 = arith.constant dense<0.000000e+00> : vector<8x128xf32>
    %68 = tpu.matmul %67, %66, %cst_66 {dimension_numbers = #tpu.dot_dimension_numbers<[1], [0], [0], [1], [0, 0, 1, 1], [], []>} : vector<8x1024xf32>, vector<1024x128xf32>, vector<8x128xf32> -> vector<8x128xf32>
    %c0_67 = arith.constant 0 : index
    %c0_68 = arith.constant 0 : index
    %69 = vector.load %arg7[%c0_67, %c0_68] : memref<8x1xf32, #tpu.memory_space<vmem>>, vector<8x1xf32>
    %70 = vector.broadcast %69 : vector<8x1xf32> to vector<8x128xf32>
    %71 = arith.addf %68, %70 : vector<8x128xf32>
    %c0_69 = arith.constant 0 : index
    %c0_70 = arith.constant 0 : index
    %72 = vector.load %arg8[%c0_69, %c0_70] : memref<13x8xf32, #tpu.memory_space<vmem>>, vector<13x8xf32>
    %cst_71 = arith.constant dense<0.000000e+00> : vector<13x128xf32>
    %73 = tpu.matmul %72, %71, %cst_71 {dimension_numbers = #tpu.dot_dimension_numbers<[1], [0], [0], [1], [0, 0, 1, 1], [], []>} : vector<13x8xf32>, vector<8x128xf32>, vector<13x128xf32> -> vector<13x128xf32>
    %c0_72 = arith.constant 0 : index
    %c0_73 = arith.constant 0 : index
    %74 = vector.load %arg9[%c0_72, %c0_73] : memref<13x1xf32, #tpu.memory_space<vmem>>, vector<13x1xf32>
    %75 = vector.broadcast %74 : vector<13x1xf32> to vector<13x128xf32>
    %76 = arith.addf %73, %75 : vector<13x128xf32>
    %cst_74 = arith.constant 0.000000e+00 : f32
    %77 = vector.broadcast %cst_74 : f32 to vector<13x128xf32>
    %78 = arith.subf %77, %76 : vector<13x128xf32>
    %79 = math.exp %78 : vector<13x128xf32>
    %cst_75 = arith.constant 1.000000e+00 : f32
    %80 = vector.broadcast %cst_75 : f32 to vector<13x128xf32>
    %81 = arith.addf %80, %79 : vector<13x128xf32>
    %cst_76 = arith.constant 1.300000e+01 : f32
    %82 = vector.broadcast %cst_76 : f32 to vector<13x128xf32>
    %83 = arith.divf %82, %81 : vector<13x128xf32>
    %c0_77 = arith.constant 0 : index
    %c0_78 = arith.constant 0 : index
    %84 = vector.load %arg10[%c0_77, %c0_78] : memref<13x128xf32, #tpu.memory_space<vmem>>, vector<13x128xf32>
    tpu.vector_store %arg10[%c0_77, %c0_78], %83 {strides = array<i32>} : memref<13x128xf32, #tpu.memory_space<vmem>>, vector<13x128xf32>,
    return
  }
  func.func @transform_0(%arg0: i32) -> (i32, i32, i32) {
    %c0_i32 = arith.constant 0 : i32
    %c0_i32_0 = arith.constant 0 : i32
    %c0_i32_1 = arith.constant 0 : i32
    return %arg0, %c0_i32, %c0_i32_0 : i32, i32, i32
  }
  func.func @transform_1(%arg0: i32) -> (i32, i32, i32) {
    %c0_i32 = arith.constant 0 : i32
    %c0_i32_0 = arith.constant 0 : i32
    %c0_i32_1 = arith.constant 0 : i32
    %c0_i32_2 = arith.constant 0 : i32
    return %c0_i32, %c0_i32_0, %c0_i32_1 : i32, i32, i32
  }
  func.func @transform_2(%arg0: i32) -> (i32, i32) {
    %c0_i32 = arith.constant 0 : i32
    %c0_i32_0 = arith.constant 0 : i32
    %c0_i32_1 = arith.constant 0 : i32
    return %c0_i32, %c0_i32_0 : i32, i32
  }
  func.func @transform_3(%arg0: i32) -> (i32, i32, i32) {
    %c0_i32 = arith.constant 0 : i32
    %c0_i32_0 = arith.constant 0 : i32
    %c0_i32_1 = arith.constant 0 : i32
    %c0_i32_2 = arith.constant 0 : i32
    return %c0_i32, %c0_i32_0, %c0_i32_1 : i32, i32, i32
  }
  func.func @transform_4(%arg0: i32) -> (i32, i32) {
    %c0_i32 = arith.constant 0 : i32
    %c0_i32_0 = arith.constant 0 : i32
    %c0_i32_1 = arith.constant 0 : i32
    return %c0_i32, %c0_i32_0 : i32, i32
  }
  func.func @transform_5(%arg0: i32) -> (i32, i32) {
    %c0_i32 = arith.constant 0 : i32
    %c0_i32_0 = arith.constant 0 : i32
    %c0_i32_1 = arith.constant 0 : i32
    return %c0_i32, %c0_i32_0 : i32, i32
  }
  func.func @transform_6(%arg0: i32) -> (i32, i32) {
    %c0_i32 = arith.constant 0 : i32
    %c0_i32_0 = arith.constant 0 : i32
    %c0_i32_1 = arith.constant 0 : i32
    return %c0_i32, %c0_i32_0 : i32, i32
  }
  func.func @transform_7(%arg0: i32) -> (i32, i32) {
    %c0_i32 = arith.constant 0 : i32
    %c0_i32_0 = arith.constant 0 : i32
    %c0_i32_1 = arith.constant 0 : i32
    return %c0_i32, %c0_i32_0 : i32, i32
  }
  func.func @transform_8(%arg0: i32) -> (i32, i32) {
    %c0_i32 = arith.constant 0 : i32
    %c0_i32_0 = arith.constant 0 : i32
    %c0_i32_1 = arith.constant 0 : i32
    return %c0_i32, %c0_i32_0 : i32, i32
  }
  func.func @transform_9(%arg0: i32) -> (i32, i32) {
    %c0_i32 = arith.constant 0 : i32
    %c0_i32_0 = arith.constant 0 : i32
    return %c0_i32, %arg0 : i32, i32
  }
}

</mosaic_0001>

<bundles_post_ra>
// kernel: net_forward.1
= control target key start
LH: loop header
LB: loop body
LE: loop exit
PB: predicated region body
PF: predicated region fallthrough
CT: control target
= control target key end

     0   :  { %vm307_vm0 = vcmask 654336   ;;  %v9914_v33 = vmov 0.0   ;;  %vm4389_vm1 = vcmask 64512   ;;  %s9904_s0 = inlined_call_operand.vmem [shape: f32[1,64,1024], index: 0, kind: input, shape index: {}]   ;;  %s9905_s1 = inlined_call_operand.vmem [shape: f32[3,64,80], index: 1, kind: input, shape index: {}]   ;;  %s9906_s2 = inlined_call_operand.vmem [shape: f32[64,1], index: 2, kind: input, shape index: {}]   ;;  %s9907_s4 = inlined_call_operand.vmem [shape: f32[128,1], index: 4, kind: input, shape index: {}]   ;;  %s9908_s6 = inlined_call_operand.vmem [shape: f32[8,1], index: 6, kind: input, shape index: {}]   ;;  %s9909_s8 = inlined_call_operand.vmem [shape: f32[13,1], index: 8, kind: input, shape index: {}]   ;;  %s9910_s3 = inlined_call_operand.vmem [shape: f32[3,128,80], index: 3, kind: input, shape index: {}]   ;;  %s9911_s5 = inlined_call_operand.vmem [shape: f32[8,1024], index: 5, kind: input, shape index: {}]   ;;  %s9912_s7 = inlined_call_operand.vmem [shape: f32[13,8], index: 7, kind: input, shape index: {}]   ;;  %s9913_s9 = inlined_call_operand.vmem [shape: f32[13,128], index: 9, kind: output, shape index: {}]  }
   0x1   :  { %v5158_v0 = vld [vmem:[%s9904_s0 + $0x1c0] sm:$0xff]  ;;  %v5163_v1 = vld [vmem:[%s9904_s0 + $0x1c8] sm:$0xff]  ;;  %v5168_v2 = vld [vmem:[%s9904_s0 + $0x1d0] sm:$0xff] }
   0x2   :  { %339 = vmatpush.msra.mxu0 %v5158_v0  ;;  %380 = vmatpush.msra.mxu1 %v5163_v1  ;;  %v5175_v3 = vld [vmem:[%s9904_s0 + $0x1d8] sm:$0xff]  ;;  %v5180_v4 = vld [vmem:[%s9904_s0 + $0x180] sm:$0xff]  ;;  %v5185_v5 = vld [vmem:[%s9904_s0 + $0x188] sm:$0xff] }
   0x3   :  { %421 = vmatpush.msra.mxu2 %v5168_v2  ;;  %462 = vmatpush.msra.mxu3 %v5175_v3  ;;  %v5192_v6 = vld [vmem:[%s9904_s0 + $0x190] sm:$0xff]  ;;  %v5197_v7 = vld [vmem:[%s9904_s0 + $0x198] sm:$0xff]  ;;  %v5202_v8 = vld [vmem:[%s9904_s0 + $0x140] sm:$0xff] }
   0x4   :  { %340 = vmatpush.msra.mxu0 %v5180_v4  ;;  %381 = vmatpush.msra.mxu1 %v5185_v5  ;;  %v5209_v9 = vld [vmem:[%s9904_s0 + $0x148] sm:$0xff]  ;;  %v5214_v10 = vld [vmem:[%s9904_s0 + $0x150] sm:$0xff]  ;;  %v5219_v11 = vld [vmem:[%s9904_s0 + $0x158] sm:$0xff] }
   0x5   :  { %422 = vmatpush.msra.mxu2 %v5192_v6  ;;  %463 = vmatpush.msra.mxu3 %v5197_v7  ;;  %v5226_v12 = vld [vmem:[%s9904_s0 + $0x100] sm:$0xff]  ;;  %v5231_v13 = vld [vmem:[%s9904_s0 + $0x108] sm:$0xff]  ;;  %v5238_v14 = vld [vmem:[%s9904_s0 + $0x110] sm:$0xff] }
   0x6   :  { %341 = vmatpush.msra.mxu0 %v5202_v8  ;;  %382 = vmatpush.msra.mxu1 %v5209_v9  ;;  %v5243_v15 = vld [vmem:[%s9904_s0 + $0x118] sm:$0xff]  ;;  %v5250_v16 = vld [vmem:[%s9904_s0 + $0xc0] sm:$0xff]  ;;  %v5255_v17 = vld [vmem:[%s9904_s0 + $0xc8] sm:$0xff] }
   0x7   :  { %423 = vmatpush.msra.mxu2 %v5214_v10  ;;  %464 = vmatpush.msra.mxu3 %v5219_v11  ;;  %v5262_v18 = vld [vmem:[%s9904_s0 + $0xd0] sm:$0xff]  ;;  %v5267_v19 = vld [vmem:[%s9904_s0 + $0xd8] sm:$0xff]  ;;  %v5274_v20 = vld [vmem:[%s9904_s0 + $0x80] sm:$0xff] }
   0x8   :  { %342 = vmatpush.msra.mxu0 %v5226_v12  ;;  %383 = vmatpush.msra.mxu1 %v5231_v13  ;;  %v5279_v21 = vld [vmem:[%s9904_s0 + $0x88] sm:$0xff]  ;;  %v5286_v22 = vld [vmem:[%s9904_s0 + $0x90] sm:$0xff]  ;;  %v5291_v23 = vld [vmem:[%s9904_s0 + $0x98] sm:$0xff] }
   0x9   :  { %424 = vmatpush.msra.mxu2 %v5238_v14  ;;  %465 = vmatpush.msra.mxu3 %v5243_v15  ;;  %v5298_v24 = vld [vmem:[%s9904_s0 + $0x40] sm:$0xff]  ;;  %v5303_v25 = vld [vmem:[%s9904_s0 + $0x48] sm:$0xff]  ;;  %v5310_v26 = vld [vmem:[%s9904_s0 + $0x50] sm:$0xff] }
   0xa   :  { %343 = vmatpush.msra.mxu0 %v5250_v16  ;;  %384 = vmatpush.msra.mxu1 %v5255_v17  ;;  %v5315_v27 = vld [vmem:[%s9904_s0 + $0x58] sm:$0xff]  ;;  %v5322_v28 = vld [vmem:[%s9904_s0] sm:$0xff]  ;;  %v5327_v29 = vld [vmem:[%s9904_s0 + $0x8] sm:$0xff] }
   0xb   :  { %425 = vmatpush.msra.mxu2 %v5262_v18  ;;  %466 = vmatpush.msra.mxu3 %v5267_v19  ;;  %v5334_v30 = vld [vmem:[%s9904_s0 + $0x10] sm:$0xff]  ;;  %v5339_v31 = vld [vmem:[%s9904_s0 + $0x18] sm:$0xff]  ;;  %v5350_v32 = vld [vmem:[%s9905_s1 + $0x40] sm:$0xff] }
   0xc   :  { %344 = vmatpush.msra.mxu0 %v5274_v20  ;;  %385 = vmatpush.msra.mxu1 %v5279_v21  ;;  %v5367_v34 = vld [vmem:[%s9905_s1 + $0x48] sm:$0xff]  ;;  %v5380_v35 = vld [vmem:[%s9904_s0 + $0x1e0] sm:$0xff]  ;;  %v5390_v37 = vld [vmem:[%s9904_s0 + $0x1f0] sm:$0xff] }
   0xd   :  { %426 = vmatpush.msra.mxu2 %v5286_v22  ;;  %467 = vmatpush.msra.mxu3 %v5291_v23  ;;  %v5385_v36 = vld [vmem:[%s9904_s0 + $0x1e8] sm:$0xff]  ;;  %v5397_v38 = vld [vmem:[%s9904_s0 + $0x1f8] sm:$0xff]  ;;  %v5404_v39 = vld [vmem:[%s9905_s1 + $0x50] sm:$0xff] }
   0xe   :  { %345 = vmatpush.msra.mxu0 %v5298_v24  ;;  %386 = vmatpush.msra.mxu1 %v5303_v25  ;;  %10054 = vst [vmem:[#allocation4_spill] sm:$0xff] %v5397_v38  ;;  %v5417_v40 = vld [vmem:[%s9904_s0 + $0x1a0] sm:$0xff]  ;;  %v5422_v41 = vld [vmem:[%s9904_s0 + $0x1a8] sm:$0xff]  ;;  %v5427_v42 = vld [vmem:[%s9904_s0 + $0x1b0] sm:$0xff] }
   0xf   :  { %427 = vmatpush.msra.mxu2 %v5310_v26  ;;  %468 = vmatpush.msra.mxu3 %v5315_v27  ;;  %v5434_v43 = vld [vmem:[%s9904_s0 + $0x1b8] sm:$0xff]  ;;  %v5439_v44 = vld [vmem:[%s9904_s0 + $0x160] sm:$0xff]  ;;  %v5444_v45 = vld [vmem:[%s9904_s0 + $0x168] sm:$0xff] }
  0x10   :  { %346 = vmatpush.msra.mxu0 %v5322_v28  ;;  %387 = vmatpush.msra.mxu1 %v5327_v29  ;;  %10055 = vst [vmem:[#allocation5_spill] sm:$0xff] %v5434_v43  ;;  %v5451_v46 = vld [vmem:[%s9904_s0 + $0x170] sm:$0xff]  ;;  %v5456_v47 = vld [vmem:[%s9904_s0 + $0x178] sm:$0xff]  ;;  %v5461_v48 = vld [vmem:[%s9904_s0 + $0x120] sm:$0xff] }
  0x11   :  { %428 = vmatpush.msra.mxu2 %v5334_v30  ;;  %469 = vmatpush.msra.mxu3 %v5339_v31  ;;  %10056 = vst [vmem:[#allocation6_spill] sm:$0xff] %v5456_v47  ;;  %v5468_v49 = vld [vmem:[%s9904_s0 + $0x128] sm:$0xff]  ;;  %v5473_v50 = vld [vmem:[%s9904_s0 + $0x130] sm:$0xff]  ;;  %v5478_v51 = vld [vmem:[%s9904_s0 + $0x138] sm:$0xff] }
  0x12   :  { %347 = vmatpush.msra.mxu0 %v9914_v33  ;;  %388 = vmatpush.msra.mxu1 %v9914_v33  ;;  %10057 = vst [vmem:[#allocation7_spill] sm:$0xff] %v5478_v51  ;;  %v5483_v52 = vld [vmem:[%s9905_s1 + $0x58] sm:$0xff]  ;;  %v5494_v53 = vld [vmem:[%s9904_s0 + $0xe0] sm:$0xff]  ;;  %v5499_v54 = vld [vmem:[%s9904_s0 + $0xe8] sm:$0xff] }
  0x13   :  { %429 = vmatpush.msra.mxu2 %v9914_v33  ;;  %470 = vmatpush.msra.mxu3 %v9914_v33  ;;  %v5508_v55 = vld [vmem:[%s9904_s0 + $0xf0] sm:$0xff]  ;;  %v5513_v56 = vld [vmem:[%s9904_s0 + $0xf8] sm:$0xff]  ;;  %v5522_v57 = vld [vmem:[%s9904_s0 + $0xa0] sm:$0xff] }
  0x14   :  { %4471 = vmatmul.msk.f32.vlgmr.msra.gmra.mxu0 %vm307_vm0, %v5350_v32  ;;  %4479 = vmatmul.msk.f32.vlgmr.msra.gmra.mxu1 %vm307_vm0, %v5350_v32  ;;  %10058 = vst [vmem:[#allocation8_spill] sm:$0xff] %v5513_v56  ;;  %v5527_v58 = vld [vmem:[%s9904_s0 + $0xa8] sm:$0xff]  ;;  %v5534_v59 = vld [vmem:[%s9904_s0 + $0xb0] sm:$0xff]  ;;  %v5539_v60 = vld [vmem:[%s9904_s0 + $0xb8] sm:$0xff] }
  0x15   :  { %4487 = vmatmul.msk.f32.vlgmr.msra.gmra.mxu2 %vm307_vm0, %v5350_v32  ;;  %4495 = vmatmul.msk.f32.vlgmr.msra.gmra.mxu3 %vm307_vm0, %v5350_v32  ;;  %10059 = vst [vmem:[#allocation9_spill] sm:$0xff] %v5539_v60  ;;  %v5546_v61 = vld [vmem:[%s9904_s0 + $0x60] sm:$0xff]  ;;  %v5551_v62 = vld [vmem:[%s9904_s0 + $0x68] sm:$0xff]  ;;  %v5558_v63 = vld [vmem:[%s9904_s0 + $0x70] sm:$0xff] }
  0x16   :  { %503 = vmatpush.msrb.mxu0 %v5380_v35  ;;  %544 = vmatpush.msrb.mxu1 %v5385_v36  ;;  %v5563_v33 = vld [vmem:[%s9904_s0 + $0x78] sm:$0xff] }
  0x17   :  { %585 = vmatpush.msrb.mxu2 %v5390_v37  ;;  %626 = vmatpush.msrb.mxu3 %v5397_v38  ;;  %10060 = vst [vmem:[#allocation10_spill] sm:$0xff] %v5563_v33  ;;  %v5613_v38 = vld [vmem:[%s9905_s1 + $0x68] sm:$0xff] }
  0x18   :  { %504 = vmatpush.msrb.mxu0 %v5417_v40  ;;  %545 = vmatpush.msrb.mxu1 %v5422_v41 }
  0x19   :  { %586 = vmatpush.msrb.mxu2 %v5427_v42  ;;  %627 = vmatpush.msrb.mxu3 %v5434_v43  ;;  %v10061_v43 = vmov 0.0  }
  0x1a   :  { %505 = vmatpush.msrb.mxu0 %v5439_v44  ;;  %546 = vmatpush.msrb.mxu1 %v5444_v45 }
  0x1b   :  { %587 = vmatpush.msrb.mxu2 %v5451_v46  ;;  %628 = vmatpush.msrb.mxu3 %v5456_v47  ;;  %v5584_v47 = vld [vmem:[%s9904_s0 + $0x28] sm:$0xff] }
  0x1c   :  { %4472 = vmatmul.msk.f32.gmra.mxu0 %vm307_vm0, %v5367_v34  ;;  %4480 = vmatmul.msk.f32.gmra.mxu1 %vm307_vm0, %v5367_v34 }
  0x1d   :  { %4488 = vmatmul.msk.f32.gmra.mxu2 %vm307_vm0, %v5367_v34  ;;  %4496 = vmatmul.msk.f32.gmra.mxu3 %vm307_vm0, %v5367_v34 }
  0x1e   :  { %506 = vmatpush.msrb.mxu0 %v5461_v48  ;;  %547 = vmatpush.msrb.mxu1 %v5468_v49 }
  0x1f   :  { %588 = vmatpush.msrb.mxu2 %v5473_v50  ;;  %629 = vmatpush.msrb.mxu3 %v5478_v51  ;;  %v5579_v51 = vld [vmem:[%s9904_s0 + $0x20] sm:$0xff] }
  0x20   :  { %507 = vmatpush.msrb.mxu0 %v5494_v53  ;;  %548 = vmatpush.msrb.mxu1 %v5499_v54 }
  0x21   :  { %589 = vmatpush.msrb.mxu2 %v5508_v55  ;;  %630 = vmatpush.msrb.mxu3 %v5513_v56  ;;  %v5568_v56 = vld [vmem:[%s9905_s1 + $0x60] sm:$0xff] }
  0x22   :  { %508 = vmatpush.msrb.mxu0 %v5522_v57  ;;  %549 = vmatpush.msrb.mxu1 %v5527_v58 }
  0x23   :  { %590 = vmatpush.msrb.mxu2 %v5534_v59  ;;  %631 = vmatpush.msrb.mxu3 %v5539_v60  ;;  %v5598_v60 = vld [vmem:[%s9904_s0 + $0x38] sm:$0xff] }
  0x24   :  { %4473 = vmatmul.msk.f32.gmra.mxu0 %vm307_vm0, %v5404_v39  ;;  %4481 = vmatmul.msk.f32.gmra.mxu1 %vm307_vm0, %v5404_v39 }
  0x25   :  { %4489 = vmatmul.msk.f32.gmra.mxu2 %vm307_vm0, %v5404_v39  ;;  %4497 = vmatmul.msk.f32.gmra.mxu3 %vm307_vm0, %v5404_v39 }
  0x26   :  { %509 = vmatpush.msrb.mxu0 %v5546_v61  ;;  %550 = vmatpush.msrb.mxu1 %v5551_v62 }
  0x27   :  { %591 = vmatpush.msrb.mxu2 %v5558_v63  ;;  %632 = vmatpush.msrb.mxu3 %v5563_v33  ;;  %v5593_v33 = vld [vmem:[%s9904_s0 + $0x30] sm:$0xff] }
  0x28   :  { %510 = vmatpush.msrb.mxu0 %v5579_v51  ;;  %551 = vmatpush.msrb.mxu1 %v5584_v47 }
  0x29   :  { %592 = vmatpush.msrb.mxu2 %v5593_v33  ;;  %633 = vmatpush.msrb.mxu3 %v5598_v60 }
  0x2a   :  { %511 = vmatpush.msrb.mxu0 %v10061_v43  ;;  %552 = vmatpush.msrb.mxu1 %v10061_v43 }
  0x2b   :  { %593 = vmatpush.msrb.mxu2 %v10061_v43  ;;  %634 = vmatpush.msrb.mxu3 %v10061_v43 }
  0x2c   :  { %4474 = vmatmul.msk.f32.gmra.mxu0 %vm307_vm0, %v5483_v52  ;;  %4482 = vmatmul.msk.f32.gmra.mxu1 %vm307_vm0, %v5483_v52 }
  0x2d   :  { %4490 = vmatmul.msk.f32.gmra.mxu2 %vm307_vm0, %v5483_v52  ;;  %4498 = vmatmul.msk.f32.gmra.mxu3 %vm307_vm0, %v5483_v52 }
  0x2e   :  { %732 = vmatpush.msra.mxu1 %v5158_v0  ;;  %773 = vmatpush.msra.mxu2 %v5163_v1  ;;  %v5637_v0 = vld [vmem:[%s9905_s1 + $0x70] sm:$0xff] }
  0x2f   :  { %814 = vmatpush.msra.mxu3 %v5168_v2  ;;  %699 = vmatpush.msra.mxu0 %v10061_v43 }
  0x30   :  { %733 = vmatpush.msra.mxu1 %v5180_v4  ;;  %774 = vmatpush.msra.mxu2 %v5185_v5  ;;  %v5659_v4 = vld [vmem:[%s9905_s1 + $0x78] sm:$0xff] }
  0x31   :  { %815 = vmatpush.msra.mxu3 %v5192_v6 }
  0x32   :  { %734 = vmatpush.msra.mxu1 %v5202_v8  ;;  %775 = vmatpush.msra.mxu2 %v5209_v9 }
  0x33   :  { %816 = vmatpush.msra.mxu3 %v5214_v10 }
  0x34   :  { %4475 = vmatmul.msk.f32.gmra.mxu0 %vm307_vm0, %v5568_v56  ;;  %4483 = vmatmul.msk.f32.gmra.mxu1 %vm307_vm0, %v5568_v56 }
  0x35   :  { %4491 = vmatmul.msk.f32.gmra.mxu2 %vm307_vm0, %v5568_v56  ;;  %4499 = vmatmul.msk.f32.gmra.mxu3 %vm307_vm0, %v5568_v56 }
  0x36   :  { %735 = vmatpush.msra.mxu1 %v5226_v12  ;;  %776 = vmatpush.msra.mxu2 %v5231_v13 }
  0x37   :  { %817 = vmatpush.msra.mxu3 %v5238_v14 }
  0x38   :  { %736 = vmatpush.msra.mxu1 %v5250_v16  ;;  %777 = vmatpush.msra.mxu2 %v5255_v17  ;;  %v5786_v16 = vld [vmem:[%s9905_s1] sm:$0xff] }
  0x39   :  { %818 = vmatpush.msra.mxu3 %v5262_v18 }
  0x3a   :  { %737 = vmatpush.msra.mxu1 %v5274_v20  ;;  %778 = vmatpush.msra.mxu2 %v5279_v21 }
  0x3b   :  { %819 = vmatpush.msra.mxu3 %v5286_v22 }
  0x3c   :  { %4476 = vmatmul.msk.f32.gmra.mxu0 %vm307_vm0, %v5613_v38  ;;  %4484 = vmatmul.msk.f32.gmra.mxu1 %vm307_vm0, %v5613_v38 }
  0x3d   :  { %4492 = vmatmul.msk.f32.gmra.mxu2 %vm307_vm0, %v5613_v38  ;;  %4500 = vmatmul.msk.f32.gmra.mxu3 %vm307_vm0, %v5613_v38 }
  0x3e   :  { %738 = vmatpush.msra.mxu1 %v5298_v24  ;;  %779 = vmatpush.msra.mxu2 %v5303_v25 }
  0x3f   :  { %820 = vmatpush.msra.mxu3 %v5310_v26 }
  0x40   :  { %739 = vmatpush.msra.mxu1 %v5322_v28  ;;  %780 = vmatpush.msra.mxu2 %v5327_v29 }
  0x41   :  { %821 = vmatpush.msra.mxu3 %v5334_v30 }
  0x42   :  { %740 = vmatpush.msra.mxu1 %v10061_v43  ;;  %781 = vmatpush.msra.mxu2 %v10061_v43 }
  0x43   :  { %822 = vmatpush.msra.mxu3 %v10061_v43 }
  0x44   :  { %4477 = vmatmul.msk.f32.gmra.mxu0 %vm307_vm0, %v5637_v0  ;;  %4485 = vmatmul.msk.f32.gmra.mxu1 %vm307_vm0, %v5637_v0 }
  0x45   :  { %4493 = vmatmul.msk.f32.gmra.mxu2 %vm307_vm0, %v5637_v0  ;;  %4501 = vmatmul.msk.f32.gmra.mxu3 %vm307_vm0, %v5637_v0 }
  0x4c   :  { %4478 = vmatmul.msk.f32.gmra.mxu0 %vm307_vm0, %v5659_v4  ;;  %4486 = vmatmul.msk.f32.gmra.mxu1 %vm307_vm0, %v5659_v4 }
  0x4d   :  { %4494 = vmatmul.msk.f32.gmra.mxu2 %vm307_vm0, %v5659_v4  ;;  %4502 = vmatmul.msk.f32.gmra.mxu3 %vm307_vm0, %v5659_v4 }
  0x54   :  { %4503 = vmatmul.msk.f32.vlgmr.msrb.gmra.mxu0 %vm307_vm0, %v5350_v32  ;;  %4511 = vmatmul.msk.f32.vlgmr.msrb.gmra.mxu1 %vm307_vm0, %v5350_v32 }
  0x55   :  { %4519 = vmatmul.msk.f32.vlgmr.msrb.gmra.mxu2 %vm307_vm0, %v5350_v32  ;;  %4527 = vmatmul.msk.f32.vlgmr.msrb.gmra.mxu3 %vm307_vm0, %v5350_v32 }
  0x56   :  { %855 = vmatpush.msrb.mxu0 %v5175_v3  ;;  %896 = vmatpush.msrb.mxu1 %v5380_v35 }
  0x57   :  { %937 = vmatpush.msrb.mxu2 %v5385_v36  ;;  %978 = vmatpush.msrb.mxu3 %v5390_v37 }
  0x58   :  { %856 = vmatpush.msrb.mxu0 %v5197_v7  ;;  %897 = vmatpush.msrb.mxu1 %v5417_v40 }
  0x59   :  { %938 = vmatpush.msrb.mxu2 %v5422_v41  ;;  %979 = vmatpush.msrb.mxu3 %v5427_v42 }
  0x5a   :  { %857 = vmatpush.msrb.mxu0 %v5219_v11  ;;  %898 = vmatpush.msrb.mxu1 %v5439_v44 }
  0x5b   :  { %939 = vmatpush.msrb.mxu2 %v5444_v45  ;;  %980 = vmatpush.msrb.mxu3 %v5451_v46 }
  0x5c   :  { %4504 = vmatmul.msk.f32.gmra.mxu0 %vm307_vm0, %v5367_v34  ;;  %4512 = vmatmul.msk.f32.gmra.mxu1 %vm307_vm0, %v5367_v34 }
  0x5d   :  { %4520 = vmatmul.msk.f32.gmra.mxu2 %vm307_vm0, %v5367_v34  ;;  %4528 = vmatmul.msk.f32.gmra.mxu3 %vm307_vm0, %v5367_v34 }
  0x5e   :  { %858 = vmatpush.msrb.mxu0 %v5243_v15  ;;  %899 = vmatpush.msrb.mxu1 %v5461_v48 }
  0x5f   :  { %940 = vmatpush.msrb.mxu2 %v5468_v49  ;;  %981 = vmatpush.msrb.mxu3 %v5473_v50 }
  0x60   :  { %859 = vmatpush.msrb.mxu0 %v5267_v19  ;;  %900 = vmatpush.msrb.mxu1 %v5494_v53 }
  0x61   :  { %941 = vmatpush.msrb.mxu2 %v5499_v54  ;;  %982 = vmatpush.msrb.mxu3 %v5508_v55 }
  0x62   :  { %860 = vmatpush.msrb.mxu0 %v5291_v23  ;;  %901 = vmatpush.msrb.mxu1 %v5522_v57 }
  0x63   :  { %942 = vmatpush.msrb.mxu2 %v5527_v58  ;;  %983 = vmatpush.msrb.mxu3 %v5534_v59 }
  0x64   :  { %4505 = vmatmul.msk.f32.gmra.mxu0 %vm307_vm0, %v5404_v39  ;;  %4513 = vmatmul.msk.f32.gmra.mxu1 %vm307_vm0, %v5404_v39 }
  0x65   :  { %4521 = vmatmul.msk.f32.gmra.mxu2 %vm307_vm0, %v5404_v39  ;;  %4529 = vmatmul.msk.f32.gmra.mxu3 %vm307_vm0, %v5404_v39 }
  0x66   :  { %861 = vmatpush.msrb.mxu0 %v5315_v27  ;;  %902 = vmatpush.msrb.mxu1 %v5546_v61 }
  0x67   :  { %943 = vmatpush.msrb.mxu2 %v5551_v62  ;;  %984 = vmatpush.msrb.mxu3 %v5558_v63 }
  0x68   :  { %862 = vmatpush.msrb.mxu0 %v5339_v31  ;;  %903 = vmatpush.msrb.mxu1 %v5579_v51 }
  0x69   :  { %944 = vmatpush.msrb.mxu2 %v5584_v47  ;;  %985 = vmatpush.msrb.mxu3 %v5593_v33 }
  0x6a   :  { %863 = vmatpush.msrb.mxu0 %v10061_v43  ;;  %904 = vmatpush.msrb.mxu1 %v10061_v43 }
  0x6b   :  { %945 = vmatpush.msrb.mxu2 %v10061_v43  ;;  %986 = vmatpush.msrb.mxu3 %v10061_v43 }
  0x6c   :  { %4506 = vmatmul.msk.f32.gmra.mxu0 %vm307_vm0, %v5483_v52  ;;  %4514 = vmatmul.msk.f32.gmra.mxu1 %vm307_vm0, %v5483_v52 }
  0x6d   :  { %4522 = vmatmul.msk.f32.gmra.mxu2 %vm307_vm0, %v5483_v52  ;;  %4530 = vmatmul.msk.f32.gmra.mxu3 %vm307_vm0, %v5483_v52 }
  0x74   :  { %4507 = vmatmul.msk.f32.gmra.mxu0 %vm307_vm0, %v5568_v56  ;;  %4515 = vmatmul.msk.f32.gmra.mxu1 %vm307_vm0, %v5568_v56 }
  0x75   :  { %4523 = vmatmul.msk.f32.gmra.mxu2 %vm307_vm0, %v5568_v56  ;;  %4531 = vmatmul.msk.f32.gmra.mxu3 %vm307_vm0, %v5568_v56 }
  0x7c   :  { %4508 = vmatmul.msk.f32.gmra.mxu0 %vm307_vm0, %v5613_v38  ;;  %4516 = vmatmul.msk.f32.gmra.mxu1 %vm307_vm0, %v5613_v38 }
  0x7d   :  { %4524 = vmatmul.msk.f32.gmra.mxu2 %vm307_vm0, %v5613_v38  ;;  %4532 = vmatmul.msk.f32.gmra.mxu3 %vm307_vm0, %v5613_v38 }
  0x84   :  { %4509 = vmatmul.msk.f32.gmra.mxu0 %vm307_vm0, %v5637_v0  ;;  %4517 = vmatmul.msk.f32.gmra.mxu1 %vm307_vm0, %v5637_v0 }
  0x85   :  { %4525 = vmatmul.msk.f32.gmra.mxu2 %vm307_vm0, %v5637_v0  ;;  %4533 = vmatmul.msk.f32.gmra.mxu3 %vm307_vm0, %v5637_v0 }
  0x8c   :  { %4510 = vmatmul.msk.f32.gmra.mxu0 %vm307_vm0, %v5659_v4  ;;  %4518 = vmatmul.msk.f32.gmra.mxu1 %vm307_vm0, %v5659_v4 }
  0x8d   :  { %4526 = vmatmul.msk.f32.gmra.mxu2 %vm307_vm0, %v5659_v4  ;;  %4534 = vmatmul.msk.f32.gmra.mxu3 %vm307_vm0, %v5659_v4 }
  0x91   :  { %v5779_v8 = vpop.f32.mrf.mxu0  ;;  %v5781_v12 = vpop.f32.mrf.mxu1 }
  0x94   :  { %4535 = vmatmul.msk.f32.vlgmr.msra.gmra.mxu0 %vm307_vm0, %v5786_v16  ;;  %4543 = vmatmul.msk.f32.vlgmr.msra.gmra.mxu1 %vm307_vm0, %v5786_v16 }
  0x95   :  { %4551 = vmatmul.msk.f32.vlgmr.msra.gmra.mxu2 %vm307_vm0, %v5786_v16  ;;  %4559 = vmatmul.msk.f32.vlgmr.msra.gmra.mxu3 %vm307_vm0, %v5786_v16 }
  0x96   :  { %1132 = vmatpush.msra.mxu0 %v5163_v1  ;;  %1173 = vmatpush.msra.mxu1 %v5168_v2  ;;  %v5813_v1 = vld [vmem:[%s9905_s1 + $0x8] sm:$0xff] }
  0x97   :  { %1214 = vmatpush.msra.mxu2 %v5175_v3  ;;  %1255 = vmatpush.msra.mxu3 %v5380_v35  ;;  %v5948_v35 = vld [vmem:[%s9905_s1 + $0x30] sm:$0xff] }
  0x98   :  { %v5800_v20 = vpop.f32.mrf.mxu2  ;;  %v5802_v24 = vpop.f32.mrf.mxu3  ;;  %1133 = vmatpush.msra.mxu0 %v5185_v5  ;;  %1174 = vmatpush.msra.mxu1 %v5192_v6 }
  0x99   :  { %v5806_v28 = vpop.f32.mrf.mxu0  ;;  %v5808_v32 = vpop.f32.mrf.mxu1  ;;  %1215 = vmatpush.msra.mxu2 %v5197_v7  ;;  %1256 = vmatpush.msra.mxu3 %v5417_v40  ;;  %v5846_v7 = vld [vmem:[%s9905_s1 + $0x10] sm:$0xff] }
  0x9a   :  { %1134 = vmatpush.msra.mxu0 %v5209_v9  ;;  %1175 = vmatpush.msra.mxu1 %v5214_v10 }
  0x9b   :  { %1216 = vmatpush.msra.mxu2 %v5219_v11  ;;  %1257 = vmatpush.msra.mxu3 %v5439_v44 }
  0x9c   :  { %4536 = vmatmul.msk.f32.gmra.mxu0 %vm307_vm0, %v5813_v1  ;;  %4544 = vmatmul.msk.f32.gmra.mxu1 %vm307_vm0, %v5813_v1 }
  0x9d   :  { %4552 = vmatmul.msk.f32.gmra.mxu2 %vm307_vm0, %v5813_v1  ;;  %4560 = vmatmul.msk.f32.gmra.mxu3 %vm307_vm0, %v5813_v1 }
  0x9e   :  { %1135 = vmatpush.msra.mxu0 %v5231_v13  ;;  %1176 = vmatpush.msra.mxu1 %v5238_v14  ;;  %v5879_v14 = vld [vmem:[%s9905_s1 + $0x18] sm:$0xff] }
  0x9f   :  { %1217 = vmatpush.msra.mxu2 %v5243_v15  ;;  %1258 = vmatpush.msra.mxu3 %v5461_v48  ;;  %v5969_v48 = vld [vmem:[%s9905_s1 + $0x38] sm:$0xff] }
  0xa0   :  { %v5833_v2 = vpop.f32.mrf.mxu2  ;;  %v5835_v3 = vpop.f32.mrf.mxu3  ;;  %1136 = vmatpush.msra.mxu0 %v5255_v17  ;;  %1177 = vmatpush.msra.mxu1 %v5262_v18 }
  0xa1   :  { %v5839_v5 = vpop.f32.mrf.mxu0  ;;  %v5841_v6 = vpop.f32.mrf.mxu1  ;;  %1218 = vmatpush.msra.mxu2 %v5267_v19  ;;  %1259 = vmatpush.msra.mxu3 %v5494_v53 }
  0xa2   :  { %1137 = vmatpush.msra.mxu0 %v5279_v21  ;;  %1178 = vmatpush.msra.mxu1 %v5286_v22  ;;  %v5906_v21 = vld [vmem:[%s9905_s1 + $0x20] sm:$0xff] }
  0xa3   :  { %1219 = vmatpush.msra.mxu2 %v5291_v23  ;;  %1260 = vmatpush.msra.mxu3 %v5522_v57  ;;  %v10071_v57 = vld [vmem:[#allocation4_spill] sm:$0xff] }
  0xa4   :  { %4537 = vmatmul.msk.f32.gmra.mxu0 %vm307_vm0, %v5846_v7  ;;  %4545 = vmatmul.msk.f32.gmra.mxu1 %vm307_vm0, %v5846_v7 }
  0xa5   :  { %4553 = vmatmul.msk.f32.gmra.mxu2 %vm307_vm0, %v5846_v7  ;;  %4561 = vmatmul.msk.f32.gmra.mxu3 %vm307_vm0, %v5846_v7 }
  0xa6   :  { %1138 = vmatpush.msra.mxu0 %v5303_v25  ;;  %1179 = vmatpush.msra.mxu1 %v5310_v26 }
  0xa7   :  { %1220 = vmatpush.msra.mxu2 %v5315_v27  ;;  %1261 = vmatpush.msra.mxu3 %v5546_v61  ;;  %v5927_v27 = vld [vmem:[%s9905_s1 + $0x28] sm:$0xff] }
  0xa8   :  { %v5866_v9 = vpop.f32.mrf.mxu2  ;;  %v5868_v10 = vpop.f32.mrf.mxu3  ;;  %1139 = vmatpush.msra.mxu0 %v5327_v29  ;;  %1180 = vmatpush.msra.mxu1 %v5334_v30 }
  0xa9   :  { %v5872_v11 = vpop.f32.mrf.mxu0  ;;  %v5874_v13 = vpop.f32.mrf.mxu1  ;;  %1221 = vmatpush.msra.mxu2 %v5339_v31  ;;  %1262 = vmatpush.msra.mxu3 %v5579_v51 }
  0xaa   :  { %1140 = vmatpush.msra.mxu0 %v10061_v43  ;;  %1181 = vmatpush.msra.mxu1 %v10061_v43 }
  0xab   :  { %1222 = vmatpush.msra.mxu2 %v10061_v43  ;;  %1263 = vmatpush.msra.mxu3 %v10061_v43 }
  0xac   :  { %4538 = vmatmul.msk.f32.gmra.mxu0 %vm307_vm0, %v5879_v14  ;;  %4546 = vmatmul.msk.f32.gmra.mxu1 %vm307_vm0, %v5879_v14 }
  0xad   :  { %4554 = vmatmul.msk.f32.gmra.mxu2 %vm307_vm0, %v5879_v14  ;;  %4562 = vmatmul.msk.f32.gmra.mxu3 %vm307_vm0, %v5879_v14 }
  0xb0   :  { %v5895_v15 = vpop.f32.mrf.mxu2  ;;  %v5897_v17 = vpop.f32.mrf.mxu3 }
  0xb1   :  { %v5899_v18 = vpop.f32.mrf.mxu0  ;;  %v5901_v19 = vpop.f32.mrf.mxu1 }
  0xb4   :  { %4539 = vmatmul.msk.f32.gmra.mxu0 %vm307_vm0, %v5906_v21  ;;  %4547 = vmatmul.msk.f32.gmra.mxu1 %vm307_vm0, %v5906_v21 }
  0xb5   :  { %4555 = vmatmul.msk.f32.gmra.mxu2 %vm307_vm0, %v5906_v21  ;;  %4563 = vmatmul.msk.f32.gmra.mxu3 %vm307_vm0, %v5906_v21 }
  0xb8   :  { %v5916_v22 = vpop.f32.mrf.mxu2  ;;  %v5918_v23 = vpop.f32.mrf.mxu3 }
  0xb9   :  { %v5920_v25 = vpop.f32.mrf.mxu0  ;;  %v5922_v26 = vpop.f32.mrf.mxu1 }
  0xbc   :  { %4540 = vmatmul.msk.f32.gmra.mxu0 %vm307_vm0, %v5927_v27  ;;  %4548 = vmatmul.msk.f32.gmra.mxu1 %vm307_vm0, %v5927_v27 }
  0xbd   :  { %4556 = vmatmul.msk.f32.gmra.mxu2 %vm307_vm0, %v5927_v27  ;;  %4564 = vmatmul.msk.f32.gmra.mxu3 %vm307_vm0, %v5927_v27 }
  0xc0   :  { %v5937_v29 = vpop.f32.mrf.mxu2  ;;  %v5939_v30 = vpop.f32.mrf.mxu3 }
  0xc1   :  { %v5941_v31 = vpop.f32.mrf.mxu0  ;;  %v5943_v34 = vpop.f32.mrf.mxu1 }
  0xc2   :  { %10062 = vst [vmem:[#allocation11_spill] sm:$0xff] %v5943_v34 }
  0xc4   :  { %4541 = vmatmul.msk.f32.gmra.mxu0 %vm307_vm0, %v5948_v35  ;;  %4549 = vmatmul.msk.f32.gmra.mxu1 %vm307_vm0, %v5948_v35 }
  0xc5   :  { %4557 = vmatmul.msk.f32.gmra.mxu2 %vm307_vm0, %v5948_v35  ;;  %4565 = vmatmul.msk.f32.gmra.mxu3 %vm307_vm0, %v5948_v35 }
  0xc8   :  { %v5958_v38 = vpop.f32.mrf.mxu2  ;;  %v5960_v39 = vpop.f32.mrf.mxu3 }
  0xc9   :  { %10063 = vst [vmem:[#allocation12_spill] sm:$0xff] %v5958_v38  ;;  %v5962_v40 = vpop.f32.mrf.mxu0  ;;  %v5964_v44 = vpop.f32.mrf.mxu1 }
  0xca   :  { %10064 = vst [vmem:[#allocation13_spill] sm:$0xff] %v5960_v39 }
  0xcb   :  { %10065 = vst [vmem:[#allocation14_spill] sm:$0xff] %v5962_v40 }
  0xcc   :  { %10066 = vst [vmem:[#allocation15_spill] sm:$0xff] %v5964_v44  ;;  %4542 = vmatmul.msk.f32.gmra.mxu0 %vm307_vm0, %v5969_v48  ;;  %4550 = vmatmul.msk.f32.gmra.mxu1 %vm307_vm0, %v5969_v48  ;;  %v3855_v44 = vld [vmem:[%s9907_s4 + $0x30] sm:$0xff] }
  0xcd   :  { %4558 = vmatmul.msk.f32.gmra.mxu2 %vm307_vm0, %v5969_v48  ;;  %4566 = vmatmul.msk.f32.gmra.mxu3 %vm307_vm0, %v5969_v48 }
  0xd0   :  { %v5979_v51 = vpop.f32.mrf.mxu2  ;;  %v5981_v52 = vpop.f32.mrf.mxu3 }
  0xd1   :  { %10067 = vst [vmem:[#allocation16_spill] sm:$0xff] %v5979_v51  ;;  %v5983_v53 = vpop.f32.mrf.mxu0  ;;  %v5985_v56 = vpop.f32.mrf.mxu1  ;;  %v6341_v51 = vld [vmem:[%s9905_s1 + $0xb0] sm:$0xff] }
  0xd2   :  { %10068 = vst [vmem:[#allocation17_spill] sm:$0xff] %v5981_v52 }
  0xd3   :  { %10069 = vst [vmem:[#allocation18_spill] sm:$0xff] %v5983_v53  ;;  %v4377_v53 = vld [vmem:[%s9909_s8] sm:$0xff] }
  0xd4   :  { %10070 = vst [vmem:[#allocation19_spill] sm:$0xff] %v5985_v56  ;;  %4567 = vmatmul.msk.f32.vlgmr.msrb.gmra.mxu0 %vm307_vm0, %v5786_v16  ;;  %4575 = vmatmul.msk.f32.vlgmr.msrb.gmra.mxu1 %vm307_vm0, %v5786_v16 }
  0xd5   :  { %4583 = vmatmul.msk.f32.vlgmr.msrb.gmra.mxu2 %vm307_vm0, %v5786_v16  ;;  %4591 = vmatmul.msk.f32.vlgmr.msrb.gmra.mxu3 %vm307_vm0, %v5786_v16  ;;  %v10076_v16 = vld [vmem:[#allocation5_spill] sm:$0xff] }
  0xd6   :  { %1296 = vmatpush.msrb.mxu0 %v5385_v36  ;;  %1337 = vmatpush.msrb.mxu1 %v5390_v37  ;;  %v10077_v36 = vld [vmem:[#allocation6_spill] sm:$0xff]  ;;  %v10078_v37 = vld [vmem:[#allocation7_spill] sm:$0xff] }
  0xd7   :  { %1378 = vmatpush.msrb.mxu2 %v10071_v57  ;;  %1427 = vmatpush.msrb.mxu3 %v10061_v43  ;;  %v10083_v57 = vld [vmem:[#allocation8_spill] sm:$0xff] }
  0xd8   :  { %v5999_v61 = vpop.f32.mrf.mxu2  ;;  %v6001_v0 = vpop.f32.mrf.mxu3  ;;  %1297 = vmatpush.msrb.mxu0 %v5422_v41  ;;  %1338 = vmatpush.msrb.mxu1 %v5427_v42 }
  0xd9   :  { %10072 = vst [vmem:[#allocation4_spill] sm:$0xff] %v5999_v61  ;;  %v6005_v4 = vpop.f32.mrf.mxu0  ;;  %v6007_v56 = vpop.f32.mrf.mxu1  ;;  %1379 = vmatpush.msrb.mxu2 %v10076_v16  ;;  %v4209_v61 = vld [vmem:[%s9908_s6] sm:$0xff] }
  0xda   :  { %10073 = vst [vmem:[#allocation20_spill] sm:$0xff] %v6001_v0  ;;  %1298 = vmatpush.msrb.mxu0 %v5444_v45  ;;  %1339 = vmatpush.msrb.mxu1 %v5451_v46 }
  0xdb   :  { %10074 = vst [vmem:[#allocation21_spill] sm:$0xff] %v6005_v4  ;;  %1380 = vmatpush.msrb.mxu2 %v10077_v36  ;;  %v6311_v4 = vld [vmem:[%s9905_s1 + $0xa8] sm:$0xff] }
  0xdc   :  { %10075 = vst [vmem:[#allocation22_spill] sm:$0xff] %v6007_v56  ;;  %4568 = vmatmul.msk.f32.gmra.mxu0 %vm307_vm0, %v5813_v1  ;;  %4576 = vmatmul.msk.f32.gmra.mxu1 %vm307_vm0, %v5813_v1 }
  0xdd   :  { %4584 = vmatmul.msk.f32.gmra.mxu2 %vm307_vm0, %v5813_v1  ;;  %4592 = vmatmul.msk.f32.gmra.mxu3 %vm307_vm0, %v5813_v1  ;;  %v5104_v1 = vmov 0  }
  0xde   :  { %1299 = vmatpush.msrb.mxu0 %v5468_v49  ;;  %1340 = vmatpush.msrb.mxu1 %v5473_v50  ;;  %v10084_v49 = vld [vmem:[#allocation9_spill] sm:$0xff]  ;;  %v10085_v50 = vld [vmem:[#allocation10_spill] sm:$0xff] }
  0xdf   :  { %1381 = vmatpush.msrb.mxu2 %v10078_v37  ;;  %5093 = vset.pattern.permute.xlu1 %v5104_v1  ;;  %v1524_v37 = vld [vmem:[%s9906_s2 + $0x38] sm:$0xff] }
  0xe0   :  { %v6024_v41 = vpop.f32.mrf.mxu2  ;;  %v6026_v42 = vpop.f32.mrf.mxu3  ;;  %1300 = vmatpush.msrb.mxu0 %v5499_v54  ;;  %1341 = vmatpush.msrb.mxu1 %v5508_v55 }
  0xe1   :  { %10079 = vst [vmem:[#allocation5_spill] sm:$0xff] %v6024_v41  ;;  %v6030_v45 = vpop.f32.mrf.mxu0  ;;  %v6032_v46 = vpop.f32.mrf.mxu1  ;;  %1382 = vmatpush.msrb.mxu2 %v10083_v57  ;;  %5092 = vset.pattern.permute.xlu0 %v5104_v1  ;;  %v1521_v57 = vld [vmem:[%s9906_s2 + $0x20] sm:$0xff] }
  0xe2   :  { %10080 = vst [vmem:[#allocation6_spill] sm:$0xff] %v6026_v42  ;;  %1301 = vmatpush.msrb.mxu0 %v5527_v58  ;;  %1342 = vmatpush.msrb.mxu1 %v5534_v59  ;;  %v3850_v42 = vld [vmem:[%s9907_s4 + $0x8] sm:$0xff] }
  0xe3   :  { %10081 = vst [vmem:[#allocation7_spill] sm:$0xff] %v6030_v45  ;;  %1383 = vmatpush.msrb.mxu2 %v10084_v49  ;;  %5094 = vset.pattern.permute.xlu2 %v5104_v1  ;;  %v1523_v1 = vld [vmem:[%s9906_s2 + $0x30] sm:$0xff] }
  0xe4   :  { %10082 = vst [vmem:[#allocation23_spill] sm:$0xff] %v6032_v46  ;;  %4569 = vmatmul.msk.f32.gmra.mxu0 %vm307_vm0, %v5846_v7  ;;  %4577 = vmatmul.msk.f32.gmra.mxu1 %vm307_vm0, %v5846_v7  ;;  %v6281_v46 = vld [vmem:[%s9905_s1 + $0xa0] sm:$0xff]  ;;  %v3851_v45 = vld [vmem:[%s9907_s4 + $0x10] sm:$0xff] }
  0xe5   :  { %4585 = vmatmul.msk.f32.gmra.mxu2 %vm307_vm0, %v5846_v7  ;;  %4593 = vmatmul.msk.f32.gmra.mxu3 %vm307_vm0, %v5846_v7 }
  0xe6   :  { %1302 = vmatpush.msrb.mxu0 %v5551_v62  ;;  %1343 = vmatpush.msrb.mxu1 %v5558_v63 }
  0xe7   :  { %1384 = vmatpush.msrb.mxu2 %v10085_v50  ;;  %1562 = vperm.xlu0 %5092, %v1524_v37   ;;  %v1517_v37 = vld [vmem:[%s9906_s2] sm:$0xff] }
  0xe8   :  { %v6049_v54 = vpop.f32.mrf.mxu2  ;;  %v6051_v55 = vpop.f32.mrf.mxu3  ;;  %1303 = vmatpush.msrb.mxu0 %v5584_v47  ;;  %1344 = vmatpush.msrb.mxu1 %v5593_v33 }
  0xe9   :  { %10086 = vst [vmem:[#allocation8_spill] sm:$0xff] %v6049_v54  ;;  %v6055_v58 = vpop.f32.mrf.mxu0  ;;  %v6057_v59 = vpop.f32.mrf.mxu1  ;;  %1385 = vmatpush.msrb.mxu2 %v5598_v60  ;;  %v1522_v60 = vld [vmem:[%s9906_s2 + $0x28] sm:$0xff] }
  0xea   :  { %10087 = vst [vmem:[#allocation9_spill] sm:$0xff] %v6051_v55  ;;  %1304 = vmatpush.msrb.mxu0 %v10061_v43  ;;  %1345 = vmatpush.msrb.mxu1 %v10061_v43 }
  0xeb   :  { %10088 = vst [vmem:[#allocation10_spill] sm:$0xff] %v6055_v58  ;;  %1386 = vmatpush.msrb.mxu2 %v10061_v43  ;;  %1552 = vperm.xlu1 %5093, %v1522_v60   ;;  %v3853_v58 = vld [vmem:[%s9907_s4 + $0x20] sm:$0xff] }
  0xec   :  { %10089 = vst [vmem:[#allocation24_spill] sm:$0xff] %v6057_v59  ;;  %4570 = vmatmul.msk.f32.gmra.mxu0 %vm307_vm0, %v5879_v14  ;;  %4578 = vmatmul.msk.f32.gmra.mxu1 %vm307_vm0, %v5879_v14  ;;  %v3854_v59 = vld [vmem:[%s9907_s4 + $0x28] sm:$0xff] }
  0xed   :  { %4586 = vmatmul.msk.f32.gmra.mxu2 %vm307_vm0, %v5879_v14  ;;  %4594 = vmatmul.msk.f32.gmra.mxu3 %vm307_vm0, %v5879_v14 }
  0xef   :  { %1557 = vperm.xlu0 %5092, %v1523_v1  }
  0xf0   :  { %v6071_v33 = vpop.f32.mrf.mxu2  ;;  %v6073_v47 = vpop.f32.mrf.mxu3 }
  0xf1   :  { %10090 = vst [vmem:[#allocation25_spill] sm:$0xff] %v6071_v33  ;;  %v6078_v62 = vpop.f32.mrf.mxu0  ;;  %v6080_v63 = vpop.f32.mrf.mxu1  ;;  %v6251_v33 = vld [vmem:[%s9905_s1 + $0x98] sm:$0xff] }
  0xf2   :  { %10091 = vst [vmem:[#allocation26_spill] sm:$0xff] %v6073_v47 }
  0xf3   :  { %10092 = vst [vmem:[#allocation27_spill] sm:$0xff] %v6078_v62  ;;  %1547 = vperm.xlu1 %5093, %v1521_v57  }
  0xf4   :  { %10093 = vst [vmem:[#allocation28_spill] sm:$0xff] %v6080_v63  ;;  %4571 = vmatmul.msk.f32.gmra.mxu0 %vm307_vm0, %v5906_v21  ;;  %4579 = vmatmul.msk.f32.gmra.mxu1 %vm307_vm0, %v5906_v21  ;;  %v3856_v63 = vld [vmem:[%s9907_s4 + $0x38] sm:$0xff] }
  0xf5   :  { %4587 = vmatmul.msk.f32.gmra.mxu2 %vm307_vm0, %v5906_v21  ;;  %4595 = vmatmul.msk.f32.gmra.mxu3 %vm307_vm0, %v5906_v21 }
  0xf8   :  { %v6090_v7 = vpop.f32.mrf.mxu2  ;;  %v6092_v14 = vpop.f32.mrf.mxu3 }
  0xf9   :  { %10094 = vst [vmem:[#allocation29_spill] sm:$0xff] %v6090_v7  ;;  %v6094_v16 = vpop.f32.mrf.mxu0  ;;  %v6096_v36 = vpop.f32.mrf.mxu1  ;;  %v3857_v7 = vld [vmem:[%s9907_s4 + $0x40] sm:$0xff] }
  0xfa   :  { %10095 = vst [vmem:[#allocation30_spill] sm:$0xff] %v6092_v14  ;;  %v6221_v14 = vld [vmem:[%s9905_s1 + $0x90] sm:$0xff] }
  0xfb   :  { %10096 = vst [vmem:[#allocation31_spill] sm:$0xff] %v6094_v16  ;;  %1527 = vperm.xlu1 %5093, %v1517_v37   ;;  %v1518_v37 = vld [vmem:[%s9906_s2 + $0x8] sm:$0xff] }
  0xfc   :  { %10097 = vst [vmem:[#allocation32_spill] sm:$0xff] %v6096_v36  ;;  %4572 = vmatmul.msk.f32.gmra.mxu0 %vm307_vm0, %v5927_v27  ;;  %4580 = vmatmul.msk.f32.gmra.mxu1 %vm307_vm0, %v5927_v27  ;;  %v3859_v36 = vld [vmem:[%s9907_s4 + $0x50] sm:$0xff] }
  0xfd   :  { %4588 = vmatmul.msk.f32.gmra.mxu2 %vm307_vm0, %v5927_v27  ;;  %4596 = vmatmul.msk.f32.gmra.mxu3 %vm307_vm0, %v5927_v27 }
  0xfe   :  { %1532 = vperm.xlu0 %5092, %v1518_v37   ;;  %v6164_v37 = vld [vmem:[%s9905_s1 + $0x80] sm:$0xff] }
 0x100   :  { %v6112_v21 = vpop.f32.mrf.mxu2  ;;  %v6114_v49 = vpop.f32.mrf.mxu3 }
 0x101   :  { %10098 = vst [vmem:[#allocation33_spill] sm:$0xff] %v6112_v21  ;;  %v6116_v50 = vpop.f32.mrf.mxu0  ;;  %v6118_v60 = vpop.f32.mrf.mxu1  ;;  %v3860_v21 = vld [vmem:[%s9907_s4 + $0x58] sm:$0xff] }
 0x102   :  { %10099 = vst [vmem:[#allocation34_spill] sm:$0xff] %v6114_v49 }
 0x103   :  { %10100 = vst [vmem:[#allocation35_spill] sm:$0xff] %v6116_v50 }
 0x104   :  { %10101 = vst [vmem:[#allocation36_spill] sm:$0xff] %v6118_v60  ;;  %4573 = vmatmul.msk.f32.gmra.mxu0 %vm307_vm0, %v5948_v35  ;;  %4581 = vmatmul.msk.f32.gmra.mxu1 %vm307_vm0, %v5948_v35  ;;  %v6191_v60 = vld [vmem:[%s9905_s1 + $0x88] sm:$0xff] }
 0x105   :  { %4589 = vmatmul.msk.f32.gmra.mxu2 %vm307_vm0, %v5948_v35  ;;  %4597 = vmatmul.msk.f32.gmra.mxu3 %vm307_vm0, %v5948_v35 }
 0x108   :  { %v6134_v27 = vpop.f32.mrf.mxu2  ;;  %v6136_v57 = vpop.f32.mrf.mxu3 }
 0x109   :  { %10102 = vst [vmem:[#allocation37_spill] sm:$0xff] %v6134_v27  ;;  %v6138_v0 = vpop.f32.mrf.mxu0  ;;  %v6140_v1 = vpop.f32.mrf.mxu1 }
 0x10a   :  { %10103 = vst [vmem:[#allocation38_spill] sm:$0xff] %v6136_v57 }
 0x10b   :  { %10104 = vst [vmem:[#allocation39_spill] sm:$0xff] %v6138_v0 }
 0x10c   :  { %10105 = vst [vmem:[#allocation40_spill] sm:$0xff] %v6140_v1  ;;  %4574 = vmatmul.msk.f32.gmra.mxu0 %vm307_vm0, %v5969_v48  ;;  %4582 = vmatmul.msk.f32.gmra.mxu1 %vm307_vm0, %v5969_v48  ;;  %v3863_v1 = vld [vmem:[%s9907_s4 + $0x70] sm:$0xff] }
 0x10d   :  { %4590 = vmatmul.msk.f32.gmra.mxu2 %vm307_vm0, %v5969_v48  ;;  %4598 = vmatmul.msk.f32.gmra.mxu3 %vm307_vm0, %v5969_v48  ;;  %v3862_v48 = vld [vmem:[%s9907_s4 + $0x68] sm:$0xff] }
 0x10e   :  { %3937 = vperm.xlu0 %5092, %v3863_v1   ;;  %3932 = vperm.xlu1 %5093, %v3862_v48   ;;  %v1520_v48 = vld [vmem:[%s9906_s2 + $0x18] sm:$0xff] }
 0x10f   :  { %1542 = vperm.xlu2 %5094, %v1520_v48  }
 0x110   :  { %v6153_v35 = vpop.f32.mrf.mxu2  ;;  %v6155_v57 = vpop.f32.mrf.mxu3 }
 0x111   :  { %10106 = vst [vmem:[#allocation41_spill] sm:$0xff] %v6153_v35  ;;  %v6157_v27 = vpop.f32.mrf.mxu0  ;;  %v6159_v49 = vpop.f32.mrf.mxu1 }
 0x112   :  { %10107 = vst [vmem:[#allocation42_spill] sm:$0xff] %v6155_v57 }
 0x114   :  { %4607 = vmatmul.msk.f32.vlgmr.msra.gmra.mxu0 %vm307_vm0, %v6164_v37  ;;  %4615 = vmatmul.msk.f32.vlgmr.msra.gmra.mxu1 %vm307_vm0, %v6164_v37 }
 0x115   :  { %4623 = vmatmul.msk.f32.vlgmr.msra.gmra.mxu2 %vm307_vm0, %v6164_v37  ;;  %4631 = vmatmul.msk.f32.vlgmr.msra.gmra.mxu3 %vm307_vm0, %v6164_v37 }
 0x116   :  { %3922 = vperm.xlu0 %5092, %v3860_v21   ;;  %3917 = vperm.xlu1 %5093, %v3859_v36   ;;  %v1519_v36 = vld [vmem:[%s9906_s2 + $0x10] sm:$0xff] }
 0x117   :  { %1537 = vperm.xlu2 %5094, %v1519_v36  }
 0x118   :  { %v6180_v57 = vpop.f32.mrf.mxu2  ;;  %v6182_v1 = vpop.f32.mrf.mxu3 }
 0x119   :  { %v6184_v35 = vpop.f32.mrf.mxu0  ;;  %v6186_v0 = vpop.f32.mrf.mxu1 }
 0x11c   :  { %4608 = vmatmul.msk.f32.gmra.mxu0 %vm307_vm0, %v6191_v60  ;;  %4616 = vmatmul.msk.f32.gmra.mxu1 %vm307_vm0, %v6191_v60 }
 0x11d   :  { %4624 = vmatmul.msk.f32.gmra.mxu2 %vm307_vm0, %v6191_v60  ;;  %4632 = vmatmul.msk.f32.gmra.mxu3 %vm307_vm0, %v6191_v60 }
 0x11e   :  { %3907 = vperm.xlu0 %5092, %v3857_v7   ;;  %3902 = vperm.xlu1 %5093, %v3856_v63   ;;  %v3864_v63 = vld [vmem:[%s9907_s4 + $0x78] sm:$0xff] }
 0x11f   :  { %3942 = vperm.xlu2 %5094, %v3864_v63  }
 0x120   :  { %v6210_v16 = vpop.f32.mrf.mxu2  ;;  %v6212_v21 = vpop.f32.mrf.mxu3 }
 0x121   :  { %v6214_v48 = vpop.f32.mrf.mxu0  ;;  %v6216_v50 = vpop.f32.mrf.mxu1 }
 0x124   :  { %4609 = vmatmul.msk.f32.gmra.mxu0 %vm307_vm0, %v6221_v14  ;;  %4617 = vmatmul.msk.f32.gmra.mxu1 %vm307_vm0, %v6221_v14 }
 0x125   :  { %4625 = vmatmul.msk.f32.gmra.mxu2 %vm307_vm0, %v6221_v14  ;;  %4633 = vmatmul.msk.f32.gmra.mxu3 %vm307_vm0, %v6221_v14 }
 0x126   :  { %3892 = vperm.xlu0 %5092, %v3854_v59   ;;  %3887 = vperm.xlu1 %5093, %v3853_v58   ;;  %v3861_v58 = vld [vmem:[%s9907_s4 + $0x60] sm:$0xff] }
 0x127   :  { %3927 = vperm.xlu2 %5094, %v3861_v58  }
 0x128   :  { %v6240_v62 = vpop.f32.mrf.mxu2  ;;  %v6242_v7 = vpop.f32.mrf.mxu3 }
 0x129   :  { %v6244_v36 = vpop.f32.mrf.mxu0  ;;  %v6246_v47 = vpop.f32.mrf.mxu1 }
 0x12c   :  { %4610 = vmatmul.msk.f32.gmra.mxu0 %vm307_vm0, %v6251_v33  ;;  %4618 = vmatmul.msk.f32.gmra.mxu1 %vm307_vm0, %v6251_v33 }
 0x12d   :  { %4626 = vmatmul.msk.f32.gmra.mxu2 %vm307_vm0, %v6251_v33  ;;  %4634 = vmatmul.msk.f32.gmra.mxu3 %vm307_vm0, %v6251_v33 }
 0x12e   :  { %3877 = vperm.xlu0 %5092, %v3851_v45   ;;  %3872 = vperm.xlu1 %5093, %v3850_v42   ;;  %v3858_v42 = vld [vmem:[%s9907_s4 + $0x48] sm:$0xff] }
 0x12f   :  { %3912 = vperm.xlu2 %5094, %v3858_v42  }
 0x130   :  { %v6270_v55 = vpop.f32.mrf.mxu2  ;;  %v6272_v59 = vpop.f32.mrf.mxu3 }
 0x131   :  { %v6274_v63 = vpop.f32.mrf.mxu0  ;;  %v6276_v54 = vpop.f32.mrf.mxu1 }
 0x134   :  { %4611 = vmatmul.msk.f32.gmra.mxu0 %vm307_vm0, %v6281_v46  ;;  %4619 = vmatmul.msk.f32.gmra.mxu1 %vm307_vm0, %v6281_v46 }
 0x135   :  { %4627 = vmatmul.msk.f32.gmra.mxu2 %vm307_vm0, %v6281_v46  ;;  %4635 = vmatmul.msk.f32.gmra.mxu3 %vm307_vm0, %v6281_v46 }
 0x136   :  { %4212 = vperm.xlu0 %5092, %v4209_v61   ;;  %4381 = vperm.xlu1 %5093, %v4377_v53  }
 0x137   :  { %3897 = vperm.xlu2 %5094, %v3855_v44   ;;  %v6365_v44 = vld [vmem:[%s9905_s1 + $0xb8] sm:$0xff] }
 0x138   :  { %v6300_v41 = vpop.f32.mrf.mxu2  ;;  %v6302_v45 = vpop.f32.mrf.mxu3 }
 0x139   :  { %v6304_v58 = vpop.f32.mrf.mxu0  ;;  %v6306_v56 = vpop.f32.mrf.mxu1 }
 0x13c   :  { %4612 = vmatmul.msk.f32.gmra.mxu0 %vm307_vm0, %v6311_v4  ;;  %4620 = vmatmul.msk.f32.gmra.mxu1 %vm307_vm0, %v6311_v4 }
 0x13d   :  { %4628 = vmatmul.msk.f32.gmra.mxu2 %vm307_vm0, %v6311_v4  ;;  %4636 = vmatmul.msk.f32.gmra.mxu3 %vm307_vm0, %v6311_v4 }
 0x140   :  { %v6330_v43 = vpop.f32.mrf.mxu2  ;;  %v6332_v61 = vpop.f32.mrf.mxu3 }
 0x141   :  { %v6334_v42 = vpop.f32.mrf.mxu0  ;;  %v6336_v52 = vpop.f32.mrf.mxu1 }
 0x142   :  { %10108 = vst [vmem:[#allocation43_spill] sm:$0xff] %v6336_v52  ;;  %v3852_v52 = vld [vmem:[%s9907_s4 + $0x18] sm:$0xff] }
 0x143   :  { %3882 = vperm.xlu2 %5094, %v3852_v52   ;;  %v3849_v52 = vld [vmem:[%s9907_s4] sm:$0xff] }
 0x144   :  { %4613 = vmatmul.msk.f32.gmra.mxu0 %vm307_vm0, %v6341_v51  ;;  %4621 = vmatmul.msk.f32.gmra.mxu1 %vm307_vm0, %v6341_v51 }
 0x145   :  { %4629 = vmatmul.msk.f32.gmra.mxu2 %vm307_vm0, %v6341_v51  ;;  %4637 = vmatmul.msk.f32.gmra.mxu3 %vm307_vm0, %v6341_v51 }
 0x148   :  { %v6354_v53 = vpop.f32.mrf.mxu2  ;;  %v6356_v40 = vpop.f32.mrf.mxu3 }
 0x149   :  { %10109 = vst [vmem:[#allocation44_spill] sm:$0xff] %v6354_v53  ;;  %v6358_v39 = vpop.f32.mrf.mxu0  ;;  %v6360_v38 = vpop.f32.mrf.mxu1 }
 0x14a   :  { %10110 = vst [vmem:[#allocation45_spill] sm:$0xff] %v6356_v40 }
 0x14b   :  { %10111 = vst [vmem:[#allocation46_spill] sm:$0xff] %v6358_v39  ;;  %3867 = vperm.xlu2 %5094, %v3849_v52   ;;  %v4378_v52 = vld [vmem:[%s9909_s8 + $0x8] sm:$0x1f] }
 0x14c   :  { %10112 = vst [vmem:[#allocation47_spill] sm:$0xff] %v6360_v38  ;;  %4614 = vmatmul.msk.f32.gmra.mxu0 %vm307_vm0, %v6365_v44  ;;  %4622 = vmatmul.msk.f32.gmra.mxu1 %vm307_vm0, %v6365_v44 }
 0x14d   :  { %4630 = vmatmul.msk.f32.gmra.mxu2 %vm307_vm0, %v6365_v44  ;;  %4638 = vmatmul.msk.f32.gmra.mxu3 %vm307_vm0, %v6365_v44 }
 0x150   :  { %v6378_v38 = vpop.f32.mrf.mxu2  ;;  %v6380_v39 = vpop.f32.mrf.mxu3 }
 0x151   :  { %10113 = vst [vmem:[#allocation48_spill] sm:$0xff] %v6378_v38  ;;  %v6382_v40 = vpop.f32.mrf.mxu0  ;;  %v6384_v53 = vpop.f32.mrf.mxu1 }
 0x152   :  { %10114 = vst [vmem:[#allocation49_spill] sm:$0xff] %v6380_v39 }
 0x153   :  { %10115 = vst [vmem:[#allocation50_spill] sm:$0xff] %v6382_v40  ;;  %4386 = vperm.xlu2 %5094, %v4378_v52  }
 0x154   :  { %10116 = vst [vmem:[#allocation51_spill] sm:$0xff] %v6384_v53  ;;  %4639 = vmatmul.msk.f32.vlgmr.msrb.gmra.mxu0 %vm307_vm0, %v6164_v37  ;;  %4647 = vmatmul.msk.f32.vlgmr.msrb.gmra.mxu1 %vm307_vm0, %v6164_v37 }
 0x155   :  { %4655 = vmatmul.msk.f32.vlgmr.msrb.gmra.mxu2 %vm307_vm0, %v6164_v37  ;;  %4663 = vmatmul.msk.f32.vlgmr.msrb.gmra.mxu3 %vm307_vm0, %v6164_v37 }
 0x158   :  { %v6397_v40 = vpop.f32.mrf.mxu2  ;;  %v6399_v53 = vpop.f32.mrf.mxu3 }
 0x159   :  { %10117 = vst [vmem:[#allocation52_spill] sm:$0xff] %v6397_v40  ;;  %v6401_v39 = vpop.f32.mrf.mxu0  ;;  %v6403_v38 = vpop.f32.mrf.mxu1 }
 0x15a   :  { %10118 = vst [vmem:[#allocation53_spill] sm:$0xff] %v6399_v53 }
 0x15b   :  { %10119 = vst [vmem:[#allocation54_spill] sm:$0xff] %v6401_v39 }
 0x15c   :  { %10120 = vst [vmem:[#allocation55_spill] sm:$0xff] %v6403_v38  ;;  %4640 = vmatmul.msk.f32.gmra.mxu0 %vm307_vm0, %v6191_v60  ;;  %4648 = vmatmul.msk.f32.gmra.mxu1 %vm307_vm0, %v6191_v60 }
 0x15d   :  { %4656 = vmatmul.msk.f32.gmra.mxu2 %vm307_vm0, %v6191_v60  ;;  %4664 = vmatmul.msk.f32.gmra.mxu3 %vm307_vm0, %v6191_v60 }
 0x160   :  { %v6416_v37 = vpop.f32.mrf.mxu2  ;;  %v6418_v53 = vpop.f32.mrf.mxu3 }
 0x161   :  { %10121 = vst [vmem:[#allocation56_spill] sm:$0xff] %v6416_v37  ;;  %v6420_v38 = vpop.f32.mrf.mxu0  ;;  %v6422_v39 = vpop.f32.mrf.mxu1 }
 0x162   :  { %10122 = vst [vmem:[#allocation57_spill] sm:$0xff] %v6418_v53 }
 0x163   :  { %10123 = vst [vmem:[#allocation58_spill] sm:$0xff] %v6420_v38 }
 0x164   :  { %10124 = vst [vmem:[#allocation59_spill] sm:$0xff] %v6422_v39  ;;  %4641 = vmatmul.msk.f32.gmra.mxu0 %vm307_vm0, %v6221_v14  ;;  %4649 = vmatmul.msk.f32.gmra.mxu1 %vm307_vm0, %v6221_v14 }
 0x165   :  { %4657 = vmatmul.msk.f32.gmra.mxu2 %vm307_vm0, %v6221_v14  ;;  %4665 = vmatmul.msk.f32.gmra.mxu3 %vm307_vm0, %v6221_v14 }
 0x168   :  { %v6432_v60 = vpop.f32.mrf.mxu2  ;;  %v6434_v52 = vpop.f32.mrf.mxu3 }
 0x169   :  { %10125 = vst [vmem:[#allocation60_spill] sm:$0xff] %v6432_v60  ;;  %v6436_v53 = vpop.f32.mrf.mxu0  ;;  %v6438_v38 = vpop.f32.mrf.mxu1 }
 0x16a   :  { %10126 = vst [vmem:[#allocation61_spill] sm:$0xff] %v6434_v52 }
 0x16b   :  { %10127 = vst [vmem:[#allocation62_spill] sm:$0xff] %v6436_v53 }
 0x16c   :  { %10128 = vst [vmem:[#allocation63_spill] sm:$0xff] %v6438_v38  ;;  %4642 = vmatmul.msk.f32.gmra.mxu0 %vm307_vm0, %v6251_v33  ;;  %4650 = vmatmul.msk.f32.gmra.mxu1 %vm307_vm0, %v6251_v33 }
 0x16d   :  { %4658 = vmatmul.msk.f32.gmra.mxu2 %vm307_vm0, %v6251_v33  ;;  %4666 = vmatmul.msk.f32.gmra.mxu3 %vm307_vm0, %v6251_v33 }
 0x170   :  { %v6448_v14 = vpop.f32.mrf.mxu2  ;;  %v6450_v60 = vpop.f32.mrf.mxu3 }
 0x171   :  { %10129 = vst [vmem:[#allocation64_spill] sm:$0xff] %v6448_v14  ;;  %v6452_v52 = vpop.f32.mrf.mxu0  ;;  %v6454_v53 = vpop.f32.mrf.mxu1 }
 0x172   :  { %10130 = vst [vmem:[#allocation65_spill] sm:$0xff] %v6450_v60 }
 0x173   :  { %10131 = vst [vmem:[#allocation66_spill] sm:$0xff] %v6452_v52 }
 0x174   :  { %10132 = vst [vmem:[#allocation67_spill] sm:$0xff] %v6454_v53  ;;  %4643 = vmatmul.msk.f32.gmra.mxu0 %vm307_vm0, %v6281_v46  ;;  %4651 = vmatmul.msk.f32.gmra.mxu1 %vm307_vm0, %v6281_v46 }
 0x175   :  { %4659 = vmatmul.msk.f32.gmra.mxu2 %vm307_vm0, %v6281_v46  ;;  %4667 = vmatmul.msk.f32.gmra.mxu3 %vm307_vm0, %v6281_v46 }
 0x178   :  { %v6464_v33 = vpop.f32.mrf.mxu2  ;;  %v6466_v14 = vpop.f32.mrf.mxu3 }
 0x179   :  { %10133 = vst [vmem:[#allocation68_spill] sm:$0xff] %v6464_v33  ;;  %v6468_v60 = vpop.f32.mrf.mxu0  ;;  %v6470_v52 = vpop.f32.mrf.mxu1 }
 0x17a   :  { %10134 = vst [vmem:[#allocation69_spill] sm:$0xff] %v6466_v14 }
 0x17b   :  { %10135 = vst [vmem:[#allocation70_spill] sm:$0xff] %v6468_v60 }
 0x17c   :  { %10136 = vst [vmem:[#allocation71_spill] sm:$0xff] %v6470_v52  ;;  %4644 = vmatmul.msk.f32.gmra.mxu0 %vm307_vm0, %v6311_v4  ;;  %4652 = vmatmul.msk.f32.gmra.mxu1 %vm307_vm0, %v6311_v4 }
 0x17d   :  { %4660 = vmatmul.msk.f32.gmra.mxu2 %vm307_vm0, %v6311_v4  ;;  %4668 = vmatmul.msk.f32.gmra.mxu3 %vm307_vm0, %v6311_v4 }
 0x180   :  { %v6480_v46 = vpop.f32.mrf.mxu2  ;;  %v6482_v33 = vpop.f32.mrf.mxu3 }
 0x181   :  { %10137 = vst [vmem:[#allocation72_spill] sm:$0xff] %v6480_v46  ;;  %v6484_v14 = vpop.f32.mrf.mxu0  ;;  %v6486_v60 = vpop.f32.mrf.mxu1 }
 0x182   :  { %10138 = vst [vmem:[#allocation73_spill] sm:$0xff] %v6482_v33 }
 0x183   :  { %10139 = vst [vmem:[#allocation74_spill] sm:$0xff] %v6484_v14 }
 0x184   :  { %10140 = vst [vmem:[#allocation75_spill] sm:$0xff] %v6486_v60  ;;  %4645 = vmatmul.msk.f32.gmra.mxu0 %vm307_vm0, %v6341_v51  ;;  %4653 = vmatmul.msk.f32.gmra.mxu1 %vm307_vm0, %v6341_v51 }
 0x185   :  { %4661 = vmatmul.msk.f32.gmra.mxu2 %vm307_vm0, %v6341_v51  ;;  %4669 = vmatmul.msk.f32.gmra.mxu3 %vm307_vm0, %v6341_v51 }
 0x188   :  { %v6496_v4 = vpop.f32.mrf.mxu2  ;;  %v6498_v46 = vpop.f32.mrf.mxu3 }
 0x189   :  { %10141 = vst [vmem:[#allocation76_spill] sm:$0xff] %v6496_v4  ;;  %v6500_v33 = vpop.f32.mrf.mxu0  ;;  %v6502_v52 = vpop.f32.mrf.mxu1 }
 0x18a   :  { %10142 = vst [vmem:[#allocation77_spill] sm:$0xff] %v6498_v46 }
 0x18b   :  { %10143 = vst [vmem:[#allocation78_spill] sm:$0xff] %v6500_v33 }
 0x18c   :  { %10144 = vst [vmem:[#allocation79_spill] sm:$0xff] %v6502_v52  ;;  %4646 = vmatmul.msk.f32.gmra.mxu0 %vm307_vm0, %v6365_v44  ;;  %4654 = vmatmul.msk.f32.gmra.mxu1 %vm307_vm0, %v6365_v44 }
 0x18d   :  { %4662 = vmatmul.msk.f32.gmra.mxu2 %vm307_vm0, %v6365_v44  ;;  %4670 = vmatmul.msk.f32.gmra.mxu3 %vm307_vm0, %v6365_v44 }
 0x190   :  { %v6512_v51 = vpop.f32.mrf.mxu2  ;;  %v6514_v4 = vpop.f32.mrf.mxu3 }
 0x191   :  { %10145 = vst [vmem:[#allocation80_spill] sm:$0xff] %v6512_v51  ;;  %v1142_v46 = vpop.f32.mrf.mxu0  ;;  %v1183_v33 = vpop.f32.mrf.mxu1 }
 0x192   :  { %10146 = vst [vmem:[#allocation81_spill] sm:$0xff] %v6514_v4 }
 0x198   :  { %v6516_v60 = vpop.f32.mrf.mxu2  ;;  %v6518_v52 = vpop.f32.mrf.mxu3 }
 0x199   :  { %10147 = vst [vmem:[#allocation82_spill] sm:$0xff] %v6516_v60  ;;  %v6520_v14 = vpop.f32.mrf.mxu0  ;;  %v6522_v53 = vpop.f32.mrf.mxu1 }
 0x19a   :  { %10148 = vst [vmem:[#allocation83_spill] sm:$0xff] %v6518_v52  ;;  %v6540_v52 = vpop.permute.xlu1 %1552 }
 0x19b   :  { %10149 = vst [vmem:[#allocation84_spill] sm:$0xff] %v6520_v14 }
 0x19c   :  { %10150 = vst [vmem:[#allocation85_spill] sm:$0xff] %v6522_v53 }
 0x19d   :  { %10158 = vst [vmem:[#allocation93_spill] sm:$0xff] %v6540_v52  ;;  %v702_v52 = vadd.f32 %v6157_v27, %v5779_v8 }
 0x1a0   :  { %v6524_v38 = vpop.f32.mrf.mxu2  ;;  %v6526_v39 = vpop.f32.mrf.mxu3 }
 0x1a1   :  { %10151 = vst [vmem:[#allocation86_spill] sm:$0xff] %v6524_v38  ;;  %v6528_v37 = vpop.f32.mrf.mxu0  ;;  %v6530_v44 = vpop.f32.mrf.mxu1 }
 0x1a2   :  { %10152 = vst [vmem:[#allocation87_spill] sm:$0xff] %v6526_v39  ;;  %v6556_v34 = vpop.permute.xlu1 %1547 }
 0x1a3   :  { %10153 = vst [vmem:[#allocation88_spill] sm:$0xff] %v6528_v37  ;;  %v6550_v37 = vpop.permute.xlu0 %1562 }
 0x1a4   :  { %10154 = vst [vmem:[#allocation89_spill] sm:$0xff] %v6530_v44 }
 0x1a5   :  { %10164 = vst [vmem:[#allocation99_spill] sm:$0xff] %v6556_v34  ;;  %v746_v34 = vadd.f32 %v6186_v0, %v5808_v32  ;;  %v6594_v0 = vadd.f32 %v6240_v62, %v5866_v9  ;;  %v6612_v9 = vadd.f32 %v6272_v59, %v5897_v17  ;;  %v755_v62 = vadd.f32 %v6276_v54, %v5901_v19  ;;  %v10166_v54 = vld [vmem:[#allocation43_spill] sm:$0xff]  ;;  %v10176_v59 = vld [vmem:[#allocation48_spill] sm:$0xff] }
 0x1a6   :  { %v717_v17 = vadd.f32 %v6304_v58, %v5920_v25  ;;  %v840_v19 = vadd.f32 %v6332_v61, %v5939_v30 }
 0x1a8   :  { %v6532_v51 = vpop.f32.mrf.mxu2  ;;  %v6534_v4 = vpop.f32.mrf.mxu3 }
 0x1a9   :  { %10155 = vst [vmem:[#allocation90_spill] sm:$0xff] %v6532_v51  ;;  %v6536_v40 = vpop.f32.mrf.mxu0  ;;  %v6538_v60 = vpop.f32.mrf.mxu1 }
 0x1aa   :  { %10156 = vst [vmem:[#allocation91_spill] sm:$0xff] %v6534_v4 }
 0x1ab   :  { %10157 = vst [vmem:[#allocation92_spill] sm:$0xff] %v6536_v40 }
 0x1b0   :  { %v6542_v14 = vpop.f32.mrf.mxu2  ;;  %v6544_v53 = vpop.f32.mrf.mxu3 }
 0x1b1   :  { %10159 = vst [vmem:[#allocation94_spill] sm:$0xff] %v6542_v14  ;;  %v6546_v38 = vpop.f32.mrf.mxu0  ;;  %v6548_v39 = vpop.f32.mrf.mxu1 }
 0x1b2   :  { %10160 = vst [vmem:[#allocation95_spill] sm:$0xff] %v6544_v53  ;;  %v743_v53 = vadd.f32 %v6159_v49, %v5781_v12  ;;  %v6562_v14 = vpop.permute.xlu0 %1557  ;;  %v6582_v12 = vadd.f32 %v6210_v16, %v5833_v2  ;;  %v6598_v2 = vadd.f32 %v6242_v7, %v5868_v10  ;;  %v752_v16 = vadd.f32 %v6246_v47, %v5874_v13  ;;  %v10174_v7 = vld [vmem:[#allocation47_spill] sm:$0xff] }
 0x1b3   :  { %10161 = vst [vmem:[#allocation96_spill] sm:$0xff] %v6548_v39  ;;  %v6566_v39 = vadd.f32 %v6180_v57, %v5800_v20  ;;  %v6586_v20 = vadd.f32 %v6212_v21, %v5835_v3  ;;  %v711_v3 = vadd.f32 %v6244_v36, %v5872_v11  ;;  %v714_v10 = vadd.f32 %v6274_v63, %v5899_v18  ;;  %v10167_v57 = vld [vmem:[#allocation12_spill] sm:$0xff]  ;;  %v10170_v21 = vld [vmem:[#allocation45_spill] sm:$0xff] }
 0x1b4   :  { %v6620_v11 = vadd.f32 %v6300_v41, %v5916_v22  ;;  %v6624_v13 = vadd.f32 %v6302_v45, %v5918_v23  ;;  %v758_v47 = vadd.f32 %v6306_v56, %v5922_v26  ;;  %v799_v18 = vadd.f32 %v6330_v43, %v5937_v29  ;;  %v6634_v22 = vpop.permute.xlu1 %1527  ;;  %v10165_v41 = vld [vmem:[#allocation11_spill] sm:$0xff]  ;;  %v10171_v56 = vld [vmem:[#allocation14_spill] sm:$0xff]  ;;  %v10175_v36 = vld [vmem:[#allocation16_spill] sm:$0xff] }
 0x1b5   :  { %v720_v23 = vadd.f32 %v6334_v42, %v5941_v31  ;;  %v10173_v29 = vld [vmem:[#allocation15_spill] sm:$0xff]  ;;  %v805_v63 = vadd.f32 %v10176_v59, %v10175_v36  ;;  %v10177_v45 = vld [vmem:[#allocation17_spill] sm:$0xff]  ;;  %v10185_v36 = vld [vmem:[#allocation92_spill] sm:$0xff] }
 0x1b6   :  { %v764_v30 = vadd.f32 %v10174_v7, %v10173_v29  ;;  %v10178_v31 = vld [vmem:[#allocation49_spill] sm:$0xff]  ;;  %v1477_v59 = vadd.f32 %v10185_v36, %v711_v3 }
 0x1b7   :  { %v846_v58 = vadd.f32 %v10178_v31, %v10177_v45 }
 0x1b8   :  { %v6552_v44 = vpop.f32.mrf.mxu2  ;;  %v6554_v51 = vpop.f32.mrf.mxu3 }
 0x1b9   :  { %10162 = vst [vmem:[#allocation97_spill] sm:$0xff] %v6552_v44  ;;  %v1157_v4 = vpop.f32.mrf.mxu0  ;;  %v1198_v40 = vpop.f32.mrf.mxu1  ;;  %v6570_v44 = vadd.f32 %v6182_v1, %v5802_v24  ;;  %v708_v24 = vadd.f32 %v6214_v48, %v5839_v5  ;;  %v10169_v1 = vld [vmem:[#allocation13_spill] sm:$0xff]  ;;  %v10172_v48 = vld [vmem:[#allocation46_spill] sm:$0xff]  ;;  %v10202_v36 = vld [vmem:[#allocation95_spill] sm:$0xff] }
 0x1ba   :  { %10163 = vst [vmem:[#allocation98_spill] sm:$0xff] %v6554_v51  ;;  %v705_v51 = vadd.f32 %v6184_v35, %v5806_v28  ;;  %v749_v28 = vadd.f32 %v6216_v50, %v5841_v6  ;;  %v6604_v5 = vpop.permute.xlu2 %1542  ;;  %v6608_v6 = vadd.f32 %v6270_v55, %v5895_v15  ;;  %v1453_v15 = vadd.f32 %v1142_v46, %v702_v52  ;;  %v10168_v35 = vld [vmem:[#allocation44_spill] sm:$0xff] }
 0x1bb   :  { %v1454_v55 = vadd.f32 %v1183_v33, %v743_v53  ;;  %v761_v50 = vadd.f32 %v10166_v54, %v10165_v41  ;;  %v802_v25 = vadd.f32 %v10168_v35, %v10167_v57  ;;  %v843_v26 = vadd.f32 %v10170_v21, %v10169_v1  ;;  %v10180_v41 = vld [vmem:[#allocation84_spill] sm:$0xff]  ;;  %v10181_v57 = vld [vmem:[#allocation85_spill] sm:$0xff] }
 0x1bc   :  { %v723_v43 = vadd.f32 %v10172_v48, %v10171_v56  ;;  %v6653_v33 = vadd.f32 %v6634_v22, %v1453_v15  ;;  %v1461_v54 = vadd.f32 %v10180_v41, %v705_v51  ;;  %v1462_v35 = vadd.f32 %v10181_v57, %v746_v34  ;;  %v10182_v1 = vld [vmem:[#allocation88_spill] sm:$0xff]  ;;  %v10183_v56 = vld [vmem:[#allocation89_spill] sm:$0xff] }
 0x1bd   :  { %v6656_v46 = vadd.f32 %v6634_v22, %v1454_v55  ;;  %v1469_v21 = vadd.f32 %v10182_v1, %v708_v24  ;;  %v1470_v48 = vadd.f32 %v10183_v56, %v749_v28  ;;  %v1478_v55 = vadd.f32 %v6538_v60, %v752_v16  ;;  %v10186_v45 = vld [vmem:[#allocation96_spill] sm:$0xff] }
 0x1be   :  { %10179 = vst [vmem:[#allocation11_spill] sm:$0xff] %v6653_v33  ;;  %v1485_v51 = vadd.f32 %v6546_v38, %v714_v10  ;;  %v1486_v34 = vadd.f32 %v10186_v45, %v755_v62  ;;  %v10191_v10 = vld [vmem:[#allocation93_spill] sm:$0xff] }
 0x1c0   :  { %v6576_v8 = vpop.f32.mrf.mxu2  ;;  %v6578_v27 = vpop.f32.mrf.mxu3 }
 0x1c1   :  { %v1160_v49 = vpop.f32.mrf.mxu0  ;;  %v1201_v32 = vpop.f32.mrf.mxu1 }
 0x1c2   :  { %v1501_v61 = vadd.f32 %v1160_v49, %v720_v23  ;;  %v1502_v42 = vadd.f32 %v1201_v32, %v761_v50  ;;  %v6662_v49 = vpop.permute.xlu0 %1532  ;;  %v1493_v32 = vadd.f32 %v1157_v4, %v717_v17  ;;  %v1494_v23 = vadd.f32 %v1198_v40, %v758_v47  ;;  %v6668_v31 = vpop.permute.xlu2 %1537 }
 0x1c3   :  { %10184 = vst [vmem:[#allocation43_spill] sm:$0xff] %v6662_v49  ;;  %v6679_v3 = vadd.f32 %v6668_v31, %v1469_v21  ;;  %v6682_v60 = vadd.f32 %v6668_v31, %v1470_v48  ;;  %v6685_v38 = vadd.f32 %v6662_v49, %v1461_v54  ;;  %v6688_v16 = vadd.f32 %v6662_v49, %v1462_v35  ;;  %v10195_v54 = vld [vmem:[#allocation99_spill] sm:$0xff] }
 0x1c4   :  { %v6671_v24 = vadd.f32 %v6562_v14, %v1501_v61  ;;  %v1614_v28 = vadd.f32 %v6562_v14, %v1502_v42  ;;  %v6691_v62 = vadd.f32 %v10191_v10, %v1493_v32  ;;  %v1606_v17 = vadd.f32 %v10191_v10, %v1494_v23  ;;  %v10198_v32 = vld [vmem:[#allocation97_spill] sm:$0xff] }
 0x1c5   :  { %10189 = vst [vmem:[#allocation13_spill] sm:$0xff] %v6679_v3  ;;  %v1590_v61 = vadd.f32 %v6604_v5, %v1478_v55  ;;  %v6702_v57 = vadd.f32 %v10195_v54, %v1485_v51  ;;  %v1598_v35 = vadd.f32 %v10195_v54, %v1486_v34  ;;  %v1487_v23 = vadd.f32 %v10198_v32, %v6620_v11 }
 0x1c6   :  { %10187 = vst [vmem:[#allocation12_spill] sm:$0xff] %v6671_v24  ;;  %v9932_v56 = vmax.f32 %v6671_v24, 0.0  ;;  %v6709_v48 = vmax.f32 %v1614_v28, 0.0 }
 0x1c7   :  { %10190 = vst [vmem:[#allocation45_spill] sm:$0xff] %v6685_v38  ;;  %v9930_v55 = vmax.f32 %v6702_v57, 0.0  ;;  %v6739_v51 = vmax.f32 %v1598_v35, 0.0  ;;  %v6755_v35 = vmax.f32 %v1590_v61, 0.0 }
 0x1c8   :  { %v1242_v53 = vpop.f32.mrf.mxu2  ;;  %v1283_v52 = vpop.f32.mrf.mxu3  ;;  %10192 = vst [vmem:[#allocation14_spill] sm:$0xff] %v6691_v62 }
 0x1c9   :  { %v1163_v29 = vpop.f32.mrf.mxu0  ;;  %v1204_v7 = vpop.f32.mrf.mxu1  ;;  %v1503_v42 = vadd.f32 %v1242_v53, %v802_v25  ;;  %v1504_v41 = vadd.f32 %v1283_v52, %v843_v26  ;;  %10196 = vst [vmem:[#allocation47_spill] sm:$0xff] %v6702_v57  ;;  %v1496_v25 = vadd.f32 %v6578_v27, %v840_v19  ;;  %v6725_v27 = vmax.f32 %v1606_v17, 0.0  ;;  %v10207_v17 = vld [vmem:[#allocation91_spill] sm:$0xff] }
 0x1ca   :  { %v1509_v50 = vadd.f32 %v1163_v29, %v723_v43  ;;  %v1510_v15 = vadd.f32 %v1204_v7, %v764_v30  ;;  %v6698_v30 = vadd.f32 %v6604_v5, %v1477_v59  ;;  %10197 = vst [vmem:[#allocation16_spill] sm:$0xff] %v6709_v48  ;;  %v1495_v29 = vadd.f32 %v6576_v8, %v799_v18 }
 0x1cb   :  { %v9931_v8 = vmax.f32 %v6691_v62, 0.0  ;;  %10200 = vst [vmem:[#allocation48_spill] sm:$0xff] %v6725_v27  ;;  %v1615_v18 = vadd.f32 %v6562_v14, %v1503_v42  ;;  %v1616_v19 = vadd.f32 %v6562_v14, %v1504_v41  ;;  %v1480_v59 = vadd.f32 %v10202_v36, %v6612_v9  ;;  %v10274_v62 = vld [vmem:[#allocation25_spill] sm:$0xff] }
 0x1cc   :  { %v6675_v4 = vadd.f32 %v6550_v37, %v1509_v50  ;;  %v1622_v40 = vadd.f32 %v6550_v37, %v1510_v15  ;;  %10194 = vst [vmem:[#allocation15_spill] sm:$0xff] %v6698_v30  ;;  %v10199_v50 = vld [vmem:[#allocation98_spill] sm:$0xff]  ;;  %v1607_v45 = vadd.f32 %v10191_v10, %v1495_v29  ;;  %v1608_v34 = vadd.f32 %v10191_v10, %v1496_v25 }
 0x1cd   :  { %v1488_v15 = vadd.f32 %v10199_v50, %v6624_v13  ;;  %10203 = vst [vmem:[#allocation17_spill] sm:$0xff] %v6739_v51  ;;  %v1472_v42 = vadd.f32 %v10207_v17, %v6598_v2  ;;  %v9929_v41 = vmax.f32 %v6698_v30, 0.0  ;;  %v6763_v2 = vmax.f32 %v1616_v19, 0.0  ;;  %v10211_v29 = vld [vmem:[#allocation86_spill] sm:$0xff]  ;;  %v10265_v30 = vld [vmem:[#allocation60_spill] sm:$0xff] }
 0x1ce   :  { %10188 = vst [vmem:[#allocation44_spill] sm:$0xff] %v6675_v4  ;;  %v9933_v47 = vmax.f32 %v6675_v4, 0.0  ;;  %v6695_v43 = vmax.f32 %v1622_v40, 0.0  ;;  %v1463_v25 = vadd.f32 %v10211_v29, %v6582_v12  ;;  %v6778_v50 = vmax.f32 %v6682_v60, 0.0 }
 0x1cf   :  { %10208 = vst [vmem:[#allocation85_spill] sm:$0xff] %v6755_v35  ;;  %v1592_v12 = vadd.f32 %v6604_v5, %v1480_v59  ;;  %v6788_v19 = vmax.f32 %v1607_v45, 0.0  ;;  %v9927_v36 = vmax.f32 %v6685_v38, 0.0  ;;  %v6801_v59 = vmax.f32 %v6688_v16, 0.0  ;;  %v10255_v38 = vld [vmem:[#allocation56_spill] sm:$0xff] }
 0x1d0   :  { %10193 = vst [vmem:[#allocation46_spill] sm:$0xff] %v6695_v43  ;;  %v1245_v1 = vpop.f32.mrf.mxu2  ;;  %v1286_v21 = vpop.f32.mrf.mxu3  ;;  %1975 = vmatpush.msra.mxu0 %v9933_v47  ;;  %2040 = vmatpush.msra.mxu1 %v6695_v43  ;;  %v9926_v16 = vmax.f32 %v6653_v33, 0.0 }
 0x1d1   :  { %v1511_v26 = vadd.f32 %v1245_v1, %v805_v63  ;;  %v1512_v53 = vadd.f32 %v1286_v21, %v846_v58  ;;  %v6713_v52 = vpop.f32.mrf.mxu0  ;;  %v6715_v7 = vpop.f32.mrf.mxu1  ;;  %v10201_v58 = vld [vmem:[#allocation94_spill] sm:$0xff]  ;;  %v1599_v1 = vadd.f32 %v10195_v54, %v1487_v23  ;;  %v1600_v21 = vadd.f32 %v10195_v54, %v1488_v15  ;;  %10210 = vst [vmem:[#allocation89_spill] sm:$0xff] %v6763_v2 }
 0x1d2   :  { %1976 = vmatpush.msra.mxu0 %v9932_v56  ;;  %2041 = vmatpush.msra.mxu1 %v6709_v48  ;;  %v1479_v13 = vadd.f32 %v10201_v58, %v6608_v6  ;;  %v10206_v6 = vld [vmem:[#allocation90_spill] sm:$0xff]  ;;  %v9928_v23 = vmax.f32 %v6679_v3, 0.0  ;;  %10215 = vst [vmem:[#allocation93_spill] sm:$0xff] %v6778_v50  ;;  %v10219_v58 = vld [vmem:[#allocation83_spill] sm:$0xff] }
 0x1d3   :  { %v1623_v63 = vadd.f32 %v6550_v37, %v1511_v26  ;;  %v1624_v11 = vadd.f32 %v6550_v37, %v1512_v53  ;;  %v1471_v9 = vadd.f32 %v10206_v6, %v6594_v0  ;;  %v6761_v0 = vmax.f32 %v1615_v18, 0.0  ;;  %v10212_v26 = vld [vmem:[#allocation87_spill] sm:$0xff]  ;;  %10216 = vst [vmem:[#allocation99_spill] sm:$0xff] %v6788_v19 }
 0x1d4   :  { %1977 = vmatpush.msra.mxu0 %v9931_v8  ;;  %2042 = vmatpush.msra.mxu1 %v6725_v27  ;;  %v1464_v53 = vadd.f32 %v10212_v26, %v6586_v20  ;;  %v1591_v15 = vadd.f32 %v6604_v5, %v1479_v13  ;;  %v1456_v13 = vadd.f32 %v10219_v58, %v6570_v44  ;;  %v6809_v44 = vmax.f32 %v1600_v21, 0.0  ;;  %v6840_v26 = vld [vmem:[%s9910_s3 + $0x80] sm:$0xff]  ;;  %v6917_v56 = vld [vmem:[%s9910_s3 + $0x98] sm:$0xff] }
 0x1d5   :  { %v6743_v28 = vmax.f32 %v1623_v63, 0.0  ;;  %v6745_v40 = vmax.f32 %v1624_v11, 0.0  ;;  %10209 = vst [vmem:[#allocation88_spill] sm:$0xff] %v6761_v0  ;;  %v6790_v63 = vmax.f32 %v1608_v34, 0.0  ;;  %v10218_v11 = vld [vmem:[#allocation82_spill] sm:$0xff]  ;;  %v1583_v45 = vadd.f32 %v6668_v31, %v1471_v9  ;;  %v10263_v3 = vld [vmem:[#allocation59_spill] sm:$0xff] }
 0x1d6   :  { %1978 = vmatpush.msra.mxu0 %v9930_v55  ;;  %2043 = vmatpush.msra.mxu1 %v6739_v51  ;;  %v1455_v60 = vadd.f32 %v10218_v11, %v6566_v39  ;;  %10220 = vst [vmem:[#allocation98_spill] sm:$0xff] %v6801_v59  ;;  %v1584_v34 = vadd.f32 %v6668_v31, %v1472_v42  ;;  %v6807_v39 = vmax.f32 %v1599_v1, 0.0  ;;  %v6816_v6 = vmax.f32 %v6656_v46, 0.0 }
 0x1d7   :  { %10204 = vst [vmem:[#allocation49_spill] sm:$0xff] %v6743_v28  ;;  %2105 = vmatpush.msra.mxu2 %v6743_v28  ;;  %2170 = vmatpush.msra.mxu3 %v6745_v40  ;;  %v1575_v9 = vadd.f32 %v6662_v49, %v1463_v25  ;;  %v1576_v17 = vadd.f32 %v6662_v49, %v1464_v53  ;;  %v6822_v42 = vmax.f32 %v1591_v15, 0.0  ;;  %v6824_v1 = vmax.f32 %v1592_v12, 0.0  ;;  %v10306_v49 = vld [vmem:[#allocation38_spill] sm:$0xff] }
 0x1d8   :  { %10205 = vst [vmem:[#allocation84_spill] sm:$0xff] %v6745_v40  ;;  %v6769_v61 = vpop.f32.mrf.mxu2  ;;  %v6771_v32 = vpop.f32.mrf.mxu3  ;;  %1979 = vmatpush.msra.mxu0 %v9929_v41  ;;  %2044 = vmatpush.msra.mxu1 %v6755_v35  ;;  %v1567_v46 = vadd.f32 %v6634_v22, %v1455_v60  ;;  %v1568_v21 = vadd.f32 %v6634_v22, %v1456_v13  ;;  %v6833_v29 = vmax.f32 %v1583_v45, 0.0  ;;  %v6835_v25 = vmax.f32 %v1584_v34, 0.0  ;;  %v10251_v35 = vld [vmem:[#allocation54_spill] sm:$0xff] }
 0x1d9   :  { %10213 = vst [vmem:[#allocation92_spill] sm:$0xff] %v6769_v61  ;;  %2106 = vmatpush.msra.mxu2 %v6761_v0  ;;  %2171 = vmatpush.msra.mxu3 %v6763_v2  ;;  %v6784_v20 = vpop.f32.mrf.mxu0  ;;  %v6786_v18 = vpop.f32.mrf.mxu1  ;;  %v10231_v12 = vmov 0.0   ;;  %v6854_v58 = vmax.f32 %v1575_v9, 0.0  ;;  %v6856_v13 = vmax.f32 %v1576_v17, 0.0  ;;  %v6875_v9 = vld [vmem:[%s9910_s3 + $0x88] sm:$0xff]  ;;  %v10264_v0 = vld [vmem:[#allocation8_spill] sm:$0xff] }
 0x1da   :  { %10214 = vst [vmem:[#allocation96_spill] sm:$0xff] %v6771_v32  ;;  %1980 = vmatpush.msra.mxu0 %v9928_v23  ;;  %2045 = vmatpush.msra.mxu1 %v6778_v50  ;;  %v6864_v45 = vmax.f32 %v1567_v46, 0.0  ;;  %v6866_v34 = vmax.f32 %v1568_v21, 0.0  ;;  %v6976_v48 = vadd.f32 %v10265_v30, %v10264_v0  ;;  %v10280_v30 = vld [vmem:[#allocation27_spill] sm:$0xff]  ;;  %v10281_v0 = vld [vmem:[#allocation66_spill] sm:$0xff]  ;;  %v10284_v32 = vld [vmem:[#allocation29_spill] sm:$0xff] }
 0x1db   :  { %10217 = vst [vmem:[#allocation97_spill] sm:$0xff] %v6790_v63  ;;  %2107 = vmatpush.msra.mxu2 %v6788_v19  ;;  %2172 = vmatpush.msra.mxu3 %v6790_v63  ;;  %v10244_v63 = vld [vmem:[#allocation50_spill] sm:$0xff]  ;;  %v878_v4 = vadd.f32 %v10281_v0, %v10280_v30  ;;  %v10285_v61 = vld [vmem:[#allocation68_spill] sm:$0xff]  ;;  %v10294_v0 = vld [vmem:[#allocation33_spill] sm:$0xff] }
 0x1dc   :  { %10221 = vst [vmem:[#allocation94_spill] sm:$0xff] %v6807_v39  ;;  %1981 = vmatpush.msra.mxu0 %v9927_v36  ;;  %2046 = vmatpush.msra.mxu1 %v6801_v59  ;;  %v6896_v36 = vld [vmem:[%s9910_s3 + $0x90] sm:$0xff]  ;;  %v10247_v59 = vld [vmem:[#allocation4_spill] sm:$0xff] }
 0x1dd   :  { %10222 = vst [vmem:[#allocation95_spill] sm:$0xff] %v6809_v44  ;;  %2108 = vmatpush.msra.mxu2 %v6807_v39  ;;  %2173 = vmatpush.msra.mxu3 %v6809_v44  ;;  %v10254_v39 = vld [vmem:[#allocation5_spill] sm:$0xff]  ;;  %v10261_v19 = vld [vmem:[#allocation58_spill] sm:$0xff] }
 0x1de   :  { %10223 = vst [vmem:[#allocation90_spill] sm:$0xff] %v6816_v6  ;;  %1982 = vmatpush.msra.mxu0 %v9926_v16  ;;  %2047 = vmatpush.msra.mxu1 %v6816_v6  ;;  %v10246_v6 = vld [vmem:[#allocation51_spill] sm:$0xff]  ;;  %v6962_v51 = vadd.f32 %v10255_v38, %v10254_v39  ;;  %v10270_v38 = vld [vmem:[#allocation10_spill] sm:$0xff] }
 0x1df   :  { %10224 = vst [vmem:[#allocation91_spill] sm:$0xff] %v6822_v42  ;;  %2109 = vmatpush.msra.mxu2 %v6822_v42  ;;  %2174 = vmatpush.msra.mxu3 %v6824_v1  ;;  %v10250_v42 = vld [vmem:[#allocation21_spill] sm:$0xff]  ;;  %v10271_v39 = vld [vmem:[#allocation62_spill] sm:$0xff] }
 0x1e0   :  { %10225 = vst [vmem:[#allocation86_spill] sm:$0xff] %v6824_v1  ;;  %v6842_v53 = vpop.f32.mrf.mxu2  ;;  %v6844_v15 = vpop.f32.mrf.mxu3  ;;  %1983 = vmatpush.msra.mxu0 %v10231_v12  ;;  %2048 = vmatpush.msra.mxu1 %v10231_v12  ;;  %v6934_v1 = vld [vmem:[%s9910_s3 + $0xa0] sm:$0xff]  ;;  %v869_v33 = vadd.f32 %v10251_v35, %v10250_v42  ;;  %v10262_v42 = vld [vmem:[#allocation23_spill] sm:$0xff]  ;;  %v875_v43 = vadd.f32 %v10271_v39, %v10270_v38  ;;  %v10286_v39 = vld [vmem:[#allocation30_spill] sm:$0xff] }
 0x1e1   :  { %10226 = vst [vmem:[#allocation87_spill] sm:$0xff] %v6833_v29  ;;  %2110 = vmatpush.msra.mxu2 %v6833_v29  ;;  %2175 = vmatpush.msra.mxu3 %v6835_v25  ;;  %v6850_v11 = vpop.f32.mrf.mxu0  ;;  %v6852_v60 = vpop.f32.mrf.mxu1  ;;  %v10248_v29 = vld [vmem:[#allocation52_spill] sm:$0xff]  ;;  %v6972_v27 = vadd.f32 %v10263_v3, %v10262_v42  ;;  %v10277_v3 = vld [vmem:[#allocation26_spill] sm:$0xff]  ;;  %v10278_v42 = vld [vmem:[#allocation65_spill] sm:$0xff]  ;;  %v7000_v38 = vadd.f32 %v10285_v61, %v10284_v32 }
 0x1e2   :  { %10227 = vst [vmem:[#allocation82_spill] sm:$0xff] %v6835_v25  ;;  %4687 = vmatmul.msk.f32.vlgmr.msra.gmra.mxu0 %vm307_vm0, %v6840_v26  ;;  %4703 = vmatmul.msk.f32.vlgmr.msra.gmra.mxu1 %vm307_vm0, %v6840_v26  ;;  %v6950_v50 = vadd.f32 %v10248_v29, %v10247_v59  ;;  %v10260_v29 = vld [vmem:[#allocation7_spill] sm:$0xff]  ;;  %v6992_v24 = vadd.f32 %v10278_v42, %v10277_v3  ;;  %v10291_v3 = vld [vmem:[#allocation70_spill] sm:$0xff] }
 0x1e3   :  { %10228 = vst [vmem:[#allocation83_spill] sm:$0xff] %v6840_v26  ;;  %2111 = vmatpush.msra.mxu2 %v6854_v58  ;;  %2176 = vmatpush.msra.mxu3 %v6856_v13  ;;  %v872_v35 = vadd.f32 %v10261_v19, %v10260_v29  ;;  %v10275_v19 = vld [vmem:[#allocation64_spill] sm:$0xff]  ;;  %v10297_v61 = vld [vmem:[#allocation75_spill] sm:$0xff] }
 0x1e4   :  { %10229 = vst [vmem:[#allocation100_spill] sm:$0xff] %v6842_v53  ;;  %v6988_v29 = vadd.f32 %v10275_v19, %v10274_v62  ;;  %v10288_v62 = vld [vmem:[#allocation35_spill] sm:$0xff]  ;;  %v10289_v19 = vld [vmem:[#allocation74_spill] sm:$0xff]  ;;  %v10300_v53 = vld [vmem:[#allocation40_spill] sm:$0xff] }
 0x1e5   :  { %10230 = vst [vmem:[#allocation101_spill] sm:$0xff] %v6844_v15  ;;  %2112 = vmatpush.msra.mxu2 %v6864_v45  ;;  %2177 = vmatpush.msra.mxu3 %v6866_v34  ;;  %v10290_v15 = vld [vmem:[#allocation31_spill] sm:$0xff] }
 0x1e6   :  { %10232 = vst [vmem:[#allocation102_spill] sm:$0xff] %v6854_v58  ;;  %v881_v42 = vadd.f32 %v10291_v3, %v10290_v15  ;;  %v10301_v15 = vld [vmem:[#allocation79_spill] sm:$0xff] }
 0x1e7   :  { %10233 = vst [vmem:[#allocation103_spill] sm:$0xff] %v6856_v13  ;;  %2113 = vmatpush.msra.mxu2 %v10231_v12  ;;  %2178 = vmatpush.msra.mxu3 %v10231_v12  ;;  %v10282_v12 = vld [vmem:[#allocation28_spill] sm:$0xff]  ;;  %v928_v3 = vadd.f32 %v10301_v15, %v10300_v53 }
 0x1e8   :  { %10234 = vst [vmem:[#allocation104_spill] sm:$0xff] %v6864_v45  ;;  %v6877_v17 = vpop.f32.mrf.mxu2  ;;  %v6879_v16 = vpop.f32.mrf.mxu3  ;;  %4719 = vmatmul.msk.f32.vlgmr.msra.gmra.mxu2 %vm307_vm0, %v6840_v26  ;;  %4735 = vmatmul.msk.f32.vlgmr.msra.gmra.mxu3 %vm307_vm0, %v6840_v26  ;;  %v10245_v45 = vld [vmem:[#allocation19_spill] sm:$0xff]  ;;  %v10309_v15 = vld [vmem:[#allocation80_spill] sm:$0xff] }
 0x1e9   :  { %10235 = vst [vmem:[#allocation105_spill] sm:$0xff] %v6866_v34  ;;  %v6885_v46 = vpop.f32.mrf.mxu0  ;;  %v6887_v21 = vpop.f32.mrf.mxu1  ;;  %v907_v58 = vadd.f32 %v10246_v6, %v10245_v45  ;;  %v10257_v6 = vld [vmem:[#allocation6_spill] sm:$0xff]  ;;  %v10258_v45 = vld [vmem:[#allocation57_spill] sm:$0xff] }
 0x1ea   :  { %10236 = vst [vmem:[#allocation106_spill] sm:$0xff] %v6875_v9  ;;  %4688 = vmatmul.msk.f32.gmra.mxu0 %vm307_vm0, %v6875_v9  ;;  %4704 = vmatmul.msk.f32.gmra.mxu1 %vm307_vm0, %v6875_v9  ;;  %v6966_v59 = vadd.f32 %v10258_v45, %v10257_v6  ;;  %v10272_v6 = vld [vmem:[#allocation24_spill] sm:$0xff]  ;;  %v10273_v45 = vld [vmem:[#allocation63_spill] sm:$0xff] }
 0x1eb   :  { %10237 = vst [vmem:[#allocation107_spill] sm:$0xff] %v6877_v17  ;;  %v916_v57 = vadd.f32 %v10273_v45, %v10272_v6  ;;  %v10287_v6 = vld [vmem:[#allocation69_spill] sm:$0xff]  ;;  %v10305_v17 = vld [vmem:[#allocation76_spill] sm:$0xff] }
 0x1ec   :  { %10238 = vst [vmem:[#allocation108_spill] sm:$0xff] %v6879_v16  ;;  %v7004_v45 = vadd.f32 %v10287_v6, %v10286_v39  ;;  %v10293_v16 = vld [vmem:[#allocation71_spill] sm:$0xff]  ;;  %v7021_v39 = vld [vmem:[%s9910_s3 + $0xa8] sm:$0xff] }
 0x1ed   :  { %10239 = vst [vmem:[#allocation109_spill] sm:$0xff] %v6896_v36  ;;  %v10298_v6 = vld [vmem:[#allocation39_spill] sm:$0xff] }
 0x1ee   :  { %10242 = vst [vmem:[#allocation112_spill] sm:$0xff] %v6917_v56 }
 0x1ef   :  { %10256 = vst [vmem:[#allocation50_spill] sm:$0xff] %v6962_v51 }
 0x1f0   :  { %v6898_v23 = vpop.f32.mrf.mxu2  ;;  %v6900_v41 = vpop.f32.mrf.mxu3  ;;  %4720 = vmatmul.msk.f32.gmra.mxu2 %vm307_vm0, %v6875_v9  ;;  %4736 = vmatmul.msk.f32.gmra.mxu3 %vm307_vm0, %v6875_v9  ;;  %10259 = vst [vmem:[#allocation19_spill] sm:$0xff] %v6966_v59  ;;  %v10292_v59 = vld [vmem:[#allocation32_spill] sm:$0xff] }
 0x1f1   :  { %10240 = vst [vmem:[#allocation110_spill] sm:$0xff] %v6898_v23  ;;  %v6906_v55 = vpop.f32.mrf.mxu0  ;;  %v6908_v8 = vpop.f32.mrf.mxu1  ;;  %v922_v30 = vadd.f32 %v10293_v16, %v10292_v59 }
 0x1f2   :  { %10241 = vst [vmem:[#allocation111_spill] sm:$0xff] %v6900_v41  ;;  %4689 = vmatmul.msk.f32.gmra.mxu0 %vm307_vm0, %v6896_v36  ;;  %4705 = vmatmul.msk.f32.gmra.mxu1 %vm307_vm0, %v6896_v36 }
 0x1f3   :  { %10266 = vst [vmem:[#allocation51_spill] sm:$0xff] %v6976_v48 }
 0x1f4   :  { %10276 = vst [vmem:[#allocation52_spill] sm:$0xff] %v6988_v29 }
 0x1f5   :  { %10279 = vst [vmem:[#allocation21_spill] sm:$0xff] %v6992_v24 }
 0x1f8   :  { %v6919_v47 = vpop.f32.mrf.mxu2  ;;  %v6921_v34 = vpop.f32.mrf.mxu3  ;;  %4721 = vmatmul.msk.f32.gmra.mxu2 %vm307_vm0, %v6896_v36  ;;  %4737 = vmatmul.msk.f32.gmra.mxu3 %vm307_vm0, %v6896_v36  ;;  %v10243_v36 = vld [vmem:[#allocation18_spill] sm:$0xff] }
 0x1f9   :  { %v1321_v13 = vpop.f32.mrf.mxu0  ;;  %v1362_v25 = vpop.f32.mrf.mxu1  ;;  %v866_v2 = vadd.f32 %v10244_v63, %v10243_v36  ;;  %10249 = vst [vmem:[#allocation18_spill] sm:$0xff] %v6950_v50  ;;  %v10253_v63 = vld [vmem:[#allocation55_spill] sm:$0xff]  ;;  %v884_v50 = vadd.f32 %v10289_v19, %v10288_v62  ;;  %v10299_v62 = vld [vmem:[#allocation78_spill] sm:$0xff] }
 0x1fa   :  { %4690 = vmatmul.msk.f32.gmra.mxu0 %vm307_vm0, %v6917_v56  ;;  %4706 = vmatmul.msk.f32.gmra.mxu1 %vm307_vm0, %v6917_v56  ;;  %v887_v19 = vadd.f32 %v10299_v62, %v10298_v6  ;;  %v10307_v6 = vld [vmem:[#allocation77_spill] sm:$0xff] }
 0x1fb   :  { %v1007_v62 = vadd.f32 %v10307_v6, %v10306_v49  ;;  %v1497_v49 = vadd.f32 %v1321_v13, %v881_v42 }
 0x200   :  { %v6936_v9 = vpop.f32.mrf.mxu2  ;;  %v6938_v44 = vpop.f32.mrf.mxu3  ;;  %4722 = vmatmul.msk.f32.gmra.mxu2 %vm307_vm0, %v6917_v56  ;;  %4738 = vmatmul.msk.f32.gmra.mxu3 %vm307_vm0, %v6917_v56  ;;  %v10252_v56 = vld [vmem:[#allocation22_spill] sm:$0xff] }
 0x201   :  { %v1324_v40 = vpop.f32.mrf.mxu0  ;;  %v1365_v26 = vpop.f32.mrf.mxu1  ;;  %v910_v36 = vadd.f32 %v10253_v63, %v10252_v56  ;;  %v10267_v56 = vld [vmem:[#allocation9_spill] sm:$0xff] }
 0x202   :  { %4691 = vmatmul.msk.f32.gmra.mxu0 %vm307_vm0, %v6934_v1  ;;  %4707 = vmatmul.msk.f32.gmra.mxu1 %vm307_vm0, %v6934_v1  ;;  %v10268_v63 = vld [vmem:[#allocation61_spill] sm:$0xff]  ;;  %v1505_v51 = vadd.f32 %v1324_v40, %v884_v50 }
 0x203   :  { %v6980_v28 = vadd.f32 %v10268_v63, %v10267_v56  ;;  %v10283_v56 = vld [vmem:[#allocation67_spill] sm:$0xff]  ;;  %v10308_v50 = vld [vmem:[#allocation41_spill] sm:$0xff] }
 0x204   :  { %v919_v63 = vadd.f32 %v10283_v56, %v10282_v12  ;;  %v10296_v56 = vld [vmem:[#allocation36_spill] sm:$0xff]  ;;  %v969_v24 = vadd.f32 %v10309_v15, %v10308_v50  ;;  %v1617_v6 = vadd.f32 %v6562_v14, %v1505_v51  ;;  %v1465_v50 = vadd.f32 %v6784_v20, %v869_v33  ;;  %v7067_v33 = vld [vmem:[%s9910_s3 + $0xb0] sm:$0xff] }
 0x205   :  { %10269 = vst [vmem:[#allocation4_spill] sm:$0xff] %v6980_v28  ;;  %v10295_v28 = vld [vmem:[#allocation72_spill] sm:$0xff]  ;;  %v925_v32 = vadd.f32 %v10297_v61, %v10296_v56  ;;  %v10304_v61 = vld [vmem:[#allocation37_spill] sm:$0xff]  ;;  %v1466_v51 = vadd.f32 %v6786_v18, %v910_v36 }
 0x206   :  { %v7014_v12 = vadd.f32 %v10295_v28, %v10294_v0  ;;  %v10302_v28 = vld [vmem:[#allocation34_spill] sm:$0xff]  ;;  %v10303_v0 = vld [vmem:[#allocation73_spill] sm:$0xff]  ;;  %v966_v48 = vadd.f32 %v10305_v17, %v10304_v61  ;;  %v1489_v61 = vadd.f32 %v6906_v55, %v878_v4  ;;  %v1481_v4 = vadd.f32 %v6885_v46, %v875_v43 }
 0x207   :  { %v1004_v56 = vadd.f32 %v10303_v0, %v10302_v28  ;;  %v1506_v41 = vadd.f32 %v1365_v26, %v925_v32  ;;  %v10310_v28 = vld [vmem:[#allocation42_spill] sm:$0xff]  ;;  %v10311_v0 = vld [vmem:[#allocation81_spill] sm:$0xff]  ;;  %v1498_v26 = vadd.f32 %v1362_v25, %v922_v30  ;;  %v1490_v32 = vadd.f32 %v6908_v8, %v919_v63 }
 0x208   :  { %v1406_v16 = vpop.f32.mrf.mxu2  ;;  %v1447_v59 = vpop.f32.mrf.mxu3  ;;  %4723 = vmatmul.msk.f32.gmra.mxu2 %vm307_vm0, %v6934_v1  ;;  %4739 = vmatmul.msk.f32.gmra.mxu3 %vm307_vm0, %v6934_v1  ;;  %v1010_v17 = vadd.f32 %v10311_v0, %v10310_v28  ;;  %v1482_v55 = vadd.f32 %v6887_v21, %v916_v57  ;;  %v1601_v43 = vadd.f32 %v10195_v54, %v1489_v61  ;;  %v7075_v18 = vmax.f32 %v1617_v6, 0.0  ;;  %v10315_v0 = vld [vmem:[#allocation52_spill] sm:$0xff] }
 0x209   :  { %v1327_v53 = vpop.f32.mrf.mxu0  ;;  %v1368_v40 = vpop.f32.mrf.mxu1  ;;  %v1618_v15 = vadd.f32 %v6562_v14, %v1506_v41  ;;  %v1602_v57 = vadd.f32 %v10195_v54, %v1490_v32  ;;  %v1507_v41 = vadd.f32 %v1406_v16, %v966_v48  ;;  %v1474_v48 = vadd.f32 %v6852_v60, %v6972_v27  ;;  %v10318_v32 = vld [vmem:[#allocation111_spill] sm:$0xff] }
 0x20a   :  { %v1513_v23 = vadd.f32 %v1327_v53, %v887_v19  ;;  %v1514_v29 = vadd.f32 %v1368_v40, %v928_v3  ;;  %4692 = vmatmul.msk.f32.gmra.mxu0 %vm307_vm0, %v7021_v39  ;;  %4708 = vmatmul.msk.f32.gmra.mxu1 %vm307_vm0, %v7021_v39  ;;  %v1457_v53 = vadd.f32 %v6713_v52, %v866_v2  ;;  %v7102_v42 = vmax.f32 %v1601_v43, 0.0 }
 0x20b   :  { %v1458_v40 = vadd.f32 %v6715_v7, %v907_v58  ;;  %v1609_v52 = vadd.f32 %v10191_v10, %v1497_v49  ;;  %v1610_v7 = vadd.f32 %v10191_v10, %v1498_v26  ;;  %v7079_v46 = vmax.f32 %v1618_v15, 0.0  ;;  %v10317_v26 = vld [vmem:[#allocation21_spill] sm:$0xff]  ;;  %v10321_v15 = vld [vmem:[#allocation51_spill] sm:$0xff] }
 0x20c   :  { %v1625_v19 = vadd.f32 %v6550_v37, %v1513_v23  ;;  %v1626_v3 = vadd.f32 %v6550_v37, %v1514_v29  ;;  %v1473_v23 = vadd.f32 %v6850_v11, %v872_v35  ;;  %v1508_v11 = vadd.f32 %v1447_v59, %v1007_v62  ;;  %v10326_v43 = vld [vmem:[#allocation4_spill] sm:$0xff] }
 0x20d   :  { %v1593_v21 = vadd.f32 %v6604_v5, %v1481_v4  ;;  %v1594_v36 = vadd.f32 %v6604_v5, %v1482_v55  ;;  %v7095_v27 = vmax.f32 %v1609_v52, 0.0  ;;  %v7097_v60 = vmax.f32 %v1610_v7, 0.0  ;;  %v10322_v4 = vld [vmem:[#allocation107_spill] sm:$0xff]  ;;  %v10325_v52 = vld [vmem:[#allocation100_spill] sm:$0xff] }
 0x20e   :  { %v7056_v25 = vmax.f32 %v1625_v19, 0.0  ;;  %v7058_v8 = vmax.f32 %v1626_v3, 0.0  ;;  %v1499_v29 = vadd.f32 %v6936_v9, %v7014_v12  ;;  %v1500_v63 = vadd.f32 %v6938_v44, %v1004_v56 }
 0x20f   :  { %v7104_v30 = vmax.f32 %v1602_v57, 0.0  ;;  %v7108_v16 = vadd.f32 %v6562_v14, %v1508_v11  ;;  %v1569_v9 = vadd.f32 %v6634_v22, %v1457_v53  ;;  %v1570_v44 = vadd.f32 %v6634_v22, %v1458_v40  ;;  %v7152_v40 = vld [vmem:[%s9910_s3 + $0xb8] sm:$0xff]  ;;  %v10327_v57 = vld [vmem:[#allocation108_spill] sm:$0xff] }
 0x210   :  { %v1409_v2 = vpop.f32.mrf.mxu2  ;;  %v1450_v20 = vpop.f32.mrf.mxu3  ;;  %4724 = vmatmul.msk.f32.gmra.mxu2 %vm307_vm0, %v7021_v39  ;;  %4740 = vmatmul.msk.f32.gmra.mxu3 %vm307_vm0, %v7021_v39  ;;  %v1491_v12 = vadd.f32 %v6919_v47, %v7000_v38  ;;  %v1492_v56 = vadd.f32 %v6921_v34, %v7004_v45  ;;  %v1586_v28 = vadd.f32 %v6668_v31, %v1474_v48  ;;  %v7127_v49 = vmax.f32 %v1593_v21, 0.0  ;;  %v10320_v45 = vld [vmem:[#allocation43_spill] sm:$0xff]  ;;  %v10329_v48 = vld [vmem:[#allocation20_spill] sm:$0xff]  ;;  %v10330_v21 = vld [vmem:[#allocation53_spill] sm:$0xff] }
 0x211   :  { %v1515_v58 = vadd.f32 %v1409_v2, %v969_v24  ;;  %v1516_v13 = vadd.f32 %v1450_v20, %v1010_v17  ;;  %2235 = vmatpush.msrb.mxu0 %v7056_v25  ;;  %2300 = vmatpush.msrb.mxu1 %v7058_v8  ;;  %10313 = vst [vmem:[#allocation22_spill] sm:$0xff] %v7104_v30  ;;  %v10316_v17 = vld [vmem:[#allocation110_spill] sm:$0xff]  ;;  %v7138_v38 = vmax.f32 %v1594_v36, 0.0 }
 0x212   :  { %4693 = vmatmul.msk.f32.gmra.mxu0 %vm307_vm0, %v7067_v33  ;;  %4709 = vmatmul.msk.f32.gmra.mxu1 %vm307_vm0, %v7067_v33  ;;  %10314 = vst [vmem:[#allocation55_spill] sm:$0xff] %v7108_v16  ;;  %v1483_v61 = vadd.f32 %v10316_v17, %v10315_v0  ;;  %v1484_v6 = vadd.f32 %v10318_v32, %v10317_v26  ;;  %v7171_v20 = vmax.f32 %v1586_v28, 0.0 }
 0x213   :  { %v1627_v24 = vadd.f32 %v6550_v37, %v1515_v58  ;;  %v7091_v35 = vadd.f32 %v6550_v37, %v1516_v13  ;;  %2236 = vmatpush.msrb.mxu0 %v7075_v18  ;;  %2301 = vmatpush.msrb.mxu1 %v7079_v46  ;;  %v1619_v37 = vadd.f32 %v6562_v14, %v1507_v41 }
 0x214   :  { %v1585_v14 = vadd.f32 %v6668_v31, %v1473_v23  ;;  %v1611_v47 = vadd.f32 %v10191_v10, %v1499_v29  ;;  %v7133_v34 = vadd.f32 %v10191_v10, %v1500_v63  ;;  %v1577_v19 = vadd.f32 %v10320_v45, %v1465_v50  ;;  %v10324_v23 = vld [vmem:[#allocation50_spill] sm:$0xff]  ;;  %v10332_v29 = vld [vmem:[#allocation101_spill] sm:$0xff] }
 0x215   :  { %10312 = vst [vmem:[#allocation54_spill] sm:$0xff] %v7091_v35  ;;  %v7110_v59 = vmax.f32 %v1627_v24, 0.0  ;;  %v10008_v62 = vmax.f32 %v7091_v35, 0.0  ;;  %2237 = vmatpush.msrb.mxu0 %v7095_v27  ;;  %2302 = vmatpush.msrb.mxu1 %v7097_v60  ;;  %v1578_v3 = vadd.f32 %v10320_v45, %v1466_v51  ;;  %v7146_v53 = vmax.f32 %v1619_v37, 0.0  ;;  %v10331_v24 = vld [vmem:[#allocation19_spill] sm:$0xff]  ;;  %v10395_v35 = vld [vmem:[#allocation105_spill] sm:$0xff] }
 0x216   :  { %10319 = vst [vmem:[#allocation5_spill] sm:$0xff] %v7133_v34  ;;  %v10007_v10 = vmax.f32 %v7108_v16, 0.0  ;;  %v1475_v50 = vadd.f32 %v10322_v4, %v10321_v15  ;;  %v1603_v55 = vadd.f32 %v10195_v54, %v1491_v12  ;;  %v7158_v51 = vadd.f32 %v10195_v54, %v1492_v56  ;;  %v10333_v12 = vld [vmem:[#allocation18_spill] sm:$0xff]  ;;  %v10334_v56 = vld [vmem:[#allocation92_spill] sm:$0xff]  ;;  %v10392_v16 = vld [vmem:[#allocation103_spill] sm:$0xff] }
 0x217   :  { %2238 = vmatpush.msrb.mxu0 %v7102_v42  ;;  %2303 = vmatpush.msrb.mxu1 %v7104_v30  ;;  %v1467_v7 = vadd.f32 %v10325_v52, %v10324_v23  ;;  %v1476_v41 = vadd.f32 %v10327_v57, %v10326_v43  ;;  %v7169_v2 = vmax.f32 %v1585_v14, 0.0  ;;  %v1595_v54 = vadd.f32 %v6604_v5, %v1483_v61  ;;  %v10335_v61 = vld [vmem:[#allocation96_spill] sm:$0xff] }
 0x218   :  { %2365 = vmatpush.msrb.mxu2 %v7110_v59  ;;  %2430 = vmatpush.msrb.mxu3 %v10008_v62  ;;  %10323 = vst [vmem:[#allocation56_spill] sm:$0xff] %v7158_v51  ;;  %v7175_v11 = vadd.f32 %v6604_v5, %v1484_v6  ;;  %v7181_v58 = vmax.f32 %v1611_v47, 0.0  ;;  %v10006_v13 = vmax.f32 %v7133_v34, 0.0  ;;  %v989_v36 = vadd.f32 %v10330_v21, %v10329_v48  ;;  %v7234_v4 = vld [vmem:[%s9910_s3 + $0xc0] sm:$0xff]  ;;  %v10346_v48 = vld [vmem:[#allocation14_spill] sm:$0xff]  ;;  %v10376_v62 = vld [vmem:[#allocation83_spill] sm:$0xff] }
 0x219   :  { %4725 = vmatmul.msk.f32.gmra.mxu2 %vm307_vm0, %v7067_v33  ;;  %4741 = vmatmul.msk.f32.gmra.mxu3 %vm307_vm0, %v7067_v33  ;;  %v1468_v63 = vadd.f32 %v10332_v29, %v10331_v24  ;;  %v7190_v5 = vmax.f32 %v1577_v19, 0.0  ;;  %v7192_v37 = vmax.f32 %v1578_v3, 0.0  ;;  %v1459_v14 = vadd.f32 %v10334_v56, %v10333_v12  ;;  %v10348_v24 = vld [vmem:[#allocation47_spill] sm:$0xff]  ;;  %v10351_v12 = vld [vmem:[#allocation49_spill] sm:$0xff]  ;;  %v10352_v56 = vld [vmem:[#allocation16_spill] sm:$0xff] }
 0x21a   :  { %2239 = vmatpush.msrb.mxu0 %v7127_v49  ;;  %2304 = vmatpush.msrb.mxu1 %v7138_v38  ;;  %10328 = vst [vmem:[#allocation6_spill] sm:$0xff] %v7175_v11  ;;  %v1587_v28 = vadd.f32 %v6668_v31, %v1475_v50  ;;  %v7200_v0 = vmax.f32 %v1603_v55, 0.0  ;;  %v10005_v17 = vmax.f32 %v7158_v51, 0.0  ;;  %v1460_v26 = vadd.f32 %v10335_v61, %v989_v36  ;;  %v7277_v36 = vld [vmem:[%s9910_s3 + $0xc8] sm:$0xff]  ;;  %v10355_v61 = vld [vmem:[#allocation88_spill] sm:$0xff]  ;;  %v10388_v34 = vld [vmem:[#allocation86_spill] sm:$0xff] }
 0x21b   :  { %2366 = vmatpush.msrb.mxu2 %v7146_v53  ;;  %2431 = vmatpush.msrb.mxu3 %v10007_v10  ;;  %v7205_v32 = vadd.f32 %v6668_v31, %v1476_v41  ;;  %v7209_v6 = vmax.f32 %v1569_v9, 0.0  ;;  %v7211_v47 = vmax.f32 %v1570_v44, 0.0  ;;  %v1579_v19 = vadd.f32 %v10320_v45, %v1467_v7  ;;  %v10342_v7 = vld [vmem:[#allocation44_spill] sm:$0xff]  ;;  %v10383_v51 = vld [vmem:[#allocation97_spill] sm:$0xff] }
 0x21c   :  { %4694 = vmatmul.msk.f32.gmra.mxu0 %vm307_vm0, %v7152_v40  ;;  %4710 = vmatmul.msk.f32.gmra.mxu1 %vm307_vm0, %v7152_v40  ;;  %v7217_v3 = vmax.f32 %v1595_v54, 0.0  ;;  %v10004_v31 = vmax.f32 %v7175_v11, 0.0  ;;  %v7221_v15 = vadd.f32 %v10320_v45, %v1468_v63  ;;  %v1571_v9 = vadd.f32 %v6634_v22, %v1459_v14  ;;  %v10344_v41 = vld [vmem:[#allocation12_spill] sm:$0xff]  ;;  %v10350_v63 = vld [vmem:[#allocation46_spill] sm:$0xff]  ;;  %v10353_v14 = vld [vmem:[#allocation15_spill] sm:$0xff] }
 0x21d   :  { %2240 = vmatpush.msrb.mxu0 %v7169_v2  ;;  %2305 = vmatpush.msrb.mxu1 %v7171_v20  ;;  %10336 = vst [vmem:[#allocation57_spill] sm:$0xff] %v7205_v32  ;;  %v7229_v44 = vmax.f32 %v1587_v28, 0.0  ;;  %v7237_v45 = vadd.f32 %v6634_v22, %v1460_v26  ;;  %v10003_v50 = vmax.f32 %v7205_v32, 0.0  ;;  %v10340_v55 = vmov 0.0   ;;  %v10356_v26 = vld [vmem:[#allocation48_spill] sm:$0xff] }
 0x21e   :  { %2367 = vmatpush.msrb.mxu2 %v7181_v58  ;;  %2432 = vmatpush.msrb.mxu3 %v10006_v13  ;;  %10337 = vst [vmem:[#allocation7_spill] sm:$0xff] %v7217_v3  ;;  %v7246_v23 = vmax.f32 %v1579_v19, 0.0  ;;  %v10002_v22 = vmax.f32 %v7221_v15, 0.0  ;;  %v7256_v52 = vmax.f32 %v1571_v9, 0.0  ;;  %v10343_v43 = vmax.f32 %v10342_v7, 0.0  ;;  %v10357_v19 = vld [vmem:[#allocation13_spill] sm:$0xff] }
 0x21f   :  { %2241 = vmatpush.msrb.mxu0 %v7190_v5  ;;  %2306 = vmatpush.msrb.mxu1 %v7192_v37  ;;  %10338 = vst [vmem:[#allocation58_spill] sm:$0xff] %v7221_v15  ;;  %v10001_v57 = vmax.f32 %v7237_v45, 0.0  ;;  %v10345_v54 = vmax.f32 %v10344_v41, 0.0  ;;  %v10347_v21 = vmax.f32 %v10346_v48, 0.0  ;;  %v10349_v29 = vmax.f32 %v10348_v24, 0.0  ;;  %v10359_v7 = vld [vmem:[#allocation99_spill] sm:$0xff] }
 0x220   :  { %2368 = vmatpush.msrb.mxu2 %v7200_v0  ;;  %2433 = vmatpush.msrb.mxu3 %v10005_v17  ;;  %10339 = vst [vmem:[#allocation23_spill] sm:$0xff] %v7237_v45  ;;  %v10354_v28 = vmax.f32 %v10353_v14, 0.0  ;;  %v10358_v9 = vmax.f32 %v10357_v19, 0.0  ;;  %v10361_v41 = vld [vmem:[#allocation45_spill] sm:$0xff]  ;;  %v10363_v48 = vld [vmem:[#allocation94_spill] sm:$0xff]  ;;  %v10364_v24 = vld [vmem:[#allocation11_spill] sm:$0xff] }
 0x221   :  { %2242 = vmatpush.msrb.mxu0 %v7209_v6  ;;  %2307 = vmatpush.msrb.mxu1 %v7211_v47  ;;  %10341 = vst [vmem:[#allocation59_spill] sm:$0xff] %v7256_v52  ;;  %v10366_v14 = vld [vmem:[#allocation85_spill] sm:$0xff]  ;;  %v7384_v17 = vld [vmem:[%s9910_s3 + $0xf8] sm:$0xff] }
 0x222   :  { %2369 = vmatpush.msrb.mxu2 %v7217_v3  ;;  %2434 = vmatpush.msrb.mxu3 %v10004_v31  ;;  %v10368_v19 = vld [vmem:[#allocation93_spill] sm:$0xff]  ;;  %v7371_v31 = vld [vmem:[%s9910_s3 + $0xf0] sm:$0xff] }
 0x223   :  { %4726 = vmatmul.msk.f32.gmra.mxu2 %vm307_vm0, %v7152_v40  ;;  %4742 = vmatmul.msk.f32.gmra.mxu3 %vm307_vm0, %v7152_v40 }
 0x224   :  { %2308 = vmatpush.msrb.mxu1 %v10340_v55  ;;  %2370 = vmatpush.msrb.mxu2 %v7229_v44 }
 0x225   :  { %2435 = vmatpush.msrb.mxu3 %v10003_v50  ;;  %4695 = vmatmul.msk.f32.gmra.mxu0 %vm307_vm0, %v7234_v4  ;;  %v7358_v50 = vld [vmem:[%s9910_s3 + $0xe8] sm:$0xff] }
 0x226   :  { %4711 = vmatmul.msk.f32.gmra.mxu1 %vm307_vm0, %v7234_v4  ;;  %2371 = vmatpush.msrb.mxu2 %v7246_v23 }
 0x227   :  { %2608 = vmatpush.msra.mxu1 %v10343_v43  ;;  %2436 = vmatpush.msrb.mxu3 %v10002_v22  ;;  %v10360_v43 = vld [vmem:[#allocation17_spill] sm:$0xff]  ;;  %v7345_v22 = vld [vmem:[%s9910_s3 + $0xe0] sm:$0xff] }
 0x228   :  { %2372 = vmatpush.msrb.mxu2 %v7256_v52  ;;  %2243 = vmatpush.msrb.mxu0 %v10340_v55 }
 0x229   :  { %2609 = vmatpush.msra.mxu1 %v10345_v54  ;;  %2437 = vmatpush.msrb.mxu3 %v10001_v57  ;;  %v10362_v54 = vmax.f32 %v10361_v41, 0.0  ;;  %v10370_v41 = vld [vmem:[#allocation98_spill] sm:$0xff]  ;;  %v10373_v57 = vld [vmem:[#allocation104_spill] sm:$0xff] }
 0x22a   :  { %2373 = vmatpush.msrb.mxu2 %v10340_v55  ;;  %2551 = vmatpush.msra.mxu0 %v10340_v55 }
 0x22b   :  { %2610 = vmatpush.msra.mxu1 %v10347_v21  ;;  %2438 = vmatpush.msrb.mxu3 %v10340_v55  ;;  %v7306_v21 = vld [vmem:[%s9910_s3 + $0xd0] sm:$0xff] }
 0x22c   :  { %4727 = vmatmul.msk.f32.gmra.mxu2 %vm307_vm0, %v7234_v4  ;;  %4743 = vmatmul.msk.f32.gmra.mxu3 %vm307_vm0, %v7234_v4 }
 0x22d   :  { %2611 = vmatpush.msra.mxu1 %v10349_v29  ;;  %2673 = vmatpush.msra.mxu2 %v10350_v63  ;;  %v10365_v29 = vmax.f32 %v10364_v24, 0.0  ;;  %v10372_v24 = vld [vmem:[#allocation90_spill] sm:$0xff] }
 0x22e   :  { %2738 = vmatpush.msra.mxu3 %v10351_v12  ;;  %4696 = vmatmul.msk.f32.gmra.mxu0 %vm307_vm0, %v7277_v36 }
 0x22f   :  { %4712 = vmatmul.msk.f32.gmra.mxu1 %vm307_vm0, %v7277_v36  ;;  %2674 = vmatpush.msra.mxu2 %v10352_v56 }
 0x230   :  { %2612 = vmatpush.msra.mxu1 %v10354_v28  ;;  %2739 = vmatpush.msra.mxu3 %v10355_v61  ;;  %v10367_v28 = vld [vmem:[#allocation91_spill] sm:$0xff] }
 0x231   :  { %2675 = vmatpush.msra.mxu2 %v10356_v26 }
 0x232   :  { %2613 = vmatpush.msra.mxu1 %v10358_v9  ;;  %2740 = vmatpush.msra.mxu3 %v10359_v7  ;;  %v10369_v9 = vld [vmem:[#allocation87_spill] sm:$0xff] }
 0x233   :  { %2676 = vmatpush.msra.mxu2 %v10360_v43 }
 0x234   :  { %2614 = vmatpush.msra.mxu1 %v10362_v54  ;;  %2741 = vmatpush.msra.mxu3 %v10363_v48  ;;  %v10371_v54 = vld [vmem:[#allocation102_spill] sm:$0xff] }
 0x235   :  { %4728 = vmatmul.msk.f32.gmra.mxu2 %vm307_vm0, %v7277_v36  ;;  %4744 = vmatmul.msk.f32.gmra.mxu3 %vm307_vm0, %v7277_v36 }
 0x236   :  { %2615 = vmatpush.msra.mxu1 %v10365_v29  ;;  %2677 = vmatpush.msra.mxu2 %v10366_v14  ;;  %v7329_v29 = vld [vmem:[%s9910_s3 + $0xd8] sm:$0xff] }
 0x237   :  { %2742 = vmatpush.msra.mxu3 %v10367_v28  ;;  %4697 = vmatmul.msk.f32.gmra.mxu0 %vm307_vm0, %v7306_v21 }
 0x238   :  { %4713 = vmatmul.msk.f32.gmra.mxu1 %vm307_vm0, %v7306_v21  ;;  %2678 = vmatpush.msra.mxu2 %v10368_v19 }
 0x239   :  { %2743 = vmatpush.msra.mxu3 %v10369_v9  ;;  %2616 = vmatpush.msra.mxu1 %v10340_v55 }
 0x23a   :  { %2679 = vmatpush.msra.mxu2 %v10370_v41 }
 0x23b   :  { %2744 = vmatpush.msra.mxu3 %v10371_v54 }
 0x23c   :  { %2680 = vmatpush.msra.mxu2 %v10372_v24 }
 0x23d   :  { %2745 = vmatpush.msra.mxu3 %v10373_v57  ;;  %4729 = vmatmul.msk.f32.gmra.mxu2 %vm307_vm0, %v7306_v21 }
 0x23e   :  { %4745 = vmatmul.msk.f32.gmra.mxu3 %vm307_vm0, %v7306_v21  ;;  %2681 = vmatpush.msra.mxu2 %v10340_v55 }
 0x23f   :  { %4698 = vmatmul.msk.f32.gmra.mxu0 %vm307_vm0, %v7329_v29  ;;  %2746 = vmatpush.msra.mxu3 %v10340_v55 }
 0x240   :  { %4714 = vmatmul.msk.f32.gmra.mxu1 %vm307_vm0, %v7329_v29 }
 0x245   :  { %4730 = vmatmul.msk.f32.gmra.mxu2 %vm307_vm0, %v7329_v29 }
 0x246   :  { %4746 = vmatmul.msk.f32.gmra.mxu3 %vm307_vm0, %v7329_v29 }
 0x247   :  { %4699 = vmatmul.msk.f32.gmra.mxu0 %vm307_vm0, %v7345_v22 }
 0x248   :  { %4715 = vmatmul.msk.f32.gmra.mxu1 %vm307_vm0, %v7345_v22 }
 0x24d   :  { %4731 = vmatmul.msk.f32.gmra.mxu2 %vm307_vm0, %v7345_v22 }
 0x24e   :  { %4747 = vmatmul.msk.f32.gmra.mxu3 %vm307_vm0, %v7345_v22 }
 0x24f   :  { %4700 = vmatmul.msk.f32.gmra.mxu0 %vm307_vm0, %v7358_v50 }
 0x250   :  { %4716 = vmatmul.msk.f32.gmra.mxu1 %vm307_vm0, %v7358_v50 }
 0x255   :  { %4732 = vmatmul.msk.f32.gmra.mxu2 %vm307_vm0, %v7358_v50 }
 0x256   :  { %4748 = vmatmul.msk.f32.gmra.mxu3 %vm307_vm0, %v7358_v50 }
 0x257   :  { %4701 = vmatmul.msk.f32.gmra.mxu0 %vm307_vm0, %v7371_v31 }
 0x258   :  { %4717 = vmatmul.msk.f32.gmra.mxu1 %vm307_vm0, %v7371_v31 }
 0x25d   :  { %4733 = vmatmul.msk.f32.gmra.mxu2 %vm307_vm0, %v7371_v31 }
 0x25e   :  { %4749 = vmatmul.msk.f32.gmra.mxu3 %vm307_vm0, %v7371_v31 }
 0x25f   :  { %4702 = vmatmul.msk.f32.gmra.mxu0 %vm307_vm0, %v7384_v17  ;;  %v7392_v13 = vpop.f32.mrf.mxu0  ;;  %v7394_v10 = vpop.f32.mrf.mxu1 }
 0x260   :  { %10374 = vst [vmem:[#allocation8_spill] sm:$0xff] %v7392_v13  ;;  %4718 = vmatmul.msk.f32.gmra.mxu1 %vm307_vm0, %v7384_v17  ;;  %v10380_v13 = vld [vmem:[#allocation89_spill] sm:$0xff] }
 0x261   :  { %10375 = vst [vmem:[#allocation60_spill] sm:$0xff] %v7394_v10  ;;  %v10379_v10 = vld [vmem:[#allocation84_spill] sm:$0xff] }
 0x265   :  { %4734 = vmatmul.msk.f32.gmra.mxu2 %vm307_vm0, %v7384_v17 }
 0x266   :  { %4750 = vmatmul.msk.f32.gmra.mxu3 %vm307_vm0, %v7384_v17 }
 0x267   :  { %4751 = vmatmul.msk.f32.vlgmr.msrb.gmra.mxu0 %vm307_vm0, %v10376_v62  ;;  %v7404_v45 = vpop.f32.mrf.mxu0  ;;  %v7406_v15 = vpop.f32.mrf.mxu1 }
 0x268   :  { %10377 = vst [vmem:[#allocation9_spill] sm:$0xff] %v7404_v45  ;;  %4767 = vmatmul.msk.f32.vlgmr.msrb.gmra.mxu1 %vm307_vm0, %v10376_v62  ;;  %2803 = vmatpush.msrb.mxu0 %v10379_v10 }
 0x269   :  { %10378 = vst [vmem:[#allocation61_spill] sm:$0xff] %v7406_v15  ;;  %2868 = vmatpush.msrb.mxu1 %v7056_v25  ;;  %v10384_v15 = vld [vmem:[#allocation95_spill] sm:$0xff] }
 0x26a   :  { %2804 = vmatpush.msrb.mxu0 %v10380_v13 }
 0x26b   :  { %2869 = vmatpush.msrb.mxu1 %v7075_v18  ;;  %v7414_v32 = vpop.f32.mrf.mxu2  ;;  %v7416_v11 = vpop.f32.mrf.mxu3 }
 0x26c   :  { %10381 = vst [vmem:[#allocation10_spill] sm:$0xff] %v7414_v32  ;;  %2805 = vmatpush.msrb.mxu0 %v10383_v51 }
 0x26d   :  { %10382 = vst [vmem:[#allocation62_spill] sm:$0xff] %v7416_v11  ;;  %2870 = vmatpush.msrb.mxu1 %v7095_v27  ;;  %4783 = vmatmul.msk.f32.vlgmr.msrb.gmra.mxu2 %vm307_vm0, %v10376_v62  ;;  %v10387_v11 = vld [vmem:[#allocation106_spill] sm:$0xff] }
 0x26e   :  { %4799 = vmatmul.msk.f32.vlgmr.msrb.gmra.mxu3 %vm307_vm0, %v10376_v62  ;;  %2806 = vmatpush.msrb.mxu0 %v10384_v15  ;;  %v10389_v62 = vld [vmem:[#allocation82_spill] sm:$0xff] }
 0x26f   :  { %2871 = vmatpush.msrb.mxu1 %v7102_v42  ;;  %2933 = vmatpush.msrb.mxu2 %v7058_v8  ;;  %v7427_v45 = vpop.f32.mrf.mxu0  ;;  %v7429_v32 = vpop.f32.mrf.mxu1 }
 0x270   :  { %10385 = vst [vmem:[#allocation24_spill] sm:$0xff] %v7427_v45  ;;  %2998 = vmatpush.msrb.mxu3 %v7110_v59  ;;  %4752 = vmatmul.msk.f32.gmra.mxu0 %vm307_vm0, %v10387_v11 }
 0x271   :  { %10386 = vst [vmem:[#allocation63_spill] sm:$0xff] %v7429_v32  ;;  %4768 = vmatmul.msk.f32.gmra.mxu1 %vm307_vm0, %v10387_v11  ;;  %2807 = vmatpush.msrb.mxu0 %v10388_v34 }
 0x272   :  { %2872 = vmatpush.msrb.mxu1 %v7127_v49  ;;  %2934 = vmatpush.msrb.mxu2 %v7079_v46 }
 0x273   :  { %2999 = vmatpush.msrb.mxu3 %v7146_v53  ;;  %2808 = vmatpush.msrb.mxu0 %v10389_v62  ;;  %v7441_v45 = vpop.f32.mrf.mxu2  ;;  %v7443_v32 = vpop.f32.mrf.mxu3 }
 0x274   :  { %10390 = vst [vmem:[#allocation25_spill] sm:$0xff] %v7441_v45  ;;  %2873 = vmatpush.msrb.mxu1 %v7169_v2  ;;  %2935 = vmatpush.msrb.mxu2 %v7097_v60 }
 0x275   :  { %10391 = vst [vmem:[#allocation64_spill] sm:$0xff] %v7443_v32  ;;  %3000 = vmatpush.msrb.mxu3 %v7181_v58  ;;  %2809 = vmatpush.msrb.mxu0 %v10392_v16 }
 0x276   :  { %2874 = vmatpush.msrb.mxu1 %v7190_v5  ;;  %2936 = vmatpush.msrb.mxu2 %v7104_v30  ;;  %v10396_v30 = vld [vmem:[#allocation109_spill] sm:$0xff] }
 0x277   :  { %3001 = vmatpush.msrb.mxu3 %v7200_v0  ;;  %4784 = vmatmul.msk.f32.gmra.mxu2 %vm307_vm0, %v10387_v11  ;;  %v7454_v45 = vpop.f32.mrf.mxu0  ;;  %v7456_v32 = vpop.f32.mrf.mxu1 }
 0x278   :  { %10393 = vst [vmem:[#allocation26_spill] sm:$0xff] %v7454_v45  ;;  %4800 = vmatmul.msk.f32.gmra.mxu3 %vm307_vm0, %v10387_v11  ;;  %2810 = vmatpush.msrb.mxu0 %v10395_v35 }
 0x279   :  { %10394 = vst [vmem:[#allocation65_spill] sm:$0xff] %v7456_v32  ;;  %2875 = vmatpush.msrb.mxu1 %v7209_v6  ;;  %2937 = vmatpush.msrb.mxu2 %v7138_v38 }
 0x27a   :  { %3002 = vmatpush.msrb.mxu3 %v7217_v3  ;;  %4753 = vmatmul.msk.f32.gmra.mxu0 %vm307_vm0, %v10396_v30 }
 0x27b   :  { %4769 = vmatmul.msk.f32.gmra.mxu1 %vm307_vm0, %v10396_v30  ;;  %2938 = vmatpush.msrb.mxu2 %v7171_v20  ;;  %v7469_v32 = vpop.f32.mrf.mxu2  ;;  %v7471_v45 = vpop.f32.mrf.mxu3 }
 0x27c   :  { %10397 = vst [vmem:[#allocation27_spill] sm:$0xff] %v7469_v32  ;;  %3003 = vmatpush.msrb.mxu3 %v7229_v44  ;;  %2811 = vmatpush.msrb.mxu0 %v10340_v55  ;;  %v10401_v32 = vld [vmem:[#allocation112_spill] sm:$0xff] }
 0x27d   :  { %10398 = vst [vmem:[#allocation66_spill] sm:$0xff] %v7471_v45  ;;  %2939 = vmatpush.msrb.mxu2 %v7192_v37  ;;  %2876 = vmatpush.msrb.mxu1 %v10340_v55 }
 0x27e   :  { %3004 = vmatpush.msrb.mxu3 %v7246_v23 }
 0x27f   :  { %2940 = vmatpush.msrb.mxu2 %v7211_v47  ;;  %v7479_v11 = vpop.f32.mrf.mxu0  ;;  %v7481_v3 = vpop.f32.mrf.mxu1 }
 0x280   :  { %10399 = vst [vmem:[#allocation28_spill] sm:$0xff] %v7479_v11  ;;  %3005 = vmatpush.msrb.mxu3 %v7256_v52  ;;  %4785 = vmatmul.msk.f32.gmra.mxu2 %vm307_vm0, %v10396_v30 }
 0x281   :  { %10400 = vst [vmem:[#allocation67_spill] sm:$0xff] %v7481_v3  ;;  %4801 = vmatmul.msk.f32.gmra.mxu3 %vm307_vm0, %v10396_v30  ;;  %2941 = vmatpush.msrb.mxu2 %v10340_v55 }
 0x282   :  { %4754 = vmatmul.msk.f32.gmra.mxu0 %vm307_vm0, %v10401_v32  ;;  %3006 = vmatpush.msrb.mxu3 %v10340_v55 }
 0x283   :  { %4770 = vmatmul.msk.f32.gmra.mxu1 %vm307_vm0, %v10401_v32  ;;  %v7494_v11 = vpop.f32.mrf.mxu2  ;;  %v7496_v3 = vpop.f32.mrf.mxu3 }
 0x284   :  { %10402 = vst [vmem:[#allocation29_spill] sm:$0xff] %v7494_v11 }
 0x285   :  { %10403 = vst [vmem:[#allocation68_spill] sm:$0xff] %v7496_v3 }
 0x287   :  { %v7498_v45 = vpop.f32.mrf.mxu0  ;;  %v7500_v52 = vpop.f32.mrf.mxu1 }
 0x288   :  { %10404 = vst [vmem:[#allocation30_spill] sm:$0xff] %v7498_v45  ;;  %4786 = vmatmul.msk.f32.gmra.mxu2 %vm307_vm0, %v10401_v32 }
 0x289   :  { %10405 = vst [vmem:[#allocation69_spill] sm:$0xff] %v7500_v52  ;;  %4802 = vmatmul.msk.f32.gmra.mxu3 %vm307_vm0, %v10401_v32 }
 0x28a   :  { %4755 = vmatmul.msk.f32.gmra.mxu0 %vm307_vm0, %v6934_v1 }
 0x28b   :  { %4771 = vmatmul.msk.f32.gmra.mxu1 %vm307_vm0, %v6934_v1  ;;  %v7510_v30 = vpop.f32.mrf.mxu2  ;;  %v7512_v11 = vpop.f32.mrf.mxu3 }
 0x28f   :  { %v7514_v3 = vpop.f32.mrf.mxu0  ;;  %v7516_v45 = vpop.f32.mrf.mxu1 }
 0x290   :  { %10406 = vst [vmem:[#allocation35_spill] sm:$0xff] %v7514_v3  ;;  %4787 = vmatmul.msk.f32.gmra.mxu2 %vm307_vm0, %v6934_v1 }
 0x291   :  { %10407 = vst [vmem:[#allocation74_spill] sm:$0xff] %v7516_v45  ;;  %4803 = vmatmul.msk.f32.gmra.mxu3 %vm307_vm0, %v6934_v1 }
 0x292   :  { %4756 = vmatmul.msk.f32.gmra.mxu0 %vm307_vm0, %v7021_v39 }
 0x293   :  { %4772 = vmatmul.msk.f32.gmra.mxu1 %vm307_vm0, %v7021_v39  ;;  %v7526_v32 = vpop.f32.mrf.mxu2  ;;  %v7528_v52 = vpop.f32.mrf.mxu3 }
 0x294   :  { %10408 = vst [vmem:[#allocation31_spill] sm:$0xff] %v7526_v32 }
 0x298   :  { %4788 = vmatmul.msk.f32.gmra.mxu2 %vm307_vm0, %v7021_v39 }
 0x299   :  { %4804 = vmatmul.msk.f32.gmra.mxu3 %vm307_vm0, %v7021_v39  ;;  %v7534_v45 = vpop.f32.mrf.mxu0  ;;  %v7536_v3 = vpop.f32.mrf.mxu1 }
 0x29a   :  { %10409 = vst [vmem:[#allocation70_spill] sm:$0xff] %v7534_v45  ;;  %4757 = vmatmul.msk.f32.gmra.mxu0 %vm307_vm0, %v7067_v33 }
 0x29b   :  { %10410 = vst [vmem:[#allocation32_spill] sm:$0xff] %v7536_v3  ;;  %4773 = vmatmul.msk.f32.gmra.mxu1 %vm307_vm0, %v7067_v33 }
 0x29c   :  { %v7542_v1 = vpop.f32.mrf.mxu2  ;;  %v7544_v32 = vpop.f32.mrf.mxu3 }
 0x29d   :  { %10411 = vst [vmem:[#allocation71_spill] sm:$0xff] %v7542_v1 }
 0x2a0   :  { %4789 = vmatmul.msk.f32.gmra.mxu2 %vm307_vm0, %v7067_v33 }
 0x2a1   :  { %4805 = vmatmul.msk.f32.gmra.mxu3 %vm307_vm0, %v7067_v33 }
 0x2a2   :  { %4758 = vmatmul.msk.f32.gmra.mxu0 %vm307_vm0, %v7152_v40  ;;  %v7552_v39 = vpop.f32.mrf.mxu0 }
 0x2a3   :  { %10412 = vst [vmem:[#allocation33_spill] sm:$0xff] %v7552_v39  ;;  %4774 = vmatmul.msk.f32.gmra.mxu1 %vm307_vm0, %v7152_v40  ;;  %v7556_v3 = vpop.f32.mrf.mxu1 }
 0x2a4   :  { %10413 = vst [vmem:[#allocation72_spill] sm:$0xff] %v7556_v3 }
 0x2a6   :  { %v7558_v45 = vpop.f32.mrf.mxu2  ;;  %v7560_v1 = vpop.f32.mrf.mxu3 }
 0x2a7   :  { %10414 = vst [vmem:[#allocation36_spill] sm:$0xff] %v7558_v45 }
 0x2a8   :  { %4790 = vmatmul.msk.f32.gmra.mxu2 %vm307_vm0, %v7152_v40 }
 0x2a9   :  { %4806 = vmatmul.msk.f32.gmra.mxu3 %vm307_vm0, %v7152_v40 }
 0x2aa   :  { %4759 = vmatmul.msk.f32.gmra.mxu0 %vm307_vm0, %v7234_v4 }
 0x2ab   :  { %4775 = vmatmul.msk.f32.gmra.mxu1 %vm307_vm0, %v7234_v4  ;;  %v7570_v33 = vpop.f32.mrf.mxu0 }
 0x2ac   :  { %10415 = vst [vmem:[#allocation75_spill] sm:$0xff] %v7570_v33  ;;  %v7572_v39 = vpop.f32.mrf.mxu1 }
 0x2af   :  { %v7574_v3 = vpop.f32.mrf.mxu2  ;;  %v7576_v45 = vpop.f32.mrf.mxu3 }
 0x2b0   :  { %10416 = vst [vmem:[#allocation39_spill] sm:$0xff] %v7574_v3  ;;  %4791 = vmatmul.msk.f32.gmra.mxu2 %vm307_vm0, %v7234_v4 }
 0x2b1   :  { %10417 = vst [vmem:[#allocation78_spill] sm:$0xff] %v7576_v45  ;;  %4807 = vmatmul.msk.f32.gmra.mxu3 %vm307_vm0, %v7234_v4 }
 0x2b2   :  { %4760 = vmatmul.msk.f32.gmra.mxu0 %vm307_vm0, %v7277_v36 }
 0x2b3   :  { %4776 = vmatmul.msk.f32.gmra.mxu1 %vm307_vm0, %v7277_v36 }
 0x2b4   :  { %v7586_v40 = vpop.f32.mrf.mxu0 }
 0x2b5   :  { %10418 = vst [vmem:[#allocation40_spill] sm:$0xff] %v7586_v40  ;;  %v7588_v33 = vpop.f32.mrf.mxu1 }
 0x2b6   :  { %10419 = vst [vmem:[#allocation79_spill] sm:$0xff] %v7588_v33 }
 0x2b8   :  { %4792 = vmatmul.msk.f32.gmra.mxu2 %vm307_vm0, %v7277_v36  ;;  %v7592_v45 = vpop.f32.mrf.mxu2  ;;  %v7594_v3 = vpop.f32.mrf.mxu3 }
 0x2b9   :  { %10420 = vst [vmem:[#allocation34_spill] sm:$0xff] %v7592_v45  ;;  %4808 = vmatmul.msk.f32.gmra.mxu3 %vm307_vm0, %v7277_v36  ;;  %v8649_v45 = vld [vmem:[%s9910_s3 + $0x170] sm:$0xff] }
 0x2ba   :  { %10421 = vst [vmem:[#allocation73_spill] sm:$0xff] %v7594_v3  ;;  %4761 = vmatmul.msk.f32.gmra.mxu0 %vm307_vm0, %v7306_v21 }
 0x2bb   :  { %4777 = vmatmul.msk.f32.gmra.mxu1 %vm307_vm0, %v7306_v21  ;;  %10611 = vst [vmem:[#allocation210_spill] sm:$0xff] %v8649_v45 }
 0x2bc   :  { %v7602_v4 = vpop.f32.mrf.mxu0 }
 0x2bd   :  { %10422 = vst [vmem:[#allocation37_spill] sm:$0xff] %v7602_v4  ;;  %v7604_v40 = vpop.f32.mrf.mxu1 }
 0x2be   :  { %10423 = vst [vmem:[#allocation76_spill] sm:$0xff] %v7604_v40 }
 0x2c0   :  { %4793 = vmatmul.msk.f32.gmra.mxu2 %vm307_vm0, %v7306_v21  ;;  %v7608_v33 = vpop.f32.mrf.mxu2 }
 0x2c1   :  { %10424 = vst [vmem:[#allocation38_spill] sm:$0xff] %v7608_v33  ;;  %4809 = vmatmul.msk.f32.gmra.mxu3 %vm307_vm0, %v7306_v21  ;;  %v7612_v3 = vpop.f32.mrf.mxu3  ;;  %v8544_v33 = vld [vmem:[%s9910_s3 + $0x148] sm:$0xff] }
 0x2c2   :  { %10425 = vst [vmem:[#allocation77_spill] sm:$0xff] %v7612_v3  ;;  %4762 = vmatmul.msk.f32.gmra.mxu0 %vm307_vm0, %v7329_v29 }
 0x2c3   :  { %4778 = vmatmul.msk.f32.gmra.mxu1 %vm307_vm0, %v7329_v29 }
 0x2c4   :  { %v7618_v36 = vpop.f32.mrf.mxu0 }
 0x2c5   :  { %10426 = vst [vmem:[#allocation41_spill] sm:$0xff] %v7618_v36  ;;  %v7620_v4 = vpop.f32.mrf.mxu1 }
 0x2c6   :  { %10427 = vst [vmem:[#allocation80_spill] sm:$0xff] %v7620_v4 }
 0x2c8   :  { %4794 = vmatmul.msk.f32.gmra.mxu2 %vm307_vm0, %v7329_v29  ;;  %v7624_v40 = vpop.f32.mrf.mxu2 }
 0x2c9   :  { %10428 = vst [vmem:[#allocation42_spill] sm:$0xff] %v7624_v40  ;;  %4810 = vmatmul.msk.f32.gmra.mxu3 %vm307_vm0, %v7329_v29  ;;  %v7628_v21 = vpop.f32.mrf.mxu3 }
 0x2ca   :  { %10429 = vst [vmem:[#allocation81_spill] sm:$0xff] %v7628_v21  ;;  %4763 = vmatmul.msk.f32.gmra.mxu0 %vm307_vm0, %v7345_v22 }
 0x2cb   :  { %4779 = vmatmul.msk.f32.gmra.mxu1 %vm307_vm0, %v7345_v22 }
 0x2cc   :  { %v7634_v3 = vpop.f32.mrf.mxu0 }
 0x2cd   :  { %10430 = vst [vmem:[#allocation52_spill] sm:$0xff] %v7634_v3  ;;  %v7636_v36 = vpop.f32.mrf.mxu1 }
 0x2ce   :  { %10431 = vst [vmem:[#allocation110_spill] sm:$0xff] %v7636_v36 }
 0x2d0   :  { %4795 = vmatmul.msk.f32.gmra.mxu2 %vm307_vm0, %v7345_v22  ;;  %v7640_v4 = vpop.f32.mrf.mxu2 }
 0x2d1   :  { %10432 = vst [vmem:[#allocation21_spill] sm:$0xff] %v7640_v4  ;;  %4811 = vmatmul.msk.f32.gmra.mxu3 %vm307_vm0, %v7345_v22  ;;  %v7644_v29 = vpop.f32.mrf.mxu3 }
 0x2d2   :  { %10433 = vst [vmem:[#allocation111_spill] sm:$0xff] %v7644_v29  ;;  %4764 = vmatmul.msk.f32.gmra.mxu0 %vm307_vm0, %v7358_v50 }
 0x2d3   :  { %4780 = vmatmul.msk.f32.gmra.mxu1 %vm307_vm0, %v7358_v50 }
 0x2d4   :  { %v7650_v21 = vpop.f32.mrf.mxu0 }
 0x2d5   :  { %10434 = vst [vmem:[#allocation43_spill] sm:$0xff] %v7650_v21  ;;  %v7652_v3 = vpop.f32.mrf.mxu1 }
 0x2d6   :  { %10435 = vst [vmem:[#allocation51_spill] sm:$0xff] %v7652_v3 }
 0x2d8   :  { %4796 = vmatmul.msk.f32.gmra.mxu2 %vm307_vm0, %v7358_v50  ;;  %v7656_v36 = vpop.f32.mrf.mxu2 }
 0x2d9   :  { %10436 = vst [vmem:[#allocation107_spill] sm:$0xff] %v7656_v36  ;;  %4812 = vmatmul.msk.f32.gmra.mxu3 %vm307_vm0, %v7358_v50  ;;  %v7660_v22 = vpop.f32.mrf.mxu3 }
 0x2da   :  { %10437 = vst [vmem:[#allocation50_spill] sm:$0xff] %v7660_v22  ;;  %4765 = vmatmul.msk.f32.gmra.mxu0 %vm307_vm0, %v7371_v31 }
 0x2db   :  { %4781 = vmatmul.msk.f32.gmra.mxu1 %vm307_vm0, %v7371_v31 }
 0x2dc   :  { %v7666_v29 = vpop.f32.mrf.mxu0 }
 0x2dd   :  { %10438 = vst [vmem:[#allocation100_spill] sm:$0xff] %v7666_v29  ;;  %v7668_v21 = vpop.f32.mrf.mxu1 }
 0x2de   :  { %10439 = vst [vmem:[#allocation4_spill] sm:$0xff] %v7668_v21  ;;  %v7689_v21 = vld [vmem:[%s9910_s3] sm:$0xff] }
 0x2e0   :  { %4797 = vmatmul.msk.f32.gmra.mxu2 %vm307_vm0, %v7371_v31  ;;  %v7672_v3 = vpop.f32.mrf.mxu2 }
 0x2e1   :  { %10440 = vst [vmem:[#allocation108_spill] sm:$0xff] %v7672_v3  ;;  %4813 = vmatmul.msk.f32.gmra.mxu3 %vm307_vm0, %v7371_v31  ;;  %v7676_v50 = vpop.f32.mrf.mxu3 }
 0x2e2   :  { %10441 = vst [vmem:[#allocation20_spill] sm:$0xff] %v7676_v50  ;;  %4766 = vmatmul.msk.f32.gmra.mxu0 %vm307_vm0, %v7384_v17 }
 0x2e3   :  { %4782 = vmatmul.msk.f32.gmra.mxu1 %vm307_vm0, %v7384_v17 }
 0x2e4   :  { %v7682_v22 = vpop.f32.mrf.mxu0 }
 0x2e5   :  { %10442 = vst [vmem:[#allocation53_spill] sm:$0xff] %v7682_v22  ;;  %v7684_v29 = vpop.f32.mrf.mxu1 }
 0x2e6   :  { %10443 = vst [vmem:[#allocation19_spill] sm:$0xff] %v7684_v29 }
 0x2e8   :  { %4798 = vmatmul.msk.f32.gmra.mxu2 %vm307_vm0, %v7384_v17  ;;  %v7693_v31 = vpop.f32.mrf.mxu2 }
 0x2e9   :  { %10444 = vst [vmem:[#allocation101_spill] sm:$0xff] %v7693_v31  ;;  %4814 = vmatmul.msk.f32.gmra.mxu3 %vm307_vm0, %v7384_v17  ;;  %v7697_v50 = vpop.f32.mrf.mxu3  ;;  %v7718_v17 = vld [vmem:[%s9910_s3 + $0x8] sm:$0xff] }
 0x2ea   :  { %10445 = vst [vmem:[#allocation18_spill] sm:$0xff] %v7697_v50  ;;  %4815 = vmatmul.msk.f32.vlgmr.msra.gmra.mxu0 %vm307_vm0, %v7689_v21 }
 0x2eb   :  { %4831 = vmatmul.msk.f32.vlgmr.msra.gmra.mxu1 %vm307_vm0, %v7689_v21  ;;  %3208 = vmatpush.msra.mxu0 %v10350_v63 }
 0x2ec   :  { %3273 = vmatpush.msra.mxu1 %v10351_v12 }
 0x2ed   :  { %3209 = vmatpush.msra.mxu0 %v10352_v56  ;;  %v7706_v29 = vpop.f32.mrf.mxu0 }
 0x2ee   :  { %10446 = vst [vmem:[#allocation92_spill] sm:$0xff] %v7706_v29  ;;  %3274 = vmatpush.msra.mxu1 %v10355_v61  ;;  %v7709_v22 = vpop.f32.mrf.mxu1  ;;  %v7830_v61 = vld [vmem:[%s9910_s3 + $0x28] sm:$0xff] }
 0x2ef   :  { %10447 = vst [vmem:[#allocation96_spill] sm:$0xff] %v7709_v22  ;;  %3210 = vmatpush.msra.mxu0 %v10356_v26  ;;  %v7977_v22 = vld [vmem:[%s9910_s3 + $0x60] sm:$0xff]  ;;  %v7998_v29 = vld [vmem:[%s9910_s3 + $0x68] sm:$0xff] }
 0x2f0   :  { %3275 = vmatpush.msra.mxu1 %v10359_v7  ;;  %4847 = vmatmul.msk.f32.vlgmr.msra.gmra.mxu2 %vm307_vm0, %v7689_v21  ;;  %v7720_v63 = vpop.f32.mrf.mxu2 }
 0x2f1   :  { %10448 = vst [vmem:[#allocation44_spill] sm:$0xff] %v7720_v63  ;;  %4863 = vmatmul.msk.f32.vlgmr.msra.gmra.mxu3 %vm307_vm0, %v7689_v21  ;;  %3211 = vmatpush.msra.mxu0 %v10360_v43  ;;  %v7725_v12 = vpop.f32.mrf.mxu3 }
 0x2f2   :  { %10449 = vst [vmem:[#allocation12_spill] sm:$0xff] %v7725_v12  ;;  %3276 = vmatpush.msra.mxu1 %v10363_v48  ;;  %3338 = vmatpush.msra.mxu2 %v10379_v10 }
 0x2f3   :  { %3403 = vmatpush.msra.mxu3 %v7056_v25  ;;  %4816 = vmatmul.msk.f32.gmra.mxu0 %vm307_vm0, %v7718_v17 }
 0x2f4   :  { %4832 = vmatmul.msk.f32.gmra.mxu1 %vm307_vm0, %v7718_v17  ;;  %3212 = vmatpush.msra.mxu0 %v10366_v14  ;;  %v7851_v14 = vld [vmem:[%s9910_s3 + $0x30] sm:$0xff] }
 0x2f5   :  { %3277 = vmatpush.msra.mxu1 %v10367_v28  ;;  %3339 = vmatpush.msra.mxu2 %v10380_v13 }
 0x2f6   :  { %3404 = vmatpush.msra.mxu3 %v7075_v18  ;;  %3213 = vmatpush.msra.mxu0 %v10368_v19  ;;  %v7755_v18 = vld [vmem:[%s9910_s3 + $0x10] sm:$0xff] }
 0x2f7   :  { %3278 = vmatpush.msra.mxu1 %v10369_v9  ;;  %3340 = vmatpush.msra.mxu2 %v10383_v51  ;;  %v7741_v25 = vpop.f32.mrf.mxu0 }
 0x2f8   :  { %10450 = vst [vmem:[#allocation14_spill] sm:$0xff] %v7741_v25  ;;  %3405 = vmatpush.msra.mxu3 %v7095_v27  ;;  %3214 = vmatpush.msra.mxu0 %v10370_v41  ;;  %v7745_v10 = vpop.f32.mrf.mxu1  ;;  %v7956_v25 = vld [vmem:[%s9910_s3 + $0x58] sm:$0xff] }
 0x2f9   :  { %10451 = vst [vmem:[#allocation47_spill] sm:$0xff] %v7745_v10  ;;  %3279 = vmatpush.msra.mxu1 %v10371_v54  ;;  %3341 = vmatpush.msra.mxu2 %v10384_v15  ;;  %v7872_v54 = vld [vmem:[%s9910_s3 + $0x38] sm:$0xff] }
 0x2fa   :  { %3406 = vmatpush.msra.mxu3 %v7102_v42  ;;  %4848 = vmatmul.msk.f32.gmra.mxu2 %vm307_vm0, %v7718_v17  ;;  %v7757_v51 = vpop.f32.mrf.mxu2 }
 0x2fb   :  { %10452 = vst [vmem:[#allocation46_spill] sm:$0xff] %v7757_v51  ;;  %4864 = vmatmul.msk.f32.gmra.mxu3 %vm307_vm0, %v7718_v17  ;;  %3215 = vmatpush.msra.mxu0 %v10372_v24  ;;  %v7762_v27 = vpop.f32.mrf.mxu3 }
 0x2fc   :  { %10453 = vst [vmem:[#allocation49_spill] sm:$0xff] %v7762_v27  ;;  %3280 = vmatpush.msra.mxu1 %v10373_v57  ;;  %3342 = vmatpush.msra.mxu2 %v10388_v34 }
 0x2fd   :  { %3407 = vmatpush.msra.mxu3 %v7127_v49  ;;  %4817 = vmatmul.msk.f32.gmra.mxu0 %vm307_vm0, %v7755_v18  ;;  %v7785_v49 = vld [vmem:[%s9910_s3 + $0x18] sm:$0xff] }
 0x2fe   :  { %4833 = vmatmul.msk.f32.gmra.mxu1 %vm307_vm0, %v7755_v18  ;;  %3343 = vmatpush.msra.mxu2 %v10389_v62 }
 0x2ff   :  { %3408 = vmatpush.msra.mxu3 %v7169_v2  ;;  %v7773_v42 = vpop.f32.mrf.mxu0  ;;  %3216 = vmatpush.msra.mxu0 %v10340_v55 }
 0x300   :  { %10454 = vst [vmem:[#allocation16_spill] sm:$0xff] %v7773_v42  ;;  %3344 = vmatpush.msra.mxu2 %v10392_v16  ;;  %v7777_v13 = vpop.f32.mrf.mxu1  ;;  %3281 = vmatpush.msra.mxu1 %v10340_v55 }
 0x301   :  { %10455 = vst [vmem:[#allocation15_spill] sm:$0xff] %v7777_v13  ;;  %3409 = vmatpush.msra.mxu3 %v7190_v5  ;;  %v7809_v5 = vld [vmem:[%s9910_s3 + $0x20] sm:$0xff]  ;;  %v7935_v13 = vld [vmem:[%s9910_s3 + $0x50] sm:$0xff] }
 0x302   :  { %3345 = vmatpush.msra.mxu2 %v10395_v35 }
 0x303   :  { %3410 = vmatpush.msra.mxu3 %v7209_v6  ;;  %4849 = vmatmul.msk.f32.gmra.mxu2 %vm307_vm0, %v7755_v18  ;;  %v7790_v34 = vpop.f32.mrf.mxu2 }
 0x304   :  { %10456 = vst [vmem:[#allocation88_spill] sm:$0xff] %v7790_v34  ;;  %4865 = vmatmul.msk.f32.gmra.mxu3 %vm307_vm0, %v7755_v18  ;;  %v7794_v16 = vpop.f32.mrf.mxu3  ;;  %3346 = vmatpush.msra.mxu2 %v10340_v55 }
 0x305   :  { %10457 = vst [vmem:[#allocation48_spill] sm:$0xff] %v7794_v16  ;;  %4818 = vmatmul.msk.f32.gmra.mxu0 %vm307_vm0, %v7785_v49  ;;  %3411 = vmatpush.msra.mxu3 %v10340_v55 }
 0x306   :  { %4834 = vmatmul.msk.f32.gmra.mxu1 %vm307_vm0, %v7785_v49 }
 0x307   :  { %v7802_v35 = vpop.f32.mrf.mxu0 }
 0x308   :  { %10458 = vst [vmem:[#allocation13_spill] sm:$0xff] %v7802_v35  ;;  %v7804_v2 = vpop.f32.mrf.mxu1 }
 0x309   :  { %10459 = vst [vmem:[#allocation99_spill] sm:$0xff] %v7804_v2 }
 0x30b   :  { %4850 = vmatmul.msk.f32.gmra.mxu2 %vm307_vm0, %v7785_v49  ;;  %v7813_v6 = vpop.f32.mrf.mxu2 }
 0x30c   :  { %10460 = vst [vmem:[#allocation17_spill] sm:$0xff] %v7813_v6  ;;  %4866 = vmatmul.msk.f32.gmra.mxu3 %vm307_vm0, %v7785_v49  ;;  %v7817_v15 = vpop.f32.mrf.mxu3 }
 0x30d   :  { %10461 = vst [vmem:[#allocation45_spill] sm:$0xff] %v7817_v15  ;;  %4819 = vmatmul.msk.f32.gmra.mxu0 %vm307_vm0, %v7809_v5 }
 0x30e   :  { %4835 = vmatmul.msk.f32.gmra.mxu1 %vm307_vm0, %v7809_v5 }
 0x30f   :  { %v7823_v57 = vpop.f32.mrf.mxu0 }
 0x310   :  { %10462 = vst [vmem:[#allocation94_spill] sm:$0xff] %v7823_v57  ;;  %v7825_v56 = vpop.f32.mrf.mxu1  ;;  %v7914_v57 = vld [vmem:[%s9910_s3 + $0x48] sm:$0xff] }
 0x311   :  { %10463 = vst [vmem:[#allocation11_spill] sm:$0xff] %v7825_v56 }
 0x313   :  { %4851 = vmatmul.msk.f32.gmra.mxu2 %vm307_vm0, %v7809_v5  ;;  %v7834_v26 = vpop.f32.mrf.mxu2 }
 0x314   :  { %10464 = vst [vmem:[#allocation85_spill] sm:$0xff] %v7834_v26  ;;  %4867 = vmatmul.msk.f32.gmra.mxu3 %vm307_vm0, %v7809_v5  ;;  %v7838_v7 = vpop.f32.mrf.mxu3 }
 0x315   :  { %10465 = vst [vmem:[#allocation91_spill] sm:$0xff] %v7838_v7  ;;  %4820 = vmatmul.msk.f32.gmra.mxu0 %vm307_vm0, %v7830_v61 }
 0x316   :  { %4836 = vmatmul.msk.f32.gmra.mxu1 %vm307_vm0, %v7830_v61 }
 0x317   :  { %v7844_v43 = vpop.f32.mrf.mxu0 }
 0x318   :  { %10466 = vst [vmem:[#allocation93_spill] sm:$0xff] %v7844_v43  ;;  %v7846_v48 = vpop.f32.mrf.mxu1 }
 0x319   :  { %10467 = vst [vmem:[#allocation87_spill] sm:$0xff] %v7846_v48  ;;  %v7893_v48 = vld [vmem:[%s9910_s3 + $0x40] sm:$0xff] }
 0x31b   :  { %4852 = vmatmul.msk.f32.gmra.mxu2 %vm307_vm0, %v7830_v61  ;;  %v7855_v28 = vpop.f32.mrf.mxu2 }
 0x31c   :  { %10468 = vst [vmem:[#allocation98_spill] sm:$0xff] %v7855_v28  ;;  %4868 = vmatmul.msk.f32.gmra.mxu3 %vm307_vm0, %v7830_v61  ;;  %v7859_v19 = vpop.f32.mrf.mxu3 }
 0x31d   :  { %10469 = vst [vmem:[#allocation102_spill] sm:$0xff] %v7859_v19  ;;  %4821 = vmatmul.msk.f32.gmra.mxu0 %vm307_vm0, %v7851_v14 }
 0x31e   :  { %4837 = vmatmul.msk.f32.gmra.mxu1 %vm307_vm0, %v7851_v14 }
 0x31f   :  { %v7865_v9 = vpop.f32.mrf.mxu0 }
 0x320   :  { %10470 = vst [vmem:[#allocation90_spill] sm:$0xff] %v7865_v9  ;;  %v7867_v41 = vpop.f32.mrf.mxu1 }
 0x321   :  { %10471 = vst [vmem:[#allocation104_spill] sm:$0xff] %v7867_v41 }
 0x323   :  { %4853 = vmatmul.msk.f32.gmra.mxu2 %vm307_vm0, %v7851_v14  ;;  %v7876_v24 = vpop.f32.mrf.mxu2 }
 0x324   :  { %10472 = vst [vmem:[#allocation83_spill] sm:$0xff] %v7876_v24  ;;  %4869 = vmatmul.msk.f32.gmra.mxu3 %vm307_vm0, %v7851_v14  ;;  %v7880_v62 = vpop.f32.mrf.mxu3 }
 0x325   :  { %10473 = vst [vmem:[#allocation84_spill] sm:$0xff] %v7880_v62  ;;  %4822 = vmatmul.msk.f32.gmra.mxu0 %vm307_vm0, %v7872_v54 }
 0x326   :  { %4838 = vmatmul.msk.f32.gmra.mxu1 %vm307_vm0, %v7872_v54 }
 0x327   :  { %v7886_v41 = vpop.f32.mrf.mxu0 }
 0x328   :  { %10474 = vst [vmem:[#allocation89_spill] sm:$0xff] %v7886_v41  ;;  %v7888_v9 = vpop.f32.mrf.mxu1 }
 0x329   :  { %10475 = vst [vmem:[#allocation97_spill] sm:$0xff] %v7888_v9 }
 0x32b   :  { %4854 = vmatmul.msk.f32.gmra.mxu2 %vm307_vm0, %v7872_v54  ;;  %v7897_v43 = vpop.f32.mrf.mxu2 }
 0x32c   :  { %10476 = vst [vmem:[#allocation95_spill] sm:$0xff] %v7897_v43  ;;  %4870 = vmatmul.msk.f32.gmra.mxu3 %vm307_vm0, %v7872_v54  ;;  %v7901_v56 = vpop.f32.mrf.mxu3 }
 0x32d   :  { %10477 = vst [vmem:[#allocation106_spill] sm:$0xff] %v7901_v56  ;;  %4823 = vmatmul.msk.f32.gmra.mxu0 %vm307_vm0, %v7893_v48 }
 0x32e   :  { %4839 = vmatmul.msk.f32.gmra.mxu1 %vm307_vm0, %v7893_v48 }
 0x32f   :  { %v7907_v9 = vpop.f32.mrf.mxu0 }
 0x330   :  { %10478 = vst [vmem:[#allocation86_spill] sm:$0xff] %v7907_v9  ;;  %v7909_v41 = vpop.f32.mrf.mxu1 }
 0x331   :  { %10479 = vst [vmem:[#allocation82_spill] sm:$0xff] %v7909_v41 }
 0x333   :  { %4855 = vmatmul.msk.f32.gmra.mxu2 %vm307_vm0, %v7893_v48  ;;  %v7918_v2 = vpop.f32.mrf.mxu2 }
 0x334   :  { %10480 = vst [vmem:[#allocation103_spill] sm:$0xff] %v7918_v2  ;;  %4871 = vmatmul.msk.f32.gmra.mxu3 %vm307_vm0, %v7893_v48  ;;  %v7922_v35 = vpop.f32.mrf.mxu3  ;;  %v8019_v2 = vld [vmem:[%s9910_s3 + $0x70] sm:$0xff] }
 0x335   :  { %10481 = vst [vmem:[#allocation105_spill] sm:$0xff] %v7922_v35  ;;  %4824 = vmatmul.msk.f32.gmra.mxu0 %vm307_vm0, %v7914_v57  ;;  %v8040_v35 = vld [vmem:[%s9910_s3 + $0x78] sm:$0xff] }
 0x336   :  { %4840 = vmatmul.msk.f32.gmra.mxu1 %vm307_vm0, %v7914_v57 }
 0x337   :  { %v7928_v41 = vpop.f32.mrf.mxu0 }
 0x338   :  { %10482 = vst [vmem:[#allocation109_spill] sm:$0xff] %v7928_v41  ;;  %v7930_v9 = vpop.f32.mrf.mxu1 }
 0x339   :  { %10483 = vst [vmem:[#allocation112_spill] sm:$0xff] %v7930_v9 }
 0x33b   :  { %4856 = vmatmul.msk.f32.gmra.mxu2 %vm307_vm0, %v7914_v57  ;;  %v7939_v42 = vpop.f32.mrf.mxu2 }
 0x33c   :  { %10484 = vst [vmem:[#allocation113_spill] sm:$0xff] %v7939_v42  ;;  %4872 = vmatmul.msk.f32.gmra.mxu3 %vm307_vm0, %v7914_v57  ;;  %v7943_v10 = vpop.f32.mrf.mxu3 }
 0x33d   :  { %10485 = vst [vmem:[#allocation114_spill] sm:$0xff] %v7943_v10  ;;  %4825 = vmatmul.msk.f32.gmra.mxu0 %vm307_vm0, %v7935_v13 }
 0x33e   :  { %4841 = vmatmul.msk.f32.gmra.mxu1 %vm307_vm0, %v7935_v13 }
 0x33f   :  { %v7949_v9 = vpop.f32.mrf.mxu0 }
 0x340   :  { %10486 = vst [vmem:[#allocation115_spill] sm:$0xff] %v7949_v9  ;;  %v7951_v41 = vpop.f32.mrf.mxu1 }
 0x341   :  { %10487 = vst [vmem:[#allocation116_spill] sm:$0xff] %v7951_v41 }
 0x343   :  { %4857 = vmatmul.msk.f32.gmra.mxu2 %vm307_vm0, %v7935_v13  ;;  %v7960_v42 = vpop.f32.mrf.mxu2 }
 0x344   :  { %10488 = vst [vmem:[#allocation117_spill] sm:$0xff] %v7960_v42  ;;  %4873 = vmatmul.msk.f32.gmra.mxu3 %vm307_vm0, %v7935_v13  ;;  %v7964_v10 = vpop.f32.mrf.mxu3 }
 0x345   :  { %10489 = vst [vmem:[#allocation118_spill] sm:$0xff] %v7964_v10  ;;  %4826 = vmatmul.msk.f32.gmra.mxu0 %vm307_vm0, %v7956_v25 }
 0x346   :  { %4842 = vmatmul.msk.f32.gmra.mxu1 %vm307_vm0, %v7956_v25 }
 0x347   :  { %v7970_v41 = vpop.f32.mrf.mxu0 }
 0x348   :  { %10490 = vst [vmem:[#allocation119_spill] sm:$0xff] %v7970_v41  ;;  %v7972_v9 = vpop.f32.mrf.mxu1 }
 0x349   :  { %10491 = vst [vmem:[#allocation120_spill] sm:$0xff] %v7972_v9 }
 0x34b   :  { %4858 = vmatmul.msk.f32.gmra.mxu2 %vm307_vm0, %v7956_v25  ;;  %v7981_v42 = vpop.f32.mrf.mxu2 }
 0x34c   :  { %10492 = vst [vmem:[#allocation121_spill] sm:$0xff] %v7981_v42  ;;  %4874 = vmatmul.msk.f32.gmra.mxu3 %vm307_vm0, %v7956_v25  ;;  %v7985_v10 = vpop.f32.mrf.mxu3 }
 0x34d   :  { %10493 = vst [vmem:[#allocation122_spill] sm:$0xff] %v7985_v10  ;;  %4827 = vmatmul.msk.f32.gmra.mxu0 %vm307_vm0, %v7977_v22 }
 0x34e   :  { %4843 = vmatmul.msk.f32.gmra.mxu1 %vm307_vm0, %v7977_v22 }
 0x34f   :  { %v7991_v9 = vpop.f32.mrf.mxu0 }
 0x350   :  { %10494 = vst [vmem:[#allocation123_spill] sm:$0xff] %v7991_v9  ;;  %v7993_v41 = vpop.f32.mrf.mxu1 }
 0x351   :  { %10495 = vst [vmem:[#allocation124_spill] sm:$0xff] %v7993_v41 }
 0x353   :  { %4859 = vmatmul.msk.f32.gmra.mxu2 %vm307_vm0, %v7977_v22  ;;  %v8002_v42 = vpop.f32.mrf.mxu2 }
 0x354   :  { %10496 = vst [vmem:[#allocation125_spill] sm:$0xff] %v8002_v42  ;;  %4875 = vmatmul.msk.f32.gmra.mxu3 %vm307_vm0, %v7977_v22  ;;  %v8006_v10 = vpop.f32.mrf.mxu3 }
 0x355   :  { %10497 = vst [vmem:[#allocation126_spill] sm:$0xff] %v8006_v10  ;;  %4828 = vmatmul.msk.f32.gmra.mxu0 %vm307_vm0, %v7998_v29 }
 0x356   :  { %4844 = vmatmul.msk.f32.gmra.mxu1 %vm307_vm0, %v7998_v29 }
 0x357   :  { %v8012_v41 = vpop.f32.mrf.mxu0 }
 0x358   :  { %10498 = vst [vmem:[#allocation127_spill] sm:$0xff] %v8012_v41  ;;  %v8014_v9 = vpop.f32.mrf.mxu1 }
 0x359   :  { %10499 = vst [vmem:[#allocation128_spill] sm:$0xff] %v8014_v9 }
 0x35b   :  { %4860 = vmatmul.msk.f32.gmra.mxu2 %vm307_vm0, %v7998_v29  ;;  %v8023_v42 = vpop.f32.mrf.mxu2 }
 0x35c   :  { %10500 = vst [vmem:[#allocation129_spill] sm:$0xff] %v8023_v42  ;;  %4876 = vmatmul.msk.f32.gmra.mxu3 %vm307_vm0, %v7998_v29  ;;  %v8027_v10 = vpop.f32.mrf.mxu3 }
 0x35d   :  { %10501 = vst [vmem:[#allocation130_spill] sm:$0xff] %v8027_v10  ;;  %4829 = vmatmul.msk.f32.gmra.mxu0 %vm307_vm0, %v8019_v2 }
 0x35e   :  { %4845 = vmatmul.msk.f32.gmra.mxu1 %vm307_vm0, %v8019_v2 }
 0x35f   :  { %v8033_v9 = vpop.f32.mrf.mxu0 }
 0x360   :  { %10502 = vst [vmem:[#allocation131_spill] sm:$0xff] %v8033_v9  ;;  %v8035_v41 = vpop.f32.mrf.mxu1 }
 0x361   :  { %10503 = vst [vmem:[#allocation132_spill] sm:$0xff] %v8035_v41 }
 0x363   :  { %4861 = vmatmul.msk.f32.gmra.mxu2 %vm307_vm0, %v8019_v2  ;;  %v8044_v42 = vpop.f32.mrf.mxu2 }
 0x364   :  { %10504 = vst [vmem:[#allocation133_spill] sm:$0xff] %v8044_v42  ;;  %4877 = vmatmul.msk.f32.gmra.mxu3 %vm307_vm0, %v8019_v2  ;;  %v8048_v10 = vpop.f32.mrf.mxu3 }
 0x365   :  { %10505 = vst [vmem:[#allocation134_spill] sm:$0xff] %v8048_v10  ;;  %4830 = vmatmul.msk.f32.gmra.mxu0 %vm307_vm0, %v8040_v35 }
 0x366   :  { %4846 = vmatmul.msk.f32.gmra.mxu1 %vm307_vm0, %v8040_v35 }
 0x367   :  { %v8054_v41 = vpop.f32.mrf.mxu0 }
 0x368   :  { %v8056_v9 = vpop.f32.mrf.mxu1 }
 0x36b   :  { %4862 = vmatmul.msk.f32.gmra.mxu2 %vm307_vm0, %v8040_v35  ;;  %v8060_v43 = vpop.f32.mrf.mxu2 }
 0x36c   :  { %10506 = vst [vmem:[#allocation135_spill] sm:$0xff] %v8060_v43  ;;  %4878 = vmatmul.msk.f32.gmra.mxu3 %vm307_vm0, %v8040_v35  ;;  %v8064_v42 = vpop.f32.mrf.mxu3 }
 0x36d   :  { %10507 = vst [vmem:[#allocation136_spill] sm:$0xff] %v8064_v42  ;;  %4879 = vmatmul.msk.f32.vlgmr.msrb.gmra.mxu0 %vm307_vm0, %v7689_v21 }
 0x36e   :  { %4895 = vmatmul.msk.f32.vlgmr.msrb.gmra.mxu1 %vm307_vm0, %v7689_v21  ;;  %3468 = vmatpush.msrb.mxu0 %v7058_v8  ;;  %v10509_v8 = vld [vmem:[#allocation22_spill] sm:$0xff] }
 0x36f   :  { %3533 = vmatpush.msrb.mxu1 %v7110_v59  ;;  %v10510_v59 = vld [vmem:[#allocation54_spill] sm:$0xff] }
 0x370   :  { %3469 = vmatpush.msrb.mxu0 %v7079_v46  ;;  %v8073_v10 = vpop.f32.mrf.mxu0 }
 0x371   :  { %3534 = vmatpush.msrb.mxu1 %v7146_v53  ;;  %v8076_v43 = vpop.f32.mrf.mxu1  ;;  %v10511_v53 = vmax.f32 %v10510_v59, 0.0 }
 0x372   :  { %3470 = vmatpush.msrb.mxu0 %v7097_v60  ;;  %v10512_v60 = vld [vmem:[#allocation7_spill] sm:$0xff] }
 0x373   :  { %3535 = vmatpush.msrb.mxu1 %v7181_v58  ;;  %4911 = vmatmul.msk.f32.vlgmr.msrb.gmra.mxu2 %vm307_vm0, %v7689_v21  ;;  %v8082_v42 = vpop.f32.mrf.mxu2  ;;  %v10513_v58 = vld [vmem:[#allocation55_spill] sm:$0xff] }
 0x374   :  { %10508 = vst [vmem:[#allocation137_spill] sm:$0xff] %v8082_v42  ;;  %4927 = vmatmul.msk.f32.vlgmr.msrb.gmra.mxu3 %vm307_vm0, %v7689_v21  ;;  %3471 = vmatpush.msrb.mxu0 %v10509_v8  ;;  %v8087_v46 = vpop.f32.mrf.mxu3  ;;  %v10514_v21 = vmax.f32 %v10513_v58, 0.0 }
 0x375   :  { %3536 = vmatpush.msrb.mxu1 %v7200_v0  ;;  %3598 = vmatpush.msrb.mxu2 %v10511_v53  ;;  %v10515_v0 = vld [vmem:[#allocation5_spill] sm:$0xff]  ;;  %v10517_v53 = vld [vmem:[#allocation56_spill] sm:$0xff] }
 0x376   :  { %4880 = vmatmul.msk.f32.gmra.mxu0 %vm307_vm0, %v7718_v17  ;;  %4896 = vmatmul.msk.f32.gmra.mxu1 %vm307_vm0, %v7718_v17  ;;  %v10516_v8 = vmax.f32 %v10515_v0, 0.0 }
 0x377   :  { %3472 = vmatpush.msrb.mxu0 %v7138_v38  ;;  %3537 = vmatpush.msrb.mxu1 %v10512_v60  ;;  %v10518_v60 = vmax.f32 %v10517_v53, 0.0 }
 0x378   :  { %3599 = vmatpush.msrb.mxu2 %v10514_v21  ;;  %3671 = vmatpush.msrb.mxu3 %v10340_v55  ;;  %v10522_v21 = vld [vmem:[#allocation57_spill] sm:$0xff] }
 0x379   :  { %3473 = vmatpush.msrb.mxu0 %v7171_v20  ;;  %3538 = vmatpush.msrb.mxu1 %v7229_v44  ;;  %v10519_v44 = vld [vmem:[#allocation59_spill] sm:$0xff]  ;;  %v10523_v0 = vmax.f32 %v10522_v21, 0.0 }
 0x37a   :  { %3600 = vmatpush.msrb.mxu2 %v10516_v8  ;;  %v8105_v59 = vpop.f32.mrf.mxu0 }
 0x37b   :  { %3474 = vmatpush.msrb.mxu0 %v7192_v37  ;;  %3539 = vmatpush.msrb.mxu1 %v7246_v23  ;;  %v8109_v38 = vpop.f32.mrf.mxu1  ;;  %v10520_v37 = vld [vmem:[#allocation6_spill] sm:$0xff] }
 0x37c   :  { %3601 = vmatpush.msrb.mxu2 %v10518_v60  ;;  %4928 = vmatmul.msk.f32.gmra.mxu3 %vm307_vm0, %v7718_v17  ;;  %v10521_v58 = vmax.f32 %v10520_v37, 0.0  ;;  %v10526_v60 = vld [vmem:[#allocation23_spill] sm:$0xff] }
 0x37d   :  { %4912 = vmatmul.msk.f32.gmra.mxu2 %vm307_vm0, %v7718_v17  ;;  %3475 = vmatpush.msrb.mxu0 %v7211_v47  ;;  %v8118_v20 = vpop.f32.mrf.mxu2  ;;  %v10524_v47 = vld [vmem:[#allocation58_spill] sm:$0xff] }
 0x37e   :  { %3540 = vmatpush.msrb.mxu1 %v10519_v44  ;;  %3602 = vmatpush.msrb.mxu2 %v10521_v58  ;;  %v8123_v23 = vpop.f32.mrf.mxu3  ;;  %v10525_v17 = vmax.f32 %v10524_v47, 0.0  ;;  %v10527_v44 = vmax.f32 %v10526_v60, 0.0 }
 0x37f   :  { %4881 = vmatmul.msk.f32.gmra.mxu0 %vm307_vm0, %v7755_v18  ;;  %4897 = vmatmul.msk.f32.gmra.mxu1 %vm307_vm0, %v7755_v18 }
 0x380   :  { %3603 = vmatpush.msrb.mxu2 %v10523_v0  ;;  %3476 = vmatpush.msrb.mxu0 %v10340_v55 }
 0x381   :  { %3541 = vmatpush.msrb.mxu1 %v10340_v55 }
 0x382   :  { %3604 = vmatpush.msrb.mxu2 %v10525_v17  ;;  %v8135_v8 = vpop.f32.mrf.mxu0 }
 0x383   :  { %v8137_v53 = vpop.f32.mrf.mxu1 }
 0x384   :  { %3605 = vmatpush.msrb.mxu2 %v10527_v44  ;;  %4929 = vmatmul.msk.f32.gmra.mxu3 %vm307_vm0, %v7755_v18 }
 0x385   :  { %4913 = vmatmul.msk.f32.gmra.mxu2 %vm307_vm0, %v7755_v18 }
 0x386   :  { %v8145_v37 = vpop.f32.mrf.mxu2  ;;  %3606 = vmatpush.msrb.mxu2 %v10340_v55 }
 0x387   :  { %4882 = vmatmul.msk.f32.gmra.mxu0 %vm307_vm0, %v7785_v49  ;;  %4898 = vmatmul.msk.f32.gmra.mxu1 %vm307_vm0, %v7785_v49  ;;  %v8152_v58 = vpop.f32.mrf.mxu3 }
 0x38a   :  { %v8154_v21 = vpop.f32.mrf.mxu0 }
 0x38b   :  { %v8156_v0 = vpop.f32.mrf.mxu1 }
 0x38c   :  { %4930 = vmatmul.msk.f32.gmra.mxu3 %vm307_vm0, %v7785_v49 }
 0x38d   :  { %4914 = vmatmul.msk.f32.gmra.mxu2 %vm307_vm0, %v7785_v49 }
 0x38e   :  { %v8162_v18 = vpop.f32.mrf.mxu2 }
 0x38f   :  { %4883 = vmatmul.msk.f32.gmra.mxu0 %vm307_vm0, %v7809_v5  ;;  %4899 = vmatmul.msk.f32.gmra.mxu1 %vm307_vm0, %v7809_v5  ;;  %v8168_v55 = vpop.f32.mrf.mxu3 }
 0x392   :  { %v8170_v47 = vpop.f32.mrf.mxu0 }
 0x393   :  { %v8172_v17 = vpop.f32.mrf.mxu1 }
 0x394   :  { %4931 = vmatmul.msk.f32.gmra.mxu3 %vm307_vm0, %v7809_v5 }
 0x395   :  { %4915 = vmatmul.msk.f32.gmra.mxu2 %vm307_vm0, %v7809_v5 }
 0x396   :  { %v8178_v49 = vpop.f32.mrf.mxu2 }
 0x397   :  { %4884 = vmatmul.msk.f32.gmra.mxu0 %vm307_vm0, %v7830_v61  ;;  %4900 = vmatmul.msk.f32.gmra.mxu1 %vm307_vm0, %v7830_v61  ;;  %v8184_v60 = vpop.f32.mrf.mxu3 }
 0x39a   :  { %v8186_v44 = vpop.f32.mrf.mxu0 }
 0x39b   :  { %v8188_v56 = vpop.f32.mrf.mxu1 }
 0x39c   :  { %4932 = vmatmul.msk.f32.gmra.mxu3 %vm307_vm0, %v7830_v61 }
 0x39d   :  { %4916 = vmatmul.msk.f32.gmra.mxu2 %vm307_vm0, %v7830_v61 }
 0x39e   :  { %v8194_v5 = vpop.f32.mrf.mxu2 }
 0x39f   :  { %4885 = vmatmul.msk.f32.gmra.mxu0 %vm307_vm0, %v7851_v14  ;;  %4901 = vmatmul.msk.f32.gmra.mxu1 %vm307_vm0, %v7851_v14  ;;  %v8200_v24 = vpop.f32.mrf.mxu3 }
 0x3a2   :  { %v8202_v62 = vpop.f32.mrf.mxu0 }
 0x3a3   :  { %v8204_v28 = vpop.f32.mrf.mxu1 }
 0x3a4   :  { %4933 = vmatmul.msk.f32.gmra.mxu3 %vm307_vm0, %v7851_v14 }
 0x3a5   :  { %4917 = vmatmul.msk.f32.gmra.mxu2 %vm307_vm0, %v7851_v14 }
 0x3a6   :  { %v8210_v61 = vpop.f32.mrf.mxu2 }
 0x3a7   :  { %4886 = vmatmul.msk.f32.gmra.mxu0 %vm307_vm0, %v7872_v54  ;;  %4902 = vmatmul.msk.f32.gmra.mxu1 %vm307_vm0, %v7872_v54  ;;  %v8216_v19 = vpop.f32.mrf.mxu3 }
 0x3aa   :  { %v8218_v26 = vpop.f32.mrf.mxu0 }
 0x3ab   :  { %v8220_v7 = vpop.f32.mrf.mxu1 }
 0x3ac   :  { %4934 = vmatmul.msk.f32.gmra.mxu3 %vm307_vm0, %v7872_v54 }
 0x3ad   :  { %4918 = vmatmul.msk.f32.gmra.mxu2 %vm307_vm0, %v7872_v54 }
 0x3ae   :  { %v8226_v14 = vpop.f32.mrf.mxu2 }
 0x3af   :  { %4887 = vmatmul.msk.f32.gmra.mxu0 %vm307_vm0, %v7893_v48  ;;  %4903 = vmatmul.msk.f32.gmra.mxu1 %vm307_vm0, %v7893_v48  ;;  %v8232_v15 = vpop.f32.mrf.mxu3 }
 0x3b2   :  { %v8234_v6 = vpop.f32.mrf.mxu0 }
 0x3b3   :  { %v8236_v42 = vpop.f32.mrf.mxu1 }
 0x3b4   :  { %4935 = vmatmul.msk.f32.gmra.mxu3 %vm307_vm0, %v7893_v48 }
 0x3b5   :  { %4919 = vmatmul.msk.f32.gmra.mxu2 %vm307_vm0, %v7893_v48 }
 0x3b6   :  { %v8242_v54 = vpop.f32.mrf.mxu2 }
 0x3b7   :  { %4888 = vmatmul.msk.f32.gmra.mxu0 %vm307_vm0, %v7914_v57  ;;  %4904 = vmatmul.msk.f32.gmra.mxu1 %vm307_vm0, %v7914_v57  ;;  %v8248_v16 = vpop.f32.mrf.mxu3 }
 0x3ba   :  { %v8250_v34 = vpop.f32.mrf.mxu0 }
 0x3bb   :  { %10528 = vst [vmem:[#allocation22_spill] sm:$0xff] %v8250_v34  ;;  %v8252_v51 = vpop.f32.mrf.mxu1 }
 0x3bc   :  { %10529 = vst [vmem:[#allocation54_spill] sm:$0xff] %v8252_v51  ;;  %4936 = vmatmul.msk.f32.gmra.mxu3 %vm307_vm0, %v7914_v57 }
 0x3bd   :  { %4920 = vmatmul.msk.f32.gmra.mxu2 %vm307_vm0, %v7914_v57 }
 0x3be   :  { %v8258_v48 = vpop.f32.mrf.mxu2 }
 0x3bf   :  { %10530 = vst [vmem:[#allocation7_spill] sm:$0xff] %v8258_v48  ;;  %4889 = vmatmul.msk.f32.gmra.mxu0 %vm307_vm0, %v7935_v13  ;;  %4905 = vmatmul.msk.f32.gmra.mxu1 %vm307_vm0, %v7935_v13  ;;  %v8264_v27 = vpop.f32.mrf.mxu3  ;;  %v8628_v48 = vld [vmem:[%s9910_s3 + $0x168] sm:$0xff] }
 0x3c0   :  { %10531 = vst [vmem:[#allocation55_spill] sm:$0xff] %v8264_v27  ;;  %v8607_v27 = vld [vmem:[%s9910_s3 + $0x160] sm:$0xff] }
 0x3c1   :  { %10606 = vst [vmem:[#allocation205_spill] sm:$0xff] %v8628_v48 }
 0x3c2   :  { %v8266_v12 = vpop.f32.mrf.mxu0 }
 0x3c3   :  { %10532 = vst [vmem:[#allocation5_spill] sm:$0xff] %v8266_v12  ;;  %v8268_v63 = vpop.f32.mrf.mxu1  ;;  %v8586_v12 = vld [vmem:[%s9910_s3 + $0x158] sm:$0xff] }
 0x3c4   :  { %10533 = vst [vmem:[#allocation56_spill] sm:$0xff] %v8268_v63  ;;  %4937 = vmatmul.msk.f32.gmra.mxu3 %vm307_vm0, %v7935_v13  ;;  %v8565_v63 = vld [vmem:[%s9910_s3 + $0x150] sm:$0xff] }
 0x3c5   :  { %4921 = vmatmul.msk.f32.gmra.mxu2 %vm307_vm0, %v7935_v13 }
 0x3c6   :  { %v8274_v57 = vpop.f32.mrf.mxu2 }
 0x3c7   :  { %10534 = vst [vmem:[#allocation59_spill] sm:$0xff] %v8274_v57  ;;  %4890 = vmatmul.msk.f32.gmra.mxu0 %vm307_vm0, %v7956_v25  ;;  %4906 = vmatmul.msk.f32.gmra.mxu1 %vm307_vm0, %v7956_v25  ;;  %v8280_v50 = vpop.f32.mrf.mxu3  ;;  %v8523_v57 = vld [vmem:[%s9910_s3 + $0x140] sm:$0xff] }
 0x3c8   :  { %10535 = vst [vmem:[#allocation6_spill] sm:$0xff] %v8280_v50  ;;  %v8502_v50 = vld [vmem:[%s9910_s3 + $0x138] sm:$0xff] }
 0x3ca   :  { %v8282_v31 = vpop.f32.mrf.mxu0 }
 0x3cb   :  { %10536 = vst [vmem:[#allocation57_spill] sm:$0xff] %v8282_v31  ;;  %v8284_v3 = vpop.f32.mrf.mxu1  ;;  %v8481_v31 = vld [vmem:[%s9910_s3 + $0x130] sm:$0xff] }
 0x3cc   :  { %10537 = vst [vmem:[#allocation58_spill] sm:$0xff] %v8284_v3  ;;  %4938 = vmatmul.msk.f32.gmra.mxu3 %vm307_vm0, %v7956_v25  ;;  %v8460_v3 = vld [vmem:[%s9910_s3 + $0x128] sm:$0xff] }
 0x3cd   :  { %4922 = vmatmul.msk.f32.gmra.mxu2 %vm307_vm0, %v7956_v25 }
 0x3ce   :  { %v8290_v13 = vpop.f32.mrf.mxu2 }
 0x3cf   :  { %10538 = vst [vmem:[#allocation23_spill] sm:$0xff] %v8290_v13  ;;  %4891 = vmatmul.msk.f32.gmra.mxu0 %vm307_vm0, %v7977_v22  ;;  %4907 = vmatmul.msk.f32.gmra.mxu1 %vm307_vm0, %v7977_v22  ;;  %v8296_v36 = vpop.f32.mrf.mxu3 }
 0x3d0   :  { %10539 = vst [vmem:[#allocation138_spill] sm:$0xff] %v8296_v36 }
 0x3d2   :  { %v8298_v4 = vpop.f32.mrf.mxu0 }
 0x3d3   :  { %10540 = vst [vmem:[#allocation139_spill] sm:$0xff] %v8298_v4  ;;  %v8300_v40 = vpop.f32.mrf.mxu1 }
 0x3d4   :  { %10541 = vst [vmem:[#allocation140_spill] sm:$0xff] %v8300_v40  ;;  %4939 = vmatmul.msk.f32.gmra.mxu3 %vm307_vm0, %v7977_v22  ;;  %v8439_v40 = vld [vmem:[%s9910_s3 + $0x120] sm:$0xff] }
 0x3d5   :  { %4923 = vmatmul.msk.f32.gmra.mxu2 %vm307_vm0, %v7977_v22 }
 0x3d6   :  { %v8306_v25 = vpop.f32.mrf.mxu2 }
 0x3d7   :  { %10542 = vst [vmem:[#allocation141_spill] sm:$0xff] %v8306_v25  ;;  %4892 = vmatmul.msk.f32.gmra.mxu0 %vm307_vm0, %v7998_v29  ;;  %4908 = vmatmul.msk.f32.gmra.mxu1 %vm307_vm0, %v7998_v29  ;;  %v8312_v13 = vpop.f32.mrf.mxu3 }
 0x3d8   :  { %10543 = vst [vmem:[#allocation142_spill] sm:$0xff] %v8312_v13 }
 0x3da   :  { %v8314_v36 = vpop.f32.mrf.mxu0 }
 0x3db   :  { %10544 = vst [vmem:[#allocation143_spill] sm:$0xff] %v8314_v36  ;;  %v8316_v4 = vpop.f32.mrf.mxu1 }
 0x3dc   :  { %10545 = vst [vmem:[#allocation144_spill] sm:$0xff] %v8316_v4  ;;  %4940 = vmatmul.msk.f32.gmra.mxu3 %vm307_vm0, %v7998_v29  ;;  %v8418_v4 = vld [vmem:[%s9910_s3 + $0x118] sm:$0xff] }
 0x3dd   :  { %4924 = vmatmul.msk.f32.gmra.mxu2 %vm307_vm0, %v7998_v29 }
 0x3de   :  { %v8322_v22 = vpop.f32.mrf.mxu2 }
 0x3df   :  { %10546 = vst [vmem:[#allocation145_spill] sm:$0xff] %v8322_v22  ;;  %4893 = vmatmul.msk.f32.gmra.mxu0 %vm307_vm0, %v8019_v2  ;;  %4909 = vmatmul.msk.f32.gmra.mxu1 %vm307_vm0, %v8019_v2  ;;  %v8328_v25 = vpop.f32.mrf.mxu3 }
 0x3e0   :  { %10547 = vst [vmem:[#allocation146_spill] sm:$0xff] %v8328_v25 }
 0x3e2   :  { %v8330_v13 = vpop.f32.mrf.mxu0 }
 0x3e3   :  { %10548 = vst [vmem:[#allocation147_spill] sm:$0xff] %v8330_v13  ;;  %v8332_v36 = vpop.f32.mrf.mxu1 }
 0x3e4   :  { %10549 = vst [vmem:[#allocation148_spill] sm:$0xff] %v8332_v36  ;;  %4941 = vmatmul.msk.f32.gmra.mxu3 %vm307_vm0, %v8019_v2  ;;  %v8397_v36 = vld [vmem:[%s9910_s3 + $0x110] sm:$0xff] }
 0x3e5   :  { %4925 = vmatmul.msk.f32.gmra.mxu2 %vm307_vm0, %v8019_v2  ;;  %v8355_v2 = vld [vmem:[%s9910_s3 + $0x100] sm:$0xff] }
 0x3e6   :  { %v8338_v29 = vpop.f32.mrf.mxu2 }
 0x3e7   :  { %10550 = vst [vmem:[#allocation149_spill] sm:$0xff] %v8338_v29  ;;  %4894 = vmatmul.msk.f32.gmra.mxu0 %vm307_vm0, %v8040_v35  ;;  %4910 = vmatmul.msk.f32.gmra.mxu1 %vm307_vm0, %v8040_v35  ;;  %v8344_v22 = vpop.f32.mrf.mxu3 }
 0x3e8   :  { %10551 = vst [vmem:[#allocation150_spill] sm:$0xff] %v8344_v22 }
 0x3ea   :  { %v8346_v25 = vpop.f32.mrf.mxu0 }
 0x3eb   :  { %10552 = vst [vmem:[#allocation151_spill] sm:$0xff] %v8346_v25  ;;  %v8348_v13 = vpop.f32.mrf.mxu1 }
 0x3ec   :  { %10553 = vst [vmem:[#allocation152_spill] sm:$0xff] %v8348_v13  ;;  %4942 = vmatmul.msk.f32.gmra.mxu3 %vm307_vm0, %v8040_v35 }
 0x3ed   :  { %4926 = vmatmul.msk.f32.gmra.mxu2 %vm307_vm0, %v8040_v35  ;;  %v8376_v35 = vld [vmem:[%s9910_s3 + $0x108] sm:$0xff] }
 0x3ee   :  { %v8359_v29 = vpop.f32.mrf.mxu2 }
 0x3ef   :  { %10554 = vst [vmem:[#allocation153_spill] sm:$0xff] %v8359_v29  ;;  %4959 = vmatmul.msk.f32.vlgmr.msra.gmra.mxu0 %vm307_vm0, %v8355_v2  ;;  %4975 = vmatmul.msk.f32.vlgmr.msra.gmra.mxu1 %vm307_vm0, %v8355_v2  ;;  %v8365_v13 = vpop.f32.mrf.mxu3 }
 0x3f0   :  { %10555 = vst [vmem:[#allocation154_spill] sm:$0xff] %v8365_v13 }
 0x3f3   :  { %v8367_v25 = vpop.f32.mrf.mxu0  ;;  %v8369_v22 = vpop.f32.mrf.mxu1 }
 0x3f4   :  { %10556 = vst [vmem:[#allocation155_spill] sm:$0xff] %v8367_v25  ;;  %5007 = vmatmul.msk.f32.vlgmr.msra.gmra.mxu3 %vm307_vm0, %v8355_v2 }
 0x3f5   :  { %10557 = vst [vmem:[#allocation156_spill] sm:$0xff] %v8369_v22  ;;  %4991 = vmatmul.msk.f32.vlgmr.msra.gmra.mxu2 %vm307_vm0, %v8355_v2 }
 0x3f6   :  { %v8380_v29 = vpop.f32.mrf.mxu2 }
 0x3f7   :  { %10558 = vst [vmem:[#allocation157_spill] sm:$0xff] %v8380_v29  ;;  %4960 = vmatmul.msk.f32.gmra.mxu0 %vm307_vm0, %v8376_v35  ;;  %4976 = vmatmul.msk.f32.gmra.mxu1 %vm307_vm0, %v8376_v35  ;;  %v8386_v22 = vpop.f32.mrf.mxu3 }
 0x3f8   :  { %10559 = vst [vmem:[#allocation158_spill] sm:$0xff] %v8386_v22 }
 0x3fc   :  { %v8388_v25 = vpop.f32.mrf.mxu0  ;;  %v8390_v13 = vpop.f32.mrf.mxu1  ;;  %5008 = vmatmul.msk.f32.gmra.mxu3 %vm307_vm0, %v8376_v35 }
 0x3fd   :  { %10560 = vst [vmem:[#allocation159_spill] sm:$0xff] %v8388_v25  ;;  %4992 = vmatmul.msk.f32.gmra.mxu2 %vm307_vm0, %v8376_v35 }
 0x3fe   :  { %10561 = vst [vmem:[#allocation160_spill] sm:$0xff] %v8390_v13 }
 0x3ff   :  { %4961 = vmatmul.msk.f32.gmra.mxu0 %vm307_vm0, %v8397_v36  ;;  %4977 = vmatmul.msk.f32.gmra.mxu1 %vm307_vm0, %v8397_v36  ;;  %v8405_v25 = vpop.f32.mrf.mxu3 }
 0x400   :  { %10562 = vst [vmem:[#allocation161_spill] sm:$0xff] %v8405_v25  ;;  %v8407_v13 = vpop.f32.mrf.mxu2 }
 0x401   :  { %10563 = vst [vmem:[#allocation162_spill] sm:$0xff] %v8407_v13 }
 0x404   :  { %v8409_v22 = vpop.f32.mrf.mxu0  ;;  %v8411_v29 = vpop.f32.mrf.mxu1  ;;  %5009 = vmatmul.msk.f32.gmra.mxu3 %vm307_vm0, %v8397_v36 }
 0x405   :  { %10564 = vst [vmem:[#allocation163_spill] sm:$0xff] %v8409_v22  ;;  %4993 = vmatmul.msk.f32.gmra.mxu2 %vm307_vm0, %v8397_v36 }
 0x406   :  { %10565 = vst [vmem:[#allocation164_spill] sm:$0xff] %v8411_v29 }
 0x407   :  { %4962 = vmatmul.msk.f32.gmra.mxu0 %vm307_vm0, %v8418_v4  ;;  %4978 = vmatmul.msk.f32.gmra.mxu1 %vm307_vm0, %v8418_v4  ;;  %v8426_v22 = vpop.f32.mrf.mxu3 }
 0x408   :  { %10566 = vst [vmem:[#allocation165_spill] sm:$0xff] %v8426_v22  ;;  %v8428_v29 = vpop.f32.mrf.mxu2 }
 0x409   :  { %10567 = vst [vmem:[#allocation166_spill] sm:$0xff] %v8428_v29 }
 0x40c   :  { %v8430_v13 = vpop.f32.mrf.mxu0  ;;  %v8432_v25 = vpop.f32.mrf.mxu1  ;;  %5010 = vmatmul.msk.f32.gmra.mxu3 %vm307_vm0, %v8418_v4 }
 0x40d   :  { %10568 = vst [vmem:[#allocation167_spill] sm:$0xff] %v8430_v13  ;;  %4994 = vmatmul.msk.f32.gmra.mxu2 %vm307_vm0, %v8418_v4 }
 0x40e   :  { %10569 = vst [vmem:[#allocation168_spill] sm:$0xff] %v8432_v25 }
 0x40f   :  { %4963 = vmatmul.msk.f32.gmra.mxu0 %vm307_vm0, %v8439_v40  ;;  %4979 = vmatmul.msk.f32.gmra.mxu1 %vm307_vm0, %v8439_v40  ;;  %v8447_v13 = vpop.f32.mrf.mxu3 }
 0x410   :  { %10570 = vst [vmem:[#allocation169_spill] sm:$0xff] %v8447_v13  ;;  %v8449_v25 = vpop.f32.mrf.mxu2 }
 0x411   :  { %10571 = vst [vmem:[#allocation170_spill] sm:$0xff] %v8449_v25 }
 0x414   :  { %v8451_v22 = vpop.f32.mrf.mxu0  ;;  %v8453_v29 = vpop.f32.mrf.mxu1  ;;  %5011 = vmatmul.msk.f32.gmra.mxu3 %vm307_vm0, %v8439_v40 }
 0x415   :  { %10572 = vst [vmem:[#allocation171_spill] sm:$0xff] %v8451_v22  ;;  %4995 = vmatmul.msk.f32.gmra.mxu2 %vm307_vm0, %v8439_v40 }
 0x416   :  { %10573 = vst [vmem:[#allocation172_spill] sm:$0xff] %v8453_v29 }
 0x417   :  { %4964 = vmatmul.msk.f32.gmra.mxu0 %vm307_vm0, %v8460_v3  ;;  %4980 = vmatmul.msk.f32.gmra.mxu1 %vm307_vm0, %v8460_v3  ;;  %v8468_v22 = vpop.f32.mrf.mxu3 }
 0x418   :  { %10574 = vst [vmem:[#allocation173_spill] sm:$0xff] %v8468_v22  ;;  %v8470_v29 = vpop.f32.mrf.mxu2 }
 0x419   :  { %10575 = vst [vmem:[#allocation174_spill] sm:$0xff] %v8470_v29 }
 0x41c   :  { %v8472_v13 = vpop.f32.mrf.mxu0  ;;  %v8474_v25 = vpop.f32.mrf.mxu1  ;;  %5012 = vmatmul.msk.f32.gmra.mxu3 %vm307_vm0, %v8460_v3 }
 0x41d   :  { %10576 = vst [vmem:[#allocation175_spill] sm:$0xff] %v8472_v13  ;;  %4996 = vmatmul.msk.f32.gmra.mxu2 %vm307_vm0, %v8460_v3 }
 0x41e   :  { %10577 = vst [vmem:[#allocation176_spill] sm:$0xff] %v8474_v25 }
 0x41f   :  { %4965 = vmatmul.msk.f32.gmra.mxu0 %vm307_vm0, %v8481_v31  ;;  %4981 = vmatmul.msk.f32.gmra.mxu1 %vm307_vm0, %v8481_v31  ;;  %v8489_v13 = vpop.f32.mrf.mxu3 }
 0x420   :  { %10578 = vst [vmem:[#allocation177_spill] sm:$0xff] %v8489_v13  ;;  %v8491_v25 = vpop.f32.mrf.mxu2 }
 0x421   :  { %10579 = vst [vmem:[#allocation178_spill] sm:$0xff] %v8491_v25 }
 0x424   :  { %v8493_v29 = vpop.f32.mrf.mxu0  ;;  %v8495_v22 = vpop.f32.mrf.mxu1  ;;  %5013 = vmatmul.msk.f32.gmra.mxu3 %vm307_vm0, %v8481_v31 }
 0x425   :  { %10580 = vst [vmem:[#allocation179_spill] sm:$0xff] %v8493_v29  ;;  %4997 = vmatmul.msk.f32.gmra.mxu2 %vm307_vm0, %v8481_v31 }
 0x426   :  { %10581 = vst [vmem:[#allocation180_spill] sm:$0xff] %v8495_v22 }
 0x427   :  { %4966 = vmatmul.msk.f32.gmra.mxu0 %vm307_vm0, %v8502_v50  ;;  %4982 = vmatmul.msk.f32.gmra.mxu1 %vm307_vm0, %v8502_v50  ;;  %v8510_v29 = vpop.f32.mrf.mxu3 }
 0x428   :  { %10582 = vst [vmem:[#allocation181_spill] sm:$0xff] %v8510_v29  ;;  %v8512_v22 = vpop.f32.mrf.mxu2 }
 0x429   :  { %10583 = vst [vmem:[#allocation182_spill] sm:$0xff] %v8512_v22 }
 0x42c   :  { %v8514_v25 = vpop.f32.mrf.mxu0  ;;  %v8516_v13 = vpop.f32.mrf.mxu1  ;;  %5014 = vmatmul.msk.f32.gmra.mxu3 %vm307_vm0, %v8502_v50 }
 0x42d   :  { %10584 = vst [vmem:[#allocation183_spill] sm:$0xff] %v8514_v25  ;;  %4998 = vmatmul.msk.f32.gmra.mxu2 %vm307_vm0, %v8502_v50 }
 0x42e   :  { %10585 = vst [vmem:[#allocation184_spill] sm:$0xff] %v8516_v13 }
 0x42f   :  { %4967 = vmatmul.msk.f32.gmra.mxu0 %vm307_vm0, %v8523_v57  ;;  %4983 = vmatmul.msk.f32.gmra.mxu1 %vm307_vm0, %v8523_v57  ;;  %v8531_v25 = vpop.f32.mrf.mxu3 }
 0x430   :  { %10586 = vst [vmem:[#allocation185_spill] sm:$0xff] %v8531_v25  ;;  %v8533_v13 = vpop.f32.mrf.mxu2 }
 0x431   :  { %10587 = vst [vmem:[#allocation186_spill] sm:$0xff] %v8533_v13 }
 0x434   :  { %v8535_v22 = vpop.f32.mrf.mxu0  ;;  %v8537_v29 = vpop.f32.mrf.mxu1  ;;  %5015 = vmatmul.msk.f32.gmra.mxu3 %vm307_vm0, %v8523_v57 }
 0x435   :  { %10588 = vst [vmem:[#allocation187_spill] sm:$0xff] %v8535_v22  ;;  %4999 = vmatmul.msk.f32.gmra.mxu2 %vm307_vm0, %v8523_v57 }
 0x436   :  { %10589 = vst [vmem:[#allocation188_spill] sm:$0xff] %v8537_v29 }
 0x437   :  { %4968 = vmatmul.msk.f32.gmra.mxu0 %vm307_vm0, %v8544_v33  ;;  %4984 = vmatmul.msk.f32.gmra.mxu1 %vm307_vm0, %v8544_v33  ;;  %v8552_v22 = vpop.f32.mrf.mxu3 }
 0x438   :  { %10590 = vst [vmem:[#allocation189_spill] sm:$0xff] %v8552_v22  ;;  %v8554_v29 = vpop.f32.mrf.mxu2 }
 0x439   :  { %10591 = vst [vmem:[#allocation190_spill] sm:$0xff] %v8554_v29 }
 0x43c   :  { %v8556_v13 = vpop.f32.mrf.mxu0  ;;  %v8558_v25 = vpop.f32.mrf.mxu1  ;;  %5016 = vmatmul.msk.f32.gmra.mxu3 %vm307_vm0, %v8544_v33 }
 0x43d   :  { %10592 = vst [vmem:[#allocation191_spill] sm:$0xff] %v8556_v13  ;;  %5000 = vmatmul.msk.f32.gmra.mxu2 %vm307_vm0, %v8544_v33 }
 0x43e   :  { %10593 = vst [vmem:[#allocation192_spill] sm:$0xff] %v8558_v25 }
 0x43f   :  { %4969 = vmatmul.msk.f32.gmra.mxu0 %vm307_vm0, %v8565_v63  ;;  %4985 = vmatmul.msk.f32.gmra.mxu1 %vm307_vm0, %v8565_v63  ;;  %v8573_v13 = vpop.f32.mrf.mxu3 }
 0x440   :  { %10594 = vst [vmem:[#allocation193_spill] sm:$0xff] %v8573_v13  ;;  %v8575_v25 = vpop.f32.mrf.mxu2 }
 0x441   :  { %10595 = vst [vmem:[#allocation194_spill] sm:$0xff] %v8575_v25 }
 0x444   :  { %v8577_v29 = vpop.f32.mrf.mxu0  ;;  %v8579_v22 = vpop.f32.mrf.mxu1  ;;  %5017 = vmatmul.msk.f32.gmra.mxu3 %vm307_vm0, %v8565_v63 }
 0x445   :  { %10596 = vst [vmem:[#allocation195_spill] sm:$0xff] %v8577_v29  ;;  %5001 = vmatmul.msk.f32.gmra.mxu2 %vm307_vm0, %v8565_v63 }
 0x446   :  { %10597 = vst [vmem:[#allocation196_spill] sm:$0xff] %v8579_v22 }
 0x447   :  { %4970 = vmatmul.msk.f32.gmra.mxu0 %vm307_vm0, %v8586_v12  ;;  %4986 = vmatmul.msk.f32.gmra.mxu1 %vm307_vm0, %v8586_v12  ;;  %v8594_v29 = vpop.f32.mrf.mxu3 }
 0x448   :  { %10598 = vst [vmem:[#allocation197_spill] sm:$0xff] %v8594_v29  ;;  %v8596_v22 = vpop.f32.mrf.mxu2 }
 0x449   :  { %10599 = vst [vmem:[#allocation198_spill] sm:$0xff] %v8596_v22 }
 0x44c   :  { %v8598_v13 = vpop.f32.mrf.mxu0  ;;  %v8600_v25 = vpop.f32.mrf.mxu1  ;;  %5018 = vmatmul.msk.f32.gmra.mxu3 %vm307_vm0, %v8586_v12 }
 0x44d   :  { %10600 = vst [vmem:[#allocation199_spill] sm:$0xff] %v8598_v13  ;;  %5002 = vmatmul.msk.f32.gmra.mxu2 %vm307_vm0, %v8586_v12 }
 0x44e   :  { %10601 = vst [vmem:[#allocation200_spill] sm:$0xff] %v8600_v25 }
 0x44f   :  { %4971 = vmatmul.msk.f32.gmra.mxu0 %vm307_vm0, %v8607_v27  ;;  %4987 = vmatmul.msk.f32.gmra.mxu1 %vm307_vm0, %v8607_v27  ;;  %v8615_v13 = vpop.f32.mrf.mxu3 }
 0x450   :  { %10602 = vst [vmem:[#allocation201_spill] sm:$0xff] %v8615_v13  ;;  %v8617_v25 = vpop.f32.mrf.mxu2 }
 0x451   :  { %10603 = vst [vmem:[#allocation202_spill] sm:$0xff] %v8617_v25 }
 0x454   :  { %v8619_v29 = vpop.f32.mrf.mxu0  ;;  %v8621_v22 = vpop.f32.mrf.mxu1  ;;  %5019 = vmatmul.msk.f32.gmra.mxu3 %vm307_vm0, %v8607_v27 }
 0x455   :  { %10604 = vst [vmem:[#allocation203_spill] sm:$0xff] %v8619_v29  ;;  %5003 = vmatmul.msk.f32.gmra.mxu2 %vm307_vm0, %v8607_v27 }
 0x456   :  { %10605 = vst [vmem:[#allocation204_spill] sm:$0xff] %v8621_v22 }
 0x457   :  { %4972 = vmatmul.msk.f32.gmra.mxu0 %vm307_vm0, %v8628_v48  ;;  %4988 = vmatmul.msk.f32.gmra.mxu1 %vm307_vm0, %v8628_v48  ;;  %v8636_v29 = vpop.f32.mrf.mxu3 }
 0x458   :  { %10607 = vst [vmem:[#allocation206_spill] sm:$0xff] %v8636_v29  ;;  %v8638_v22 = vpop.f32.mrf.mxu2 }
 0x459   :  { %10608 = vst [vmem:[#allocation207_spill] sm:$0xff] %v8638_v22 }
 0x45c   :  { %v8640_v13 = vpop.f32.mrf.mxu0  ;;  %v8642_v25 = vpop.f32.mrf.mxu1  ;;  %5020 = vmatmul.msk.f32.gmra.mxu3 %vm307_vm0, %v8628_v48 }
 0x45d   :  { %10609 = vst [vmem:[#allocation208_spill] sm:$0xff] %v8640_v13  ;;  %5004 = vmatmul.msk.f32.gmra.mxu2 %vm307_vm0, %v8628_v48  ;;  %v8670_v48 = vld [vmem:[%s9910_s3 + $0x178] sm:$0xff] }
 0x45e   :  { %10610 = vst [vmem:[#allocation209_spill] sm:$0xff] %v8642_v25 }
 0x45f   :  { %4973 = vmatmul.msk.f32.gmra.mxu0 %vm307_vm0, %v8649_v45  ;;  %4989 = vmatmul.msk.f32.gmra.mxu1 %vm307_vm0, %v8649_v45  ;;  %v8657_v13 = vpop.f32.mrf.mxu3  ;;  %10616 = vst [vmem:[#allocation215_spill] sm:$0xff] %v8670_v48 }
 0x460   :  { %10612 = vst [vmem:[#allocation211_spill] sm:$0xff] %v8657_v13  ;;  %v8659_v25 = vpop.f32.mrf.mxu2 }
 0x461   :  { %10613 = vst [vmem:[#allocation212_spill] sm:$0xff] %v8659_v25 }
 0x464   :  { %v8661_v29 = vpop.f32.mrf.mxu0  ;;  %v8663_v22 = vpop.f32.mrf.mxu1  ;;  %5021 = vmatmul.msk.f32.gmra.mxu3 %vm307_vm0, %v8649_v45 }
 0x465   :  { %10614 = vst [vmem:[#allocation213_spill] sm:$0xff] %v8661_v29  ;;  %5005 = vmatmul.msk.f32.gmra.mxu2 %vm307_vm0, %v8649_v45 }
 0x466   :  { %10615 = vst [vmem:[#allocation214_spill] sm:$0xff] %v8663_v22 }
 0x467   :  { %4974 = vmatmul.msk.f32.gmra.mxu0 %vm307_vm0, %v8670_v48  ;;  %4990 = vmatmul.msk.f32.gmra.mxu1 %vm307_vm0, %v8670_v48  ;;  %v8678_v29 = vpop.f32.mrf.mxu3 }
 0x468   :  { %10617 = vst [vmem:[#allocation216_spill] sm:$0xff] %v8678_v29  ;;  %v8680_v22 = vpop.f32.mrf.mxu2 }
 0x469   :  { %10618 = vst [vmem:[#allocation217_spill] sm:$0xff] %v8680_v22 }
 0x46c   :  { %v8682_v13 = vpop.f32.mrf.mxu0  ;;  %v8684_v25 = vpop.f32.mrf.mxu1  ;;  %5022 = vmatmul.msk.f32.gmra.mxu3 %vm307_vm0, %v8670_v48 }
 0x46d   :  { %10619 = vst [vmem:[#allocation218_spill] sm:$0xff] %v8682_v13  ;;  %5006 = vmatmul.msk.f32.gmra.mxu2 %vm307_vm0, %v8670_v48  ;;  %v10625_v48 = vld [vmem:[#allocation62_spill] sm:$0xff] }
 0x46e   :  { %10620 = vst [vmem:[#allocation219_spill] sm:$0xff] %v8684_v25  ;;  %v2749_v25 = vadd.f32 %v8087_v46, %v10625_v48  ;;  %v10629_v46 = vld [vmem:[#allocation64_spill] sm:$0xff] }
 0x46f   :  { %5023 = vmatmul.msk.f32.vlgmr.msrb.gmra.mxu0 %vm307_vm0, %v8355_v2  ;;  %5039 = vmatmul.msk.f32.vlgmr.msrb.gmra.mxu1 %vm307_vm0, %v8355_v2  ;;  %v8694_v45 = vpop.f32.mrf.mxu3  ;;  %v2752_v48 = vadd.f32 %v8123_v23, %v10629_v46  ;;  %v10634_v46 = vld [vmem:[#allocation27_spill] sm:$0xff] }
 0x470   :  { %10621 = vst [vmem:[#allocation220_spill] sm:$0xff] %v8694_v45  ;;  %v8696_v29 = vpop.f32.mrf.mxu2 }
 0x471   :  { %10622 = vst [vmem:[#allocation221_spill] sm:$0xff] %v8696_v29 }
 0x474   :  { %v8698_v22 = vpop.f32.mrf.mxu0  ;;  %v8700_v13 = vpop.f32.mrf.mxu1  ;;  %5071 = vmatmul.msk.f32.vlgmr.msrb.gmra.mxu3 %vm307_vm0, %v8355_v2 }
 0x475   :  { %10623 = vst [vmem:[#allocation222_spill] sm:$0xff] %v8698_v22  ;;  %5055 = vmatmul.msk.f32.vlgmr.msrb.gmra.mxu2 %vm307_vm0, %v8355_v2  ;;  %v10630_v2 = vld [vmem:[#allocation25_spill] sm:$0xff] }
 0x476   :  { %10624 = vst [vmem:[#allocation223_spill] sm:$0xff] %v8700_v13  ;;  %v2687_v34 = vadd.f32 %v8118_v20, %v10630_v2  ;;  %v10633_v20 = vld [vmem:[#allocation66_spill] sm:$0xff]  ;;  %v2690_v2 = vadd.f32 %v8145_v37, %v10634_v46  ;;  %v10637_v37 = vld [vmem:[#allocation68_spill] sm:$0xff] }
 0x477   :  { %5024 = vmatmul.msk.f32.gmra.mxu0 %vm307_vm0, %v8376_v35  ;;  %5040 = vmatmul.msk.f32.gmra.mxu1 %vm307_vm0, %v8376_v35  ;;  %v3413_v29 = vpop.f32.mrf.mxu3  ;;  %v2755_v23 = vadd.f32 %v8152_v58, %v10633_v20  ;;  %v2758_v58 = vadd.f32 %v8168_v55, %v10637_v37  ;;  %v10638_v20 = vld [vmem:[#allocation29_spill] sm:$0xff]  ;;  %v2696_v55 = vadd.f32 %v8178_v49, %v7510_v30  ;;  %v10643_v30 = vld [vmem:[#allocation31_spill] sm:$0xff] }
 0x478   :  { %v8712_v45 = vpop.f32.mrf.mxu2  ;;  %v8714_v22 = vadd.f32 %v3413_v29, %v2749_v25  ;;  %v2693_v46 = vadd.f32 %v8162_v18, %v10638_v20  ;;  %v2761_v18 = vadd.f32 %v8184_v60, %v7512_v11  ;;  %v2764_v11 = vadd.f32 %v8200_v24, %v7528_v52  ;;  %v10646_v24 = vld [vmem:[#allocation71_spill] sm:$0xff] }
 0x479   :  { %10626 = vst [vmem:[#allocation62_spill] sm:$0xff] %v8712_v45  ;;  %v2699_v49 = vadd.f32 %v8194_v5, %v10643_v30  ;;  %v2767_v52 = vadd.f32 %v8216_v19, %v7544_v32  ;;  %v2702_v5 = vadd.f32 %v8210_v61, %v10646_v24  ;;  %v2770_v32 = vadd.f32 %v8232_v15, %v7560_v1  ;;  %v10649_v19 = vld [vmem:[#allocation36_spill] sm:$0xff]  ;;  %v8864_v1 = vpop.permute.xlu1 %3932 }
 0x47a   :  { %10627 = vst [vmem:[#allocation224_spill] sm:$0xff] %v8714_v22  ;;  %v2705_v61 = vadd.f32 %v8226_v14, %v10649_v19 }
 0x47b   :  { %10654 = vst [vmem:[#allocation233_spill] sm:$0xff] %v8864_v1  ;;  %v10752_v1 = vld [vmem:[#allocation51_spill] sm:$0xff] }
 0x47c   :  { %v8716_v13 = vpop.f32.mrf.mxu0  ;;  %v8718_v51 = vpop.f32.mrf.mxu1  ;;  %5072 = vmatmul.msk.f32.gmra.mxu3 %vm307_vm0, %v8376_v35 }
 0x47d   :  { %10628 = vst [vmem:[#allocation225_spill] sm:$0xff] %v8718_v51  ;;  %5056 = vmatmul.msk.f32.gmra.mxu2 %vm307_vm0, %v8376_v35 }
 0x47f   :  { %5025 = vmatmul.msk.f32.gmra.mxu0 %vm307_vm0, %v8397_v36  ;;  %5041 = vmatmul.msk.f32.gmra.mxu1 %vm307_vm0, %v8397_v36  ;;  %v3416_v25 = vpop.f32.mrf.mxu3 }
 0x480   :  { %v3351_v29 = vpop.f32.mrf.mxu2  ;;  %v8732_v22 = vadd.f32 %v3416_v25, %v2752_v48 }
 0x481   :  { %v8734_v45 = vadd.f32 %v3351_v29, %v2687_v34 }
 0x482   :  { %10631 = vst [vmem:[#allocation64_spill] sm:$0xff] %v8732_v22 }
 0x483   :  { %10632 = vst [vmem:[#allocation25_spill] sm:$0xff] %v8734_v45 }
 0x484   :  { %v8736_v51 = vpop.f32.mrf.mxu0  ;;  %v8738_v35 = vpop.f32.mrf.mxu1  ;;  %5073 = vmatmul.msk.f32.gmra.mxu3 %vm307_vm0, %v8397_v36 }
 0x485   :  { %5057 = vmatmul.msk.f32.gmra.mxu2 %vm307_vm0, %v8397_v36 }
 0x487   :  { %5026 = vmatmul.msk.f32.gmra.mxu0 %vm307_vm0, %v8418_v4  ;;  %5042 = vmatmul.msk.f32.gmra.mxu1 %vm307_vm0, %v8418_v4  ;;  %v3419_v34 = vpop.f32.mrf.mxu3 }
 0x488   :  { %v3354_v48 = vpop.f32.mrf.mxu2  ;;  %v8752_v25 = vadd.f32 %v3419_v34, %v2755_v23 }
 0x489   :  { %v8754_v29 = vadd.f32 %v3354_v48, %v2690_v2 }
 0x48a   :  { %10635 = vst [vmem:[#allocation66_spill] sm:$0xff] %v8752_v25 }
 0x48b   :  { %10636 = vst [vmem:[#allocation27_spill] sm:$0xff] %v8754_v29 }
 0x48c   :  { %v8756_v22 = vpop.f32.mrf.mxu0  ;;  %v8758_v36 = vpop.f32.mrf.mxu1  ;;  %5074 = vmatmul.msk.f32.gmra.mxu3 %vm307_vm0, %v8418_v4 }
 0x48d   :  { %5058 = vmatmul.msk.f32.gmra.mxu2 %vm307_vm0, %v8418_v4 }
 0x48f   :  { %5027 = vmatmul.msk.f32.gmra.mxu0 %vm307_vm0, %v8439_v40  ;;  %5043 = vmatmul.msk.f32.gmra.mxu1 %vm307_vm0, %v8439_v40  ;;  %v3422_v23 = vpop.f32.mrf.mxu3 }
 0x490   :  { %v3357_v2 = vpop.f32.mrf.mxu2  ;;  %v8772_v34 = vadd.f32 %v3422_v23, %v2758_v58 }
 0x491   :  { %v8774_v48 = vadd.f32 %v3357_v2, %v2693_v46 }
 0x492   :  { %10639 = vst [vmem:[#allocation68_spill] sm:$0xff] %v8772_v34 }
 0x493   :  { %10640 = vst [vmem:[#allocation29_spill] sm:$0xff] %v8774_v48 }
 0x494   :  { %v8776_v45 = vpop.f32.mrf.mxu0  ;;  %v8778_v4 = vpop.f32.mrf.mxu1  ;;  %5075 = vmatmul.msk.f32.gmra.mxu3 %vm307_vm0, %v8439_v40 }
 0x495   :  { %5059 = vmatmul.msk.f32.gmra.mxu2 %vm307_vm0, %v8439_v40 }
 0x497   :  { %5028 = vmatmul.msk.f32.gmra.mxu0 %vm307_vm0, %v8460_v3  ;;  %5044 = vmatmul.msk.f32.gmra.mxu1 %vm307_vm0, %v8460_v3  ;;  %v3425_v37 = vpop.f32.mrf.mxu3 }
 0x498   :  { %v3360_v58 = vpop.f32.mrf.mxu2  ;;  %v8792_v20 = vadd.f32 %v3425_v37, %v2761_v18 }
 0x499   :  { %v8794_v46 = vadd.f32 %v3360_v58, %v2696_v55 }
 0x49a   :  { %10641 = vst [vmem:[#allocation226_spill] sm:$0xff] %v8792_v20 }
 0x49b   :  { %10642 = vst [vmem:[#allocation227_spill] sm:$0xff] %v8794_v46 }
 0x49c   :  { %v8796_v23 = vpop.f32.mrf.mxu0  ;;  %v8798_v40 = vpop.f32.mrf.mxu1  ;;  %5076 = vmatmul.msk.f32.gmra.mxu3 %vm307_vm0, %v8460_v3 }
 0x49d   :  { %5060 = vmatmul.msk.f32.gmra.mxu2 %vm307_vm0, %v8460_v3 }
 0x49f   :  { %5029 = vmatmul.msk.f32.gmra.mxu0 %vm307_vm0, %v8481_v31  ;;  %5045 = vmatmul.msk.f32.gmra.mxu1 %vm307_vm0, %v8481_v31  ;;  %v3428_v60 = vpop.f32.mrf.mxu3 }
 0x4a0   :  { %v3363_v2 = vpop.f32.mrf.mxu2  ;;  %v8812_v18 = vadd.f32 %v3428_v60, %v2764_v11 }
 0x4a1   :  { %v8814_v55 = vadd.f32 %v3363_v2, %v2699_v49 }
 0x4a2   :  { %10644 = vst [vmem:[#allocation31_spill] sm:$0xff] %v8812_v18 }
 0x4a3   :  { %10645 = vst [vmem:[#allocation228_spill] sm:$0xff] %v8814_v55 }
 0x4a4   :  { %v8816_v37 = vpop.f32.mrf.mxu0  ;;  %v8818_v3 = vpop.f32.mrf.mxu1  ;;  %5077 = vmatmul.msk.f32.gmra.mxu3 %vm307_vm0, %v8481_v31 }
 0x4a5   :  { %5061 = vmatmul.msk.f32.gmra.mxu2 %vm307_vm0, %v8481_v31 }
 0x4a7   :  { %5030 = vmatmul.msk.f32.gmra.mxu0 %vm307_vm0, %v8502_v50  ;;  %5046 = vmatmul.msk.f32.gmra.mxu1 %vm307_vm0, %v8502_v50  ;;  %v3431_v58 = vpop.f32.mrf.mxu3 }
 0x4a8   :  { %v3366_v11 = vpop.f32.mrf.mxu2  ;;  %v8832_v30 = vadd.f32 %v3431_v58, %v2767_v52 }
 0x4a9   :  { %v8834_v49 = vadd.f32 %v3366_v11, %v2702_v5  ;;  %v8874_v11 = vpop.permute.xlu0 %3937 }
 0x4aa   :  { %10647 = vst [vmem:[#allocation71_spill] sm:$0xff] %v8832_v30 }
 0x4ab   :  { %10648 = vst [vmem:[#allocation229_spill] sm:$0xff] %v8834_v49 }
 0x4ac   :  { %v8836_v60 = vpop.f32.mrf.mxu0  ;;  %v8838_v31 = vpop.f32.mrf.mxu1  ;;  %5078 = vmatmul.msk.f32.gmra.mxu3 %vm307_vm0, %v8502_v50 }
 0x4ad   :  { %5062 = vmatmul.msk.f32.gmra.mxu2 %vm307_vm0, %v8502_v50 }
 0x4af   :  { %5031 = vmatmul.msk.f32.gmra.mxu0 %vm307_vm0, %v8523_v57  ;;  %5047 = vmatmul.msk.f32.gmra.mxu1 %vm307_vm0, %v8523_v57  ;;  %v3434_v2 = vpop.f32.mrf.mxu3 }
 0x4b0   :  { %v3369_v52 = vpop.f32.mrf.mxu2  ;;  %v8852_v24 = vadd.f32 %v3434_v2, %v2770_v32  ;;  %v8892_v2 = vpop.permute.xlu1 %3917 }
 0x4b1   :  { %v8854_v5 = vadd.f32 %v3369_v52, %v2705_v61  ;;  %10661 = vst [vmem:[#allocation240_spill] sm:$0xff] %v8892_v2  ;;  %v8894_v52 = vpop.permute.xlu0 %3922  ;;  %v10679_v2 = vld [vmem:[#allocation63_spill] sm:$0xff] }
 0x4b2   :  { %10650 = vst [vmem:[#allocation36_spill] sm:$0xff] %v8852_v24 }
 0x4b3   :  { %10651 = vst [vmem:[#allocation230_spill] sm:$0xff] %v8854_v5  ;;  %v10674_v5 = vld [vmem:[#allocation8_spill] sm:$0xff] }
 0x4b4   :  { %v8856_v58 = vpop.f32.mrf.mxu0  ;;  %v8858_v50 = vpop.f32.mrf.mxu1  ;;  %5079 = vmatmul.msk.f32.gmra.mxu3 %vm307_vm0, %v8523_v57  ;;  %10662 = vst [vmem:[#allocation241_spill] sm:$0xff] %v8894_v52  ;;  %v8938_v24 = vadd.f32 %v8054_v41, %v10674_v5  ;;  %v10680_v41 = vld [vmem:[#allocation26_spill] sm:$0xff] }
 0x4b5   :  { %10652 = vst [vmem:[#allocation231_spill] sm:$0xff] %v8856_v58  ;;  %5063 = vmatmul.msk.f32.gmra.mxu2 %vm307_vm0, %v8523_v57  ;;  %v8958_v5 = vadd.f32 %v8135_v8, %v10680_v41  ;;  %v10686_v8 = vld [vmem:[#allocation35_spill] sm:$0xff] }
 0x4b6   :  { %10653 = vst [vmem:[#allocation232_spill] sm:$0xff] %v8858_v50  ;;  %v8978_v41 = vadd.f32 %v8186_v44, %v10686_v8  ;;  %v10690_v44 = vld [vmem:[#allocation33_spill] sm:$0xff]  ;;  %v10692_v8 = vld [vmem:[#allocation72_spill] sm:$0xff] }
 0x4b7   :  { %5032 = vmatmul.msk.f32.gmra.mxu0 %vm307_vm0, %v8544_v33  ;;  %5048 = vmatmul.msk.f32.gmra.mxu1 %vm307_vm0, %v8544_v33  ;;  %v8870_v15 = vpop.f32.mrf.mxu3 }
 0x4b8   :  { %10655 = vst [vmem:[#allocation234_spill] sm:$0xff] %v8870_v15  ;;  %v8872_v14 = vpop.f32.mrf.mxu2  ;;  %v8914_v20 = vpop.permute.xlu1 %3902 }
 0x4b9   :  { %10656 = vst [vmem:[#allocation235_spill] sm:$0xff] %v8872_v14  ;;  %v10675_v14 = vld [vmem:[#allocation60_spill] sm:$0xff] }
 0x4ba   :  { %10668 = vst [vmem:[#allocation247_spill] sm:$0xff] %v8914_v20  ;;  %v8942_v15 = vadd.f32 %v8056_v9, %v10675_v14  ;;  %v10681_v9 = vld [vmem:[#allocation65_spill] sm:$0xff] }
 0x4bb   :  { %v8962_v14 = vadd.f32 %v8137_v53, %v10681_v9 }
 0x4bc   :  { %v8876_v32 = vpop.f32.mrf.mxu0  ;;  %v8878_v19 = vpop.f32.mrf.mxu1  ;;  %5080 = vmatmul.msk.f32.gmra.mxu3 %vm307_vm0, %v8544_v33 }
 0x4bd   :  { %10657 = vst [vmem:[#allocation236_spill] sm:$0xff] %v8876_v32  ;;  %5064 = vmatmul.msk.f32.gmra.mxu2 %vm307_vm0, %v8544_v33  ;;  %v8902_v33 = vpop.permute.xlu2 %3942  ;;  %v10724_v32 = vld [vmem:[#allocation59_spill] sm:$0xff] }
 0x4be   :  { %10658 = vst [vmem:[#allocation237_spill] sm:$0xff] %v8878_v19 }
 0x4bf   :  { %5033 = vmatmul.msk.f32.gmra.mxu0 %vm307_vm0, %v8565_v63  ;;  %5049 = vmatmul.msk.f32.gmra.mxu1 %vm307_vm0, %v8565_v63  ;;  %v8888_v57 = vpop.f32.mrf.mxu3  ;;  %10665 = vst [vmem:[#allocation244_spill] sm:$0xff] %v8902_v33 }
 0x4c0   :  { %10659 = vst [vmem:[#allocation238_spill] sm:$0xff] %v8888_v57  ;;  %v8890_v61 = vpop.f32.mrf.mxu2  ;;  %v10677_v57 = vld [vmem:[#allocation61_spill] sm:$0xff] }
 0x4c1   :  { %10660 = vst [vmem:[#allocation239_spill] sm:$0xff] %v8890_v61 }
 0x4c4   :  { %v8896_v25 = vpop.f32.mrf.mxu0  ;;  %v8898_v29 = vpop.f32.mrf.mxu1  ;;  %5081 = vmatmul.msk.f32.gmra.mxu3 %vm307_vm0, %v8565_v63 }
 0x4c5   :  { %10663 = vst [vmem:[#allocation242_spill] sm:$0xff] %v8896_v25  ;;  %5065 = vmatmul.msk.f32.gmra.mxu2 %vm307_vm0, %v8565_v63  ;;  %v8922_v63 = vpop.permute.xlu0 %3907  ;;  %v8926_v55 = vpop.permute.xlu2 %3927  ;;  %v10755_v25 = vld [vmem:[#allocation145_spill] sm:$0xff] }
 0x4c6   :  { %10664 = vst [vmem:[#allocation243_spill] sm:$0xff] %v8898_v29 }
 0x4c7   :  { %5034 = vmatmul.msk.f32.gmra.mxu0 %vm307_vm0, %v8586_v12  ;;  %5050 = vmatmul.msk.f32.gmra.mxu1 %vm307_vm0, %v8586_v12  ;;  %v8910_v48 = vpop.f32.mrf.mxu3  ;;  %10670 = vst [vmem:[#allocation249_spill] sm:$0xff] %v8922_v63 }
 0x4c8   :  { %10666 = vst [vmem:[#allocation245_spill] sm:$0xff] %v8910_v48  ;;  %v8912_v34 = vpop.f32.mrf.mxu2  ;;  %v10678_v48 = vld [vmem:[#allocation24_spill] sm:$0xff] }
 0x4c9   :  { %10667 = vst [vmem:[#allocation246_spill] sm:$0xff] %v8912_v34  ;;  %v8948_v34 = vadd.f32 %v8076_v43, %v10677_v57  ;;  %v10683_v43 = vld [vmem:[#allocation67_spill] sm:$0xff] }
 0x4ca   :  { %10671 = vst [vmem:[#allocation250_spill] sm:$0xff] %v8926_v55  ;;  %v8968_v57 = vadd.f32 %v8156_v0, %v10683_v43 }
 0x4cc   :  { %v8916_v46 = vpop.f32.mrf.mxu0  ;;  %v8918_v18 = vpop.f32.mrf.mxu1  ;;  %5082 = vmatmul.msk.f32.gmra.mxu3 %vm307_vm0, %v8586_v12 }
 0x4cd   :  { %10669 = vst [vmem:[#allocation248_spill] sm:$0xff] %v8918_v18  ;;  %5066 = vmatmul.msk.f32.gmra.mxu2 %vm307_vm0, %v8586_v12  ;;  %v10676_v12 = vld [vmem:[#allocation9_spill] sm:$0xff]  ;;  %v9060_v55 = vpop.permute.xlu2 %3912 }
 0x4ce   :  { %v2557_v61 = vadd.f32 %v8073_v10, %v10676_v12  ;;  %v10682_v10 = vld [vmem:[#allocation28_spill] sm:$0xff] }
 0x4cf   :  { %5035 = vmatmul.msk.f32.gmra.mxu0 %vm307_vm0, %v8607_v27  ;;  %5051 = vmatmul.msk.f32.gmra.mxu1 %vm307_vm0, %v8607_v27  ;;  %v8932_v49 = vpop.f32.mrf.mxu3  ;;  %v2566_v12 = vadd.f32 %v8154_v21, %v10682_v10  ;;  %v10687_v21 = vld [vmem:[#allocation74_spill] sm:$0xff] }
 0x4d0   :  { %10672 = vst [vmem:[#allocation251_spill] sm:$0xff] %v8932_v49  ;;  %v8934_v30 = vpop.f32.mrf.mxu2  ;;  %v2560_v49 = vadd.f32 %v8105_v59, %v10678_v48  ;;  %v10684_v59 = vld [vmem:[#allocation30_spill] sm:$0xff]  ;;  %v8988_v0 = vadd.f32 %v8188_v56, %v10687_v21  ;;  %v9008_v56 = vadd.f32 %v8220_v7, %v10692_v8  ;;  %v10693_v21 = vld [vmem:[#allocation75_spill] sm:$0xff]  ;;  %v10701_v7 = vld [vmem:[#allocation40_spill] sm:$0xff] }
 0x4d1   :  { %10673 = vst [vmem:[#allocation252_spill] sm:$0xff] %v8934_v30  ;;  %v8954_v30 = vadd.f32 %v8109_v38, %v10679_v2  ;;  %v2569_v48 = vadd.f32 %v8170_v47, %v10684_v59  ;;  %v10685_v38 = vld [vmem:[#allocation69_spill] sm:$0xff]  ;;  %v10688_v47 = vld [vmem:[#allocation70_spill] sm:$0xff]  ;;  %v9000_v59 = vadd.f32 %v8218_v26, %v10690_v44 }
 0x4d2   :  { %v8974_v2 = vadd.f32 %v8172_v17, %v10685_v38  ;;  %v8992_v10 = vadd.f32 %v8202_v62, %v10688_v47  ;;  %v10689_v17 = vld [vmem:[#allocation32_spill] sm:$0xff]  ;;  %v9004_v38 = vpop.permute.xlu1 %3887  ;;  %v9012_v62 = vadd.f32 %v8234_v6, %v10693_v21  ;;  %v10696_v47 = vld [vmem:[#allocation39_spill] sm:$0xff]  ;;  %v10702_v8 = vld [vmem:[#allocation22_spill] sm:$0xff]  ;;  %10722 = vst [vmem:[#allocation70_spill] sm:$0xff] %v9060_v55 }
 0x4d3   :  { %v8996_v43 = vadd.f32 %v8204_v28, %v10689_v17  ;;  %10691 = vst [vmem:[#allocation8_spill] sm:$0xff] %v9004_v38  ;;  %v9016_v28 = vadd.f32 %v8236_v42, %v7572_v39  ;;  %v9020_v26 = vadd.f32 %v8242_v54, %v10696_v47  ;;  %v9022_v17 = vpop.permute.xlu0 %3892  ;;  %v9030_v52 = vadd.f32 %v10702_v8, %v10701_v7  ;;  %v10704_v6 = vld [vmem:[#allocation79_spill] sm:$0xff]  ;;  %v10705_v21 = vld [vmem:[#allocation54_spill] sm:$0xff]  ;;  %v10707_v39 = vld [vmem:[#allocation205_spill] sm:$0xff] }
 0x4d4   :  { %v8980_v53 = vpop.f32.mrf.mxu0  ;;  %v8982_v9 = vpop.f32.mrf.mxu1  ;;  %5083 = vmatmul.msk.f32.gmra.mxu3 %vm307_vm0, %v8607_v27  ;;  %10694 = vst [vmem:[#allocation60_spill] sm:$0xff] %v9012_v62  ;;  %v9034_v50 = vadd.f32 %v10705_v21, %v10704_v6  ;;  %v10709_v54 = vld [vmem:[#allocation34_spill] sm:$0xff]  ;;  %v10710_v47 = vld [vmem:[#allocation7_spill] sm:$0xff]  ;;  %v10715_v8 = vld [vmem:[#allocation37_spill] sm:$0xff] }
 0x4d5   :  { %5067 = vmatmul.msk.f32.gmra.mxu2 %vm307_vm0, %v8607_v27  ;;  %10695 = vst [vmem:[#allocation9_spill] sm:$0xff] %v9016_v28  ;;  %v10699_v27 = vld [vmem:[#allocation78_spill] sm:$0xff]  ;;  %v10718_v21 = vld [vmem:[#allocation76_spill] sm:$0xff]  ;;  %v10737_v55 = vld [vmem:[#allocation81_spill] sm:$0xff] }
 0x4d6   :  { %10697 = vst [vmem:[#allocation61_spill] sm:$0xff] %v9020_v26  ;;  %v9026_v44 = vadd.f32 %v8248_v16, %v10699_v27  ;;  %v9044_v16 = vadd.f32 %v10710_v47, %v10709_v54  ;;  %v10712_v27 = vld [vmem:[#allocation73_spill] sm:$0xff]  ;;  %v10713_v26 = vld [vmem:[#allocation55_spill] sm:$0xff]  ;;  %v10719_v28 = vld [vmem:[#allocation56_spill] sm:$0xff] }
 0x4d7   :  { %10698 = vst [vmem:[#allocation24_spill] sm:$0xff] %v9022_v17  ;;  %5036 = vmatmul.msk.f32.gmra.mxu0 %vm307_vm0, %v10707_v39  ;;  %5052 = vmatmul.msk.f32.gmra.mxu1 %vm307_vm0, %v10707_v39  ;;  %v9040_v42 = vpop.f32.mrf.mxu3  ;;  %v9048_v7 = vadd.f32 %v10713_v26, %v10712_v27  ;;  %v9056_v19 = vadd.f32 %v10719_v28, %v10718_v21  ;;  %v10726_v47 = vld [vmem:[#allocation77_spill] sm:$0xff]  ;;  %v10734_v21 = vld [vmem:[#allocation42_spill] sm:$0xff] }
 0x4d8   :  { %10700 = vst [vmem:[#allocation63_spill] sm:$0xff] %v9026_v44  ;;  %v10716_v44 = vld [vmem:[#allocation5_spill] sm:$0xff]  ;;  %v10738_v62 = vld [vmem:[#allocation138_spill] sm:$0xff] }
 0x4d9   :  { %10703 = vst [vmem:[#allocation26_spill] sm:$0xff] %v9030_v52  ;;  %v9052_v6 = vadd.f32 %v10716_v44, %v10715_v8  ;;  %v10729_v27 = vld [vmem:[#allocation41_spill] sm:$0xff]  ;;  %v10731_v8 = vld [vmem:[#allocation80_spill] sm:$0xff]  ;;  %v10732_v52 = vld [vmem:[#allocation58_spill] sm:$0xff] }
 0x4da   :  { %10706 = vst [vmem:[#allocation65_spill] sm:$0xff] %v9034_v50  ;;  %v9058_v50 = vpop.f32.mrf.mxu2  ;;  %v9076_v28 = vadd.f32 %v10732_v52, %v10731_v8  ;;  %v10747_v52 = vld [vmem:[#allocation111_spill] sm:$0xff]  ;;  %v10748_v8 = vld [vmem:[#allocation142_spill] sm:$0xff] }
 0x4db   :  { %10708 = vst [vmem:[#allocation28_spill] sm:$0xff] %v9040_v42  ;;  %v10723_v42 = vld [vmem:[#allocation38_spill] sm:$0xff]  ;;  %v9096_v63 = vadd.f32 %v10748_v8, %v10747_v52  ;;  %v10763_v52 = vld [vmem:[#allocation148_spill] sm:$0xff] }
 0x4dc   :  { %10711 = vst [vmem:[#allocation67_spill] sm:$0xff] %v9044_v16  ;;  %v9064_v54 = vadd.f32 %v10724_v32, %v10723_v42  ;;  %v10727_v16 = vld [vmem:[#allocation6_spill] sm:$0xff]  ;;  %v9084_v32 = vadd.f32 %v10738_v62, %v10737_v55  ;;  %v10740_v42 = vld [vmem:[#allocation52_spill] sm:$0xff]  ;;  %v3325_v18 = vpop.f32.mrf.mxu1  ;;  %5084 = vmatmul.msk.f32.gmra.mxu3 %vm307_vm0, %v10707_v39 }
 0x4dd   :  { %10714 = vst [vmem:[#allocation30_spill] sm:$0xff] %v9048_v7  ;;  %v9068_v26 = vadd.f32 %v10727_v16, %v10726_v47  ;;  %v10730_v7 = vld [vmem:[#allocation57_spill] sm:$0xff]  ;;  %v10742_v47 = vld [vmem:[#allocation110_spill] sm:$0xff]  ;;  %v10753_v55 = vld [vmem:[#allocation144_spill] sm:$0xff]  ;;  %5068 = vmatmul.msk.f32.gmra.mxu2 %vm307_vm0, %v10707_v39  ;;  %v3753_v39 = vadd.f32 %v8756_v22, %v2566_v12  ;;  %v3769_v22 = vadd.f32 %v8796_v23, %v8978_v41 }
 0x4de   :  { %10717 = vst [vmem:[#allocation69_spill] sm:$0xff] %v9052_v6  ;;  %v9072_v44 = vadd.f32 %v10730_v7, %v10729_v27  ;;  %v10744_v7 = vld [vmem:[#allocation21_spill] sm:$0xff]  ;;  %v2661_v62 = vadd.f32 %v10753_v55, %v10752_v1  ;;  %v10762_v6 = vld [vmem:[#allocation4_spill] sm:$0xff] }
 0x4df   :  { %10720 = vst [vmem:[#allocation35_spill] sm:$0xff] %v9056_v19  ;;  %v10745_v27 = vld [vmem:[#allocation141_spill] sm:$0xff]  ;;  %v2664_v8 = vadd.f32 %v10763_v52, %v10762_v6  ;;  %v10764_v1 = vld [vmem:[#allocation108_spill] sm:$0xff]  ;;  %v10773_v6 = vld [vmem:[#allocation18_spill] sm:$0xff] }
 0x4e0   :  { %10721 = vst [vmem:[#allocation74_spill] sm:$0xff] %v9058_v50  ;;  %v10735_v50 = vld [vmem:[#allocation23_spill] sm:$0xff]  ;;  %v9092_v19 = vadd.f32 %v10745_v27, %v10744_v7  ;;  %v10760_v7 = vld [vmem:[#allocation100_spill] sm:$0xff]  ;;  %v10774_v52 = vld [vmem:[#allocation154_spill] sm:$0xff] }
 0x4e1   :  { %10725 = vst [vmem:[#allocation32_spill] sm:$0xff] %v9064_v54  ;;  %v9080_v58 = vadd.f32 %v10735_v50, %v10734_v21  ;;  %v10741_v54 = vld [vmem:[#allocation139_spill] sm:$0xff] }
 0x4e2   :  { %10728 = vst [vmem:[#allocation33_spill] sm:$0xff] %v9068_v26  ;;  %v2593_v16 = vadd.f32 %v10741_v54, %v10740_v42  ;;  %v10743_v26 = vld [vmem:[#allocation140_spill] sm:$0xff]  ;;  %v10750_v50 = vld [vmem:[#allocation43_spill] sm:$0xff]  ;;  %v10757_v42 = vld [vmem:[#allocation50_spill] sm:$0xff]  ;;  %v9170_v12 = vpop.f32.mrf.mxu2 }
 0x4e3   :  { %10733 = vst [vmem:[#allocation72_spill] sm:$0xff] %v9076_v28  ;;  %v2658_v29 = vadd.f32 %v10743_v26, %v10742_v47  ;;  %v10751_v21 = vld [vmem:[#allocation143_spill] sm:$0xff]  ;;  %v10758_v26 = vld [vmem:[#allocation146_spill] sm:$0xff]  ;;  %v10775_v28 = vld [vmem:[#allocation44_spill] sm:$0xff] }
 0x4e4   :  { %10736 = vst [vmem:[#allocation75_spill] sm:$0xff] %v9080_v58  ;;  %v2596_v58 = vadd.f32 %v10751_v21, %v10750_v50  ;;  %v9108_v47 = vadd.f32 %v10758_v26, %v10757_v42  ;;  %v10761_v27 = vld [vmem:[#allocation147_spill] sm:$0xff]  ;;  %v10765_v50 = vld [vmem:[#allocation149_spill] sm:$0xff] }
 0x4e5   :  { %10739 = vst [vmem:[#allocation39_spill] sm:$0xff] %v9084_v32  ;;  %v10754_v32 = vld [vmem:[#allocation107_spill] sm:$0xff]  ;;  %v9118_v21 = vadd.f32 %v10765_v50, %v10764_v1  ;;  %v10769_v42 = vld [vmem:[#allocation101_spill] sm:$0xff] }
 0x4e6   :  { %10746 = vst [vmem:[#allocation78_spill] sm:$0xff] %v9092_v19  ;;  %v9104_v54 = vadd.f32 %v10755_v25, %v10754_v32  ;;  %v2599_v19 = vadd.f32 %v10761_v27, %v10760_v7  ;;  %v10767_v25 = vld [vmem:[#allocation20_spill] sm:$0xff]  ;;  %v10768_v32 = vld [vmem:[#allocation150_spill] sm:$0xff]  ;;  %v10770_v26 = vld [vmem:[#allocation153_spill] sm:$0xff] }
 0x4e7   :  { %10749 = vst [vmem:[#allocation40_spill] sm:$0xff] %v9096_v63  ;;  %v3260_v63 = vpop.f32.mrf.mxu0  ;;  %v9122_v55 = vadd.f32 %v10768_v32, %v10767_v25  ;;  %v10772_v7 = vld [vmem:[#allocation222_spill] sm:$0xff]  ;;  %v10776_v1 = vld [vmem:[#allocation157_spill] sm:$0xff] }
 0x4e8   :  { %10756 = vst [vmem:[#allocation22_spill] sm:$0xff] %v9104_v54  ;;  %v9126_v54 = vadd.f32 %v10770_v26, %v10769_v42  ;;  %v3729_v27 = vadd.f32 %v10772_v7, %v2557_v61  ;;  %v9137_v50 = vadd.f32 %v10776_v1, %v10775_v28  ;;  %v10778_v25 = vld [vmem:[#allocation158_spill] sm:$0xff]  ;;  %v3737_v42 = vadd.f32 %v8716_v13, %v2560_v49  ;;  %v10779_v26 = vld [vmem:[#allocation49_spill] sm:$0xff]  ;;  %v9154_v28 = vpop.f32.mrf.mxu3 }
 0x4e9   :  { %10759 = vst [vmem:[#allocation79_spill] sm:$0xff] %v9108_v47  ;;  %v9133_v47 = vadd.f32 %v10774_v52, %v10773_v6  ;;  %v3761_v7 = vadd.f32 %v8776_v45, %v2569_v48  ;;  %v10781_v6 = vld [vmem:[#allocation210_spill] sm:$0xff]  ;;  %v3762_v45 = vadd.f32 %v8778_v4, %v8974_v2  ;;  %v9172_v48 = vpop.permute.xlu0 %3877  ;;  %v3770_v4 = vadd.f32 %v8798_v40, %v8988_v0  ;;  %v10790_v2 = vld [vmem:[#allocation225_spill] sm:$0xff] }
 0x4ea   :  { %10766 = vst [vmem:[#allocation54_spill] sm:$0xff] %v9118_v21  ;;  %v10777_v21 = vld [vmem:[#allocation12_spill] sm:$0xff]  ;;  %5037 = vmatmul.msk.f32.gmra.mxu0 %vm307_vm0, %v10781_v6  ;;  %5053 = vmatmul.msk.f32.gmra.mxu1 %vm307_vm0, %v10781_v6  ;;  %v10783_v52 = vld [vmem:[#allocation46_spill] sm:$0xff]  ;;  %v9188_v23 = vadd.f32 %v9172_v48, %v3737_v42  ;;  %v9192_v41 = vadd.f32 %v10790_v2, %v8954_v30 }
 0x4eb   :  { %10771 = vst [vmem:[#allocation205_spill] sm:$0xff] %v9126_v54  ;;  %v9141_v32 = vadd.f32 %v10778_v25, %v10777_v21  ;;  %v10780_v54 = vld [vmem:[#allocation161_spill] sm:$0xff]  ;;  %v9156_v21 = vpop.permute.xlu1 %3872  ;;  %v10784_v13 = vld [vmem:[#allocation162_spill] sm:$0xff]  ;;  %v10787_v25 = vld [vmem:[#allocation219_spill] sm:$0xff]  ;;  %v9209_v40 = vadd.f32 %v8758_v36, %v8968_v57  ;;  %v9212_v30 = vadd.f32 %v9022_v17, %v3761_v7  ;;  %v3833_v0 = vadd.f32 %v3260_v63, %v2596_v58 }
 0x4ec   :  { %v9146_v61 = vadd.f32 %v10780_v54, %v10779_v26  ;;  %10782 = vst [vmem:[#allocation34_spill] sm:$0xff] %v9156_v21  ;;  %v9160_v49 = vadd.f32 %v10784_v13, %v10783_v52  ;;  %v10785_v54 = vld [vmem:[#allocation218_spill] sm:$0xff]  ;;  %v9176_v26 = vadd.f32 %v10787_v25, %v8942_v15  ;;  %v9179_v52 = vadd.f32 %v9156_v21, %v3729_v27 }
 0x4ed   :  { %v9164_v1 = vadd.f32 %v10785_v54, %v8938_v24  ;;  %10786 = vst [vmem:[#allocation7_spill] sm:$0xff] %v9172_v48  ;;  %v10789_v24 = vld [vmem:[#allocation223_spill] sm:$0xff]  ;;  %v9196_v15 = vadd.f32 %v8736_v51, %v8958_v5  ;;  %v9200_v27 = vadd.f32 %v8738_v35, %v8962_v14  ;;  %v9205_v54 = vadd.f32 %v9004_v38, %v3753_v39  ;;  %v3328_v39 = vpop.f32.mrf.mxu1 }
 0x4ee   :  { %10788 = vst [vmem:[#allocation73_spill] sm:$0xff] %v9179_v52  ;;  %v9183_v13 = vadd.f32 %v10789_v24, %v8948_v34  ;;  %v9202_v34 = vpop.permute.xlu2 %3897  ;;  %v9215_v51 = vadd.f32 %v9022_v17, %v3762_v45  ;;  %v3777_v35 = vadd.f32 %v8816_v37, %v8992_v10  ;;  %v3834_v14 = vadd.f32 %v3325_v18, %v2661_v62 }
 0x4ef   :  { %v9218_v5 = vadd.f32 %v9202_v34, %v3769_v22  ;;  %v3263_v42 = vpop.f32.mrf.mxu0  ;;  %5085 = vmatmul.msk.f32.gmra.mxu3 %vm307_vm0, %v10781_v6  ;;  %v9225_v36 = vadd.f32 %v9202_v34, %v3770_v4  ;;  %v3825_v58 = vadd.f32 %v8980_v53, %v2593_v16  ;;  %v3842_v57 = vadd.f32 %v3328_v39, %v2664_v8  ;;  %v10791_v16 = vld [vmem:[#allocation215_spill] sm:$0xff]  ;;  %v10794_v8 = vld [vmem:[#allocation69_spill] sm:$0xff] }
 0x4f0   :  { %v3841_v63 = vadd.f32 %v3263_v42, %v2599_v19  ;;  %5069 = vmatmul.msk.f32.gmra.mxu2 %vm307_vm0, %v10781_v6  ;;  %v3778_v7 = vadd.f32 %v8818_v3, %v8996_v43  ;;  %v3785_v18 = vadd.f32 %v8836_v60, %v9000_v59  ;;  %v3817_v37 = vadd.f32 %v8916_v46, %v9072_v44  ;;  %v3455_v3 = vpop.f32.mrf.mxu3  ;;  %v3390_v44 = vpop.f32.mrf.mxu2  ;;  %v10795_v6 = vld [vmem:[#allocation242_spill] sm:$0xff]  ;;  %v10796_v22 = vld [vmem:[#allocation233_spill] sm:$0xff] }
 0x4f1   :  { %v3826_v10 = vadd.f32 %v8982_v9, %v2658_v29  ;;  %v4057_v62 = vadd.f32 %v8874_v11, %v3833_v0  ;;  %v4066_v19 = vadd.f32 %v8902_v33, %v3842_v57  ;;  %v9245_v60 = vadd.f32 %v8914_v20, %v3777_v35  ;;  %v10792_v29 = vld [vmem:[#allocation72_spill] sm:$0xff]  ;;  %v10797_v0 = vld [vmem:[#allocation249_spill] sm:$0xff] }
 0x4f2   :  { %v4065_v53 = vadd.f32 %v8902_v33, %v3841_v63  ;;  %5038 = vmatmul.msk.f32.gmra.mxu0 %vm307_vm0, %v10791_v16  ;;  %5054 = vmatmul.msk.f32.gmra.mxu1 %vm307_vm0, %v10791_v16  ;;  %v3786_v46 = vadd.f32 %v8838_v31, %v9008_v56  ;;  %v10793_v9 = vld [vmem:[#allocation248_spill] sm:$0xff]  ;;  %v4058_v59 = vadd.f32 %v8874_v11, %v3834_v14  ;;  %v10798_v31 = vld [vmem:[#allocation35_spill] sm:$0xff] }
 0x4f3   :  { %v3818_v43 = vadd.f32 %v10793_v9, %v10792_v29  ;;  %v3809_v45 = vadd.f32 %v10795_v6, %v10794_v8  ;;  %v4049_v25 = vadd.f32 %v10796_v22, %v3825_v58  ;;  %v4194_v4 = vmax.f32 %v4066_v19, 0.0  ;;  %v10799_v56 = vld [vmem:[#allocation243_spill] sm:$0xff]  ;;  %v10800_v14 = vld [vmem:[#allocation60_spill] sm:$0xff]  ;;  %v10802_v29 = vld [vmem:[#allocation26_spill] sm:$0xff] }
 0x4f4   :  { %v4193_v24 = vmax.f32 %v4065_v53, 0.0  ;;  %v9256_v2 = vadd.f32 %v8914_v20, %v3778_v7  ;;  %v9259_v35 = vadd.f32 %v10797_v0, %v3785_v18  ;;  %v3810_v42 = vadd.f32 %v10799_v56, %v10798_v31  ;;  %v10801_v63 = vld [vmem:[#allocation231_spill] sm:$0xff]  ;;  %v10803_v9 = vld [vmem:[#allocation236_spill] sm:$0xff]  ;;  %v10804_v58 = vld [vmem:[#allocation250_spill] sm:$0xff] }
 0x4f5   :  { %v4050_v39 = vadd.f32 %v10796_v22, %v3826_v10  ;;  %v3793_v57 = vadd.f32 %v10801_v63, %v10800_v14  ;;  %v3801_v8 = vadd.f32 %v10803_v9, %v10802_v29  ;;  %v4041_v53 = vadd.f32 %v10804_v58, %v3817_v37  ;;  %4235 = vmatpush.msra.mxu1 %v4194_v4  ;;  %v10805_v7 = vld [vmem:[#allocation65_spill] sm:$0xff]  ;;  %v9274_v10 = vpop.f32.mrf.mxu1  ;;  %v10813_v56 = vld [vmem:[#allocation240_spill] sm:$0xff] }
 0x4f6   :  { %v4185_v19 = vmax.f32 %v4057_v62, 0.0  ;;  %4215 = vmatpush.msra.mxu0 %v4193_v24  ;;  %v10806_v6 = vld [vmem:[#allocation237_spill] sm:$0xff]  ;;  %v4042_v52 = vadd.f32 %v10804_v58, %v3818_v43  ;;  %v4186_v17 = vmax.f32 %v4058_v59, 0.0  ;;  %10808 = vst [vmem:[#allocation37_spill] sm:$0xff] %v9274_v10  ;;  %v9280_v37 = vadd.f32 %v10797_v0, %v3786_v46  ;;  %v10810_v24 = vld [vmem:[#allocation232_spill] sm:$0xff]  ;;  %v10812_v46 = vld [vmem:[#allocation70_spill] sm:$0xff] }
 0x4f7   :  { %v3802_v18 = vadd.f32 %v10806_v6, %v10805_v7  ;;  %v9272_v31 = vpop.f32.mrf.mxu0  ;;  %5086 = vmatmul.msk.f32.gmra.mxu3 %vm307_vm0, %v10791_v16  ;;  %v10809_v62 = vld [vmem:[#allocation9_spill] sm:$0xff]  ;;  %v4177_v29 = vmax.f32 %v4049_v25, 0.0  ;;  %v4178_v59 = vmax.f32 %v4050_v39, 0.0  ;;  %v3836_v9 = vadd.f32 %v3455_v3, %v9122_v55 }
 0x4f8   :  { %10807 = vst [vmem:[#allocation55_spill] sm:$0xff] %v9272_v31  ;;  %v3794_v4 = vadd.f32 %v10810_v24, %v10809_v62  ;;  %v10811_v14 = vld [vmem:[#allocation241_spill] sm:$0xff]  ;;  %5070 = vmatmul.msk.f32.gmra.mxu2 %vm307_vm0, %v10791_v16  ;;  %4216 = vmatpush.msra.mxu0 %v4185_v19  ;;  %v4017_v6 = vadd.f32 %v10812_v46, %v3793_v57  ;;  %v4169_v62 = vmax.f32 %v4041_v53, 0.0  ;;  %v10814_v24 = vld [vmem:[#allocation54_spill] sm:$0xff]  ;;  %v3458_v25 = vpop.f32.mrf.mxu3  ;;  %v4170_v19 = vmax.f32 %v4042_v52, 0.0  ;;  %v10815_v31 = vld [vmem:[#allocation79_spill] sm:$0xff]  ;;  %v3393_v55 = vpop.f32.mrf.mxu2 }
 0x4f9   :  { %v4033_v63 = vadd.f32 %v10811_v14, %v3809_v45  ;;  %v4034_v43 = vadd.f32 %v10811_v14, %v3810_v42  ;;  %4236 = vmatpush.msra.mxu1 %v4186_v17  ;;  %v4025_v10 = vadd.f32 %v10813_v56, %v3801_v8  ;;  %v3835_v45 = vadd.f32 %v3390_v44, %v10814_v24  ;;  %v10816_v57 = vld [vmem:[#allocation22_spill] sm:$0xff]  ;;  %v10817_v53 = vld [vmem:[#allocation205_spill] sm:$0xff]  ;;  %v10818_v24 = vld [vmem:[#allocation40_spill] sm:$0xff] }
 0x4fa   :  { %4217 = vmatpush.msra.mxu0 %v4177_v29  ;;  %v4026_v16 = vadd.f32 %v10813_v56, %v3802_v18  ;;  %v3828_v42 = vadd.f32 %v9154_v28, %v10815_v31  ;;  %v3844_v17 = vadd.f32 %v3458_v25, %v9133_v47  ;;  %v4018_v3 = vadd.f32 %v10812_v46, %v3794_v4  ;;  %v10819_v18 = vld [vmem:[#allocation28_spill] sm:$0xff]  ;;  %v10820_v31 = vld [vmem:[#allocation78_spill] sm:$0xff]  ;;  %v10822_v25 = vld [vmem:[#allocation39_spill] sm:$0xff] }
 0x4fb   :  { %4237 = vmatpush.msra.mxu1 %v4178_v59  ;;  %v4161_v39 = vmax.f32 %v4033_v63, 0.0  ;;  %v3827_v8 = vadd.f32 %v9170_v12, %v10816_v57  ;;  %v3843_v44 = vadd.f32 %v3393_v55, %v10817_v53  ;;  %v4162_v29 = vmax.f32 %v4034_v43, 0.0  ;;  %v10821_v47 = vld [vmem:[#allocation74_spill] sm:$0xff]  ;;  %v10824_v53 = vld [vmem:[#allocation75_spill] sm:$0xff] }
 0x4fc   :  { %4218 = vmatpush.msra.mxu0 %v4169_v62  ;;  %v3820_v52 = vadd.f32 %v10819_v18, %v10818_v24  ;;  %v4060_v7 = vadd.f32 %v8874_v11, %v3836_v9  ;;  %v4068_v28 = vadd.f32 %v8902_v33, %v3844_v17  ;;  %v3819_v59 = vadd.f32 %v10821_v47, %v10820_v31  ;;  %v10823_v62 = vld [vmem:[#allocation251_spill] sm:$0xff]  ;;  %v10825_v24 = vld [vmem:[#allocation252_spill] sm:$0xff]  ;;  %v10827_v31 = vld [vmem:[#allocation245_spill] sm:$0xff] }
 0x4fd   :  { %4238 = vmatpush.msra.mxu1 %v4170_v19  ;;  %v4059_v4 = vadd.f32 %v8874_v11, %v3835_v45  ;;  %v4067_v63 = vadd.f32 %v8902_v33, %v3843_v44  ;;  %v4153_v12 = vmax.f32 %v4025_v10, 0.0  ;;  %v3812_v43 = vadd.f32 %v10823_v62, %v10822_v25  ;;  %v9314_v17 = vpop.f32.mrf.mxu1  ;;  %v10828_v25 = vld [vmem:[#allocation32_spill] sm:$0xff]  ;;  %v10829_v62 = vld [vmem:[#allocation246_spill] sm:$0xff] }
 0x4fe   :  { %4219 = vmatpush.msra.mxu0 %v4161_v39  ;;  %v4052_v55 = vadd.f32 %v10796_v22, %v3828_v42  ;;  %v4196_v57 = vmax.f32 %v4068_v28, 0.0  ;;  %v4154_v19 = vmax.f32 %v4026_v16, 0.0  ;;  %v3811_v18 = vadd.f32 %v10825_v24, %v10824_v53  ;;  %v10826_v39 = vld [vmem:[#allocation33_spill] sm:$0xff]  ;;  %v10832_v24 = vld [vmem:[#allocation238_spill] sm:$0xff] }
 0x4ff   :  { %4239 = vmatpush.msra.mxu1 %v4162_v29  ;;  %v9312_v9 = vpop.f32.mrf.mxu0  ;;  %v4051_v45 = vadd.f32 %v10796_v22, %v3827_v8  ;;  %v4195_v44 = vmax.f32 %v4067_v63, 0.0  ;;  %v4145_v10 = vmax.f32 %v4017_v6, 0.0  ;;  %v3804_v47 = vadd.f32 %v10827_v31, %v10826_v39  ;;  %v9326_v63 = vpop.permute.xlu2 %3882  ;;  %v11013_v22 = vld [vmem:[#allocation128_spill] sm:$0xff] }
 0x500   :  { %4220 = vmatpush.msra.mxu0 %v4153_v12  ;;  %v4044_v42 = vadd.f32 %v10804_v58, %v3820_v52  ;;  %v4188_v28 = vmax.f32 %v4060_v7, 0.0  ;;  %v4146_v29 = vmax.f32 %v4018_v3, 0.0  ;;  %4275 = vmatpush.msra.mxu3 %v4196_v57  ;;  %v3803_v16 = vadd.f32 %v10829_v62, %v10828_v25  ;;  %v3673_v8 = vpop.f32.mrf.mxu3  ;;  %10830 = vst [vmem:[#allocation5_spill] sm:$0xff] %v9326_v63  ;;  %v10831_v12 = vld [vmem:[#allocation30_spill] sm:$0xff]  ;;  %v3608_v57 = vpop.f32.mrf.mxu2  ;;  %v10840_v62 = vld [vmem:[#allocation61_spill] sm:$0xff] }
 0x501   :  { %4240 = vmatpush.msra.mxu1 %v4154_v19  ;;  %v4043_v33 = vadd.f32 %v10804_v58, %v3819_v59  ;;  %v4187_v53 = vmax.f32 %v4059_v4, 0.0  ;;  %4255 = vmatpush.msra.mxu2 %v4195_v44  ;;  %v4138_v6 = vmax.f32 %v9280_v37, 0.0  ;;  %v3796_v52 = vadd.f32 %v10832_v24, %v10831_v12  ;;  %v10834_v59 = vld [vmem:[#allocation67_spill] sm:$0xff] }
 0x502   :  { %4221 = vmatpush.msra.mxu0 %v4145_v10  ;;  %v4036_v7 = vadd.f32 %v10811_v14, %v3812_v43  ;;  %v4180_v3 = vmax.f32 %v4052_v55, 0.0  ;;  %v9332_v19 = vadd.f32 %v3673_v8, %v9141_v32  ;;  %4276 = vmatpush.msra.mxu3 %v4188_v28  ;;  %v10835_v4 = vld [vmem:[#allocation239_spill] sm:$0xff]  ;;  %v4035_v10 = vadd.f32 %v10811_v14, %v3811_v18  ;;  %v10839_v55 = vld [vmem:[#allocation234_spill] sm:$0xff] }
 0x503   :  { %4241 = vmatpush.msra.mxu1 %v4146_v29  ;;  %v3795_v44 = vadd.f32 %v10835_v4, %v10834_v59  ;;  %v4179_v37 = vmax.f32 %v4051_v45, 0.0  ;;  %v9338_v39 = vadd.f32 %v3608_v57, %v9137_v50  ;;  %v10837_v31 = vmax.f32 %v9259_v35, 0.0  ;;  %4256 = vmatpush.msra.mxu2 %v4187_v53  ;;  %v10838_v43 = vld [vmem:[#allocation63_spill] sm:$0xff]  ;;  %v10843_v4 = vld [vmem:[#allocation36_spill] sm:$0xff] }
 0x504   :  { %10833 = vst [vmem:[#allocation76_spill] sm:$0xff] %v9332_v19  ;;  %v3788_v29 = vadd.f32 %v10839_v55, %v10838_v43  ;;  %v4028_v32 = vadd.f32 %v10813_v56, %v3804_v47  ;;  %v4172_v25 = vmax.f32 %v4044_v42, 0.0  ;;  %v4130_v28 = vmax.f32 %v9256_v2, 0.0  ;;  %4277 = vmatpush.msra.mxu3 %v4180_v3  ;;  %v10841_v18 = vld [vmem:[#allocation235_spill] sm:$0xff]  ;;  %v10923_v19 = vld [vmem:[#allocation53_spill] sm:$0xff] }
 0x505   :  { %10836 = vst [vmem:[#allocation56_spill] sm:$0xff] %v9338_v39  ;;  %4222 = vmatpush.msra.mxu0 %v10837_v31  ;;  %4242 = vmatpush.msra.mxu1 %v4138_v6  ;;  %v3787_v45 = vadd.f32 %v10841_v18, %v10840_v62  ;;  %v4027_v50 = vadd.f32 %v10813_v56, %v3803_v16  ;;  %v4171_v8 = vmax.f32 %v4043_v33, 0.0  ;;  %v10842_v35 = vmax.f32 %v9245_v60, 0.0  ;;  %v9357_v12 = vpop.f32.mrf.mxu1  ;;  %v10849_v18 = vld [vmem:[#allocation229_spill] sm:$0xff]  ;;  %v10970_v14 = vld [vmem:[#allocation191_spill] sm:$0xff] }
 0x506   :  { %4257 = vmatpush.msra.mxu2 %v4179_v37  ;;  %v4121_v53 = vmax.f32 %v9218_v5, 0.0  ;;  %v3978_v47 = vadd.f32 %v9004_v38, %v9209_v40  ;;  %v4020_v42 = vadd.f32 %v10812_v46, %v3796_v52  ;;  %v4164_v6 = vmax.f32 %v4036_v7, 0.0  ;;  %4278 = vmatpush.msra.mxu3 %v4172_v25 }
 0x507   :  { %4223 = vmatpush.msra.mxu0 %v10842_v35  ;;  %4243 = vmatpush.msra.mxu1 %v4130_v28  ;;  %v9355_v2 = vpop.f32.mrf.mxu0  ;;  %v4122_v16 = vmax.f32 %v9225_v36, 0.0  ;;  %v3969_v33 = vadd.f32 %v9326_v63, %v9196_v15  ;;  %v4019_v60 = vadd.f32 %v10812_v46, %v3795_v44  ;;  %v4163_v5 = vmax.f32 %v4035_v10, 0.0 }
 0x508   :  { %4258 = vmatpush.msra.mxu2 %v4171_v8  ;;  %v4113_v40 = vmax.f32 %v9212_v30, 0.0  ;;  %v3970_v24 = vadd.f32 %v9326_v63, %v9200_v27  ;;  %v4012_v52 = vadd.f32 %v10797_v0, %v3788_v29  ;;  %v4156_v7 = vmax.f32 %v4028_v32, 0.0  ;;  %4279 = vmatpush.msra.mxu3 %v4164_v6  ;;  %v3676_v59 = vpop.f32.mrf.mxu3  ;;  %v3611_v44 = vpop.f32.mrf.mxu2  ;;  %v10851_v6 = vld [vmem:[#allocation24_spill] sm:$0xff] }
 0x509   :  { %4224 = vmatpush.msra.mxu0 %v4121_v53  ;;  %4244 = vmatpush.msra.mxu1 %v4122_v16  ;;  %v4114_v36 = vmax.f32 %v9215_v51, 0.0  ;;  %v3962_v15 = vadd.f32 %v9172_v48, %v9192_v41  ;;  %v4011_v3 = vadd.f32 %v10797_v0, %v3787_v45  ;;  %v4155_v57 = vmax.f32 %v4027_v50, 0.0  ;;  %v10845_v41 = vld [vmem:[#allocation230_spill] sm:$0xff]  ;;  %v9382_v29 = vpop.permute.xlu2 %3867  ;;  %v10967_v0 = vld [vmem:[#allocation188_spill] sm:$0xff] }
 0x50a   :  { %4259 = vmatpush.msra.mxu2 %v4163_v5  ;;  %v4105_v30 = vmax.f32 %v9205_v54, 0.0  ;;  %v4004_v27 = vadd.f32 %v8914_v20, %v10843_v4  ;;  %v9375_v10 = vadd.f32 %v3676_v59, %v9146_v61  ;;  %v4106_v51 = vmax.f32 %v3978_v47, 0.0  ;;  %4280 = vmatpush.msra.mxu3 %v4156_v7  ;;  %10847 = vst [vmem:[#allocation77_spill] sm:$0xff] %v9382_v29  ;;  %v10848_v61 = vld [vmem:[#allocation71_spill] sm:$0xff]  ;;  %v10856_v7 = vld [vmem:[#allocation48_spill] sm:$0xff]  ;;  %v10859_v4 = vld [vmem:[#allocation226_spill] sm:$0xff] }
 0x50b   :  { %4225 = vmatpush.msra.mxu0 %v4113_v40  ;;  %4245 = vmatpush.msra.mxu1 %v4114_v36  ;;  %v4148_v37 = vmax.f32 %v4020_v42, 0.0  ;;  %v4003_v31 = vadd.f32 %v8914_v20, %v10845_v41  ;;  %v9380_v43 = vadd.f32 %v3611_v44, %v9160_v49  ;;  %v4097_v54 = vmax.f32 %v3969_v33, 0.0  ;;  %v10852_v33 = vld [vmem:[#allocation31_spill] sm:$0xff]  ;;  %v10857_v36 = vld [vmem:[#allocation165_spill] sm:$0xff]  ;;  %v4201_v41 = vld [vmem:[%s9911_s5] sm:$0xff] }
 0x50c   :  { %10844 = vst [vmem:[#allocation38_spill] sm:$0xff] %v9375_v10  ;;  %4260 = vmatpush.msra.mxu2 %v4155_v57  ;;  %v4147_v55 = vmax.f32 %v4019_v60, 0.0  ;;  %v3954_v32 = vadd.f32 %v9156_v21, %v9183_v13  ;;  %v3996_v25 = vadd.f32 %v9202_v34, %v10848_v61  ;;  %v4098_v28 = vmax.f32 %v3970_v24, 0.0  ;;  %v10855_v24 = vld [vmem:[#allocation166_spill] sm:$0xff]  ;;  %v10858_v59 = vld [vmem:[#allocation227_spill] sm:$0xff]  ;;  %v10979_v20 = vld [vmem:[#allocation193_spill] sm:$0xff] }
 0x50d   :  { %10846 = vst [vmem:[#allocation59_spill] sm:$0xff] %v9380_v43  ;;  %4226 = vmatpush.msra.mxu0 %v4105_v30  ;;  %4246 = vmatpush.msra.mxu1 %v4106_v51  ;;  %v4140_v62 = vmax.f32 %v4012_v52, 0.0  ;;  %v3945_v49 = vadd.f32 %v9382_v29, %v9164_v1  ;;  %v3995_v45 = vadd.f32 %v9202_v34, %v10849_v18  ;;  %v4089_v50 = vmax.f32 %v9188_v23, 0.0  ;;  %v9397_v53 = vpop.f32.mrf.mxu1  ;;  %v10850_v1 = vld [vmem:[#allocation228_spill] sm:$0xff]  ;;  %v10853_v23 = vld [vmem:[#allocation73_spill] sm:$0xff]  ;;  %v10924_v43 = vld [vmem:[#allocation151_spill] sm:$0xff] }
 0x50e   :  { %4281 = vmatpush.msra.mxu3 %v4148_v37  ;;  %4261 = vmatpush.msra.mxu2 %v4147_v55  ;;  %v4139_v8 = vmax.f32 %v4011_v3, 0.0  ;;  %v3946_v13 = vadd.f32 %v9382_v29, %v9176_v26  ;;  %v4090_v47 = vmax.f32 %v3962_v15, 0.0  ;;  %v4132_v42 = vmax.f32 %v4004_v27, 0.0  ;;  %v10854_v26 = vld [vmem:[#allocation88_spill] sm:$0xff]  ;;  %v10864_v18 = vld [vmem:[#allocation29_spill] sm:$0xff] }
 0x50f   :  { %4227 = vmatpush.msra.mxu0 %v4097_v54  ;;  %4247 = vmatpush.msra.mxu1 %v4098_v28  ;;  %v9395_v35 = vpop.f32.mrf.mxu0  ;;  %v3987_v16 = vadd.f32 %v10851_v6, %v10850_v1  ;;  %v3988_v60 = vadd.f32 %v10851_v6, %v10852_v33  ;;  %v4081_v5 = vmax.f32 %v10853_v23, 0.0  ;;  %v4131_v40 = vmax.f32 %v4003_v31, 0.0  ;;  %v10860_v31 = vld [vmem:[#allocation10_spill] sm:$0xff]  ;;  %v10861_v54 = vld [vmem:[#allocation137_spill] sm:$0xff]  ;;  %v10867_v33 = vld [vmem:[#allocation27_spill] sm:$0xff] }
 0x510   :  { %4282 = vmatpush.msra.mxu3 %v4140_v62  ;;  %4262 = vmatpush.msra.mxu2 %v4139_v8  ;;  %v2950_v52 = vadd.f32 %v10855_v24, %v10854_v26  ;;  %v3015_v3 = vadd.f32 %v10857_v36, %v10856_v7  ;;  %v4082_v15 = vmax.f32 %v3954_v32, 0.0  ;;  %v4124_v57 = vmax.f32 %v3996_v25, 0.0  ;;  %v3679_v44 = vpop.f32.mrf.mxu3  ;;  %v10862_v32 = vld [vmem:[#allocation68_spill] sm:$0xff]  ;;  %v3614_v25 = vpop.f32.mrf.mxu2  ;;  %v10868_v23 = vld [vmem:[#allocation66_spill] sm:$0xff]  ;;  %v10869_v24 = vld [vmem:[#allocation25_spill] sm:$0xff] }
 0x511   :  { %4228 = vmatpush.msra.mxu0 %v4089_v50  ;;  %4248 = vmatpush.msra.mxu1 %v4090_v47  ;;  %v3979_v30 = vadd.f32 %v9004_v38, %v10858_v59  ;;  %v3980_v27 = vadd.f32 %v9004_v38, %v10859_v4  ;;  %v4073_v51 = vmax.f32 %v3945_v49, 0.0  ;;  %v4123_v37 = vmax.f32 %v3995_v45, 0.0  ;;  %v4202_v47 = vld [vmem:[%s9911_s5 + $0x8] sm:$0xff]  ;;  %v10870_v7 = vld [vmem:[#allocation64_spill] sm:$0xff]  ;;  %v10872_v59 = vld [vmem:[#allocation170_spill] sm:$0xff] }
 0x512   :  { %4283 = vmatpush.msra.mxu3 %v4132_v42  ;;  %4263 = vmatpush.msra.mxu2 %v4131_v40  ;;  %v2684_v55 = vadd.f32 %v10861_v54, %v10860_v31  ;;  %v3972_v61 = vadd.f32 %v9326_v63, %v10862_v32  ;;  %v9419_v28 = vadd.f32 %v3679_v44, %v3015_v3  ;;  %v4074_v62 = vmax.f32 %v3946_v13, 0.0  ;;  %v10866_v42 = vld [vmem:[#allocation62_spill] sm:$0xff]  ;;  %v10937_v38 = vld [vmem:[#allocation15_spill] sm:$0xff] }
 0x513   :  { %4229 = vmatpush.msra.mxu0 %v4081_v5  ;;  %4249 = vmatpush.msra.mxu1 %v4082_v15  ;;  %v3971_v49 = vadd.f32 %v9326_v63, %v10864_v18  ;;  %v9423_v45 = vadd.f32 %v3614_v25, %v2950_v52  ;;  %v4115_v50 = vmax.f32 %v3987_v16, 0.0  ;;  %v4116_v8 = vmax.f32 %v3988_v60, 0.0 }
 0x514   :  { %10863 = vst [vmem:[#allocation6_spill] sm:$0xff] %v9419_v28  ;;  %4284 = vmatpush.msra.mxu3 %v4124_v57  ;;  %4264 = vmatpush.msra.mxu2 %v4123_v37  ;;  %v3723_v1 = vadd.f32 %v10866_v42, %v2684_v55  ;;  %v3963_v13 = vadd.f32 %v9172_v48, %v10867_v33  ;;  %v4107_v40 = vmax.f32 %v3979_v30, 0.0  ;;  %v4108_v26 = vmax.f32 %v3980_v27, 0.0  ;;  %v10871_v57 = vld [vmem:[#allocation17_spill] sm:$0xff]  ;;  %v10875_v37 = vld [vmem:[#allocation224_spill] sm:$0xff]  ;;  %v10878_v33 = vld [vmem:[#allocation91_spill] sm:$0xff] }
 0x515   :  { %10865 = vst [vmem:[#allocation41_spill] sm:$0xff] %v9423_v45  ;;  %4230 = vmatpush.msra.mxu0 %v4073_v51  ;;  %4250 = vmatpush.msra.mxu1 %v4074_v62  ;;  %v3964_v5 = vadd.f32 %v9172_v48, %v10868_v23  ;;  %v9435_v60 = vpop.f32.mrf.mxu1  ;;  %v3955_v52 = vadd.f32 %v9156_v21, %v10869_v24  ;;  %v4099_v3 = vmax.f32 %v3971_v49, 0.0  ;;  %v4100_v15 = vmax.f32 %v3972_v61, 0.0  ;;  %v10873_v30 = vld [vmem:[#allocation45_spill] sm:$0xff]  ;;  %v10925_v45 = vld [vmem:[#allocation19_spill] sm:$0xff]  ;;  %v10926_v28 = vld [vmem:[#allocation152_spill] sm:$0xff] }
 0x516   :  { %4231 = vmatmul.f32.vlgmr.msra.gmra.mxu0 %v4201_v41  ;;  %4265 = vmatpush.msra.mxu2 %v4115_v50  ;;  %v3956_v36 = vadd.f32 %v9156_v21, %v10870_v7  ;;  %v2953_v4 = vadd.f32 %v10872_v59, %v10871_v57  ;;  %v10874_v27 = vld [vmem:[#allocation169_spill] sm:$0xff]  ;;  %v3947_v51 = vadd.f32 %v9382_v29, %v3723_v1  ;;  %v4091_v54 = vmax.f32 %v3963_v13, 0.0  ;;  %v10884_v57 = vld [vmem:[#allocation102_spill] sm:$0xff]  ;;  %v10933_v21 = vld [vmem:[#allocation47_spill] sm:$0xff] }
 0x517   :  { %4285 = vmatpush.msra.mxu3 %v4116_v8  ;;  %v9433_v16 = vpop.f32.mrf.mxu0  ;;  %4251 = vmatmul.f32.vlgmr.msra.gmra.mxu1 %v4202_v47  ;;  %v3018_v44 = vadd.f32 %v10874_v27, %v10873_v30  ;;  %v3948_v41 = vadd.f32 %v9382_v29, %v10875_v37  ;;  %v4092_v55 = vmax.f32 %v3964_v5, 0.0  ;;  %v4083_v62 = vmax.f32 %v3955_v52, 0.0  ;;  %v4203_v8 = vld [vmem:[%s9911_s5 + $0x10] sm:$0xff]  ;;  %v4204_v47 = vld [vmem:[%s9911_s5 + $0x18] sm:$0xff]  ;;  %v10879_v13 = vld [vmem:[#allocation173_spill] sm:$0xff] }
 0x518   :  { %4266 = vmatpush.msra.mxu2 %v4107_v40  ;;  %v3682_v31 = vpop.f32.mrf.mxu3  ;;  %v3617_v32 = vpop.f32.mrf.mxu2  ;;  %v4084_v18 = vmax.f32 %v3956_v36, 0.0  ;;  %v4075_v49 = vmax.f32 %v3947_v51, 0.0  ;;  %v3021_v23 = vadd.f32 %v10879_v13, %v10878_v33  ;;  %v10880_v5 = vld [vmem:[#allocation85_spill] sm:$0xff]  ;;  %v10881_v40 = vld [vmem:[#allocation174_spill] sm:$0xff]  ;;  %v2814_v10 = vadd.f32 %v10924_v43, %v10923_v19  ;;  %v10935_v48 = vld [vmem:[#allocation16_spill] sm:$0xff] }
 0x519   :  { %4286 = vmatpush.msra.mxu3 %v4108_v26  ;;  %v9448_v25 = vadd.f32 %v3682_v31, %v3018_v44  ;;  %v9450_v61 = vadd.f32 %v3617_v32, %v2953_v4  ;;  %v4076_v50 = vmax.f32 %v3948_v41, 0.0  ;;  %v2956_v26 = vadd.f32 %v10881_v40, %v10880_v5  ;;  %v10885_v59 = vld [vmem:[#allocation177_spill] sm:$0xff]  ;;  %v10886_v30 = vld [vmem:[#allocation98_spill] sm:$0xff]  ;;  %v10891_v32 = vld [vmem:[#allocation84_spill] sm:$0xff] }
 0x51a   :  { %4267 = vmatpush.msra.mxu2 %v4099_v3  ;;  %v3024_v4 = vadd.f32 %v10885_v59, %v10884_v57  ;;  %v10887_v27 = vld [vmem:[#allocation178_spill] sm:$0xff]  ;;  %v10901_v57 = vld [vmem:[#allocation95_spill] sm:$0xff]  ;;  %v10938_v19 = vld [vmem:[#allocation164_spill] sm:$0xff] }
 0x51b   :  { %4287 = vmatpush.msra.mxu3 %v4100_v15  ;;  %10876 = vst [vmem:[#allocation57_spill] sm:$0xff] %v9448_v25  ;;  %v2959_v44 = vadd.f32 %v10887_v27, %v10886_v30  ;;  %v10902_v59 = vld [vmem:[#allocation186_spill] sm:$0xff]  ;;  %v10927_v25 = vld [vmem:[#allocation92_spill] sm:$0xff]  ;;  %v2888_v43 = vadd.f32 %v10938_v19, %v10937_v38 }
 0x51c   :  { %10877 = vst [vmem:[#allocation80_spill] sm:$0xff] %v9450_v61  ;;  %4268 = vmatpush.msra.mxu2 %v4091_v54  ;;  %v2879_v61 = vadd.f32 %v10926_v28, %v10925_v45  ;;  %v10931_v29 = vld [vmem:[#allocation14_spill] sm:$0xff]  ;;  %v10940_v28 = vld [vmem:[#allocation167_spill] sm:$0xff] }
 0x51d   :  { %4288 = vmatpush.msra.mxu3 %v4092_v55  ;;  %v9460_v1 = vpop.f32.mrf.mxu1 }
 0x51e   :  { %4269 = vmatpush.msra.mxu2 %v4083_v62  ;;  %v10892_v62 = vld [vmem:[#allocation181_spill] sm:$0xff] }
 0x51f   :  { %4289 = vmatpush.msra.mxu3 %v4084_v18  ;;  %v9458_v42 = vpop.f32.mrf.mxu0  ;;  %v3027_v18 = vadd.f32 %v10892_v62, %v10891_v32  ;;  %v10907_v62 = vld [vmem:[#allocation105_spill] sm:$0xff] }
 0x520   :  { %4270 = vmatpush.msra.mxu2 %v4075_v49  ;;  %v3685_v24 = vpop.f32.mrf.mxu3  ;;  %v3620_v52 = vpop.f32.mrf.mxu2  ;;  %v10893_v49 = vld [vmem:[#allocation83_spill] sm:$0xff] }
 0x521   :  { %4290 = vmatpush.msra.mxu3 %v4076_v50  ;;  %4271 = vmatmul.f32.vlgmr.msra.gmra.mxu2 %v4203_v8  ;;  %v9466_v7 = vadd.f32 %v3685_v24, %v3021_v23  ;;  %v9468_v36 = vadd.f32 %v3620_v52, %v2956_v26  ;;  %v10894_v50 = vld [vmem:[#allocation182_spill] sm:$0xff]  ;;  %v10900_v24 = vld [vmem:[#allocation185_spill] sm:$0xff] }
 0x522   :  { %4291 = vmatmul.f32.vlgmr.msra.gmra.mxu3 %v4204_v47  ;;  %v2962_v8 = vadd.f32 %v10894_v50, %v10893_v49  ;;  %v10899_v26 = vld [vmem:[#allocation106_spill] sm:$0xff]  ;;  %v10909_v50 = vld [vmem:[#allocation103_spill] sm:$0xff] }
 0x523   :  { %10882 = vst [vmem:[#allocation58_spill] sm:$0xff] %v9466_v7  ;;  %v3030_v52 = vadd.f32 %v10900_v24, %v10899_v26 }
 0x524   :  { %10883 = vst [vmem:[#allocation42_spill] sm:$0xff] %v9468_v36  ;;  %v10928_v36 = vld [vmem:[#allocation155_spill] sm:$0xff] }
 0x525   :  { %v9472_v15 = vpop.f32.mrf.mxu1  ;;  %v2817_v7 = vadd.f32 %v10928_v36, %v10927_v25  ;;  %v10942_v25 = vld [vmem:[#allocation168_spill] sm:$0xff] }
 0x527   :  { %v9470_v3 = vpop.f32.mrf.mxu0 }
 0x528   :  { %v3688_v51 = vpop.f32.mrf.mxu3  ;;  %v3623_v37 = vpop.f32.mrf.mxu2 }
 0x529   :  { %v9478_v41 = vadd.f32 %v3688_v51, %v3024_v4  ;;  %v9480_v31 = vadd.f32 %v3623_v37, %v2959_v44  ;;  %v2965_v4 = vadd.f32 %v10902_v59, %v10901_v57 }
 0x52b   :  { %10888 = vst [vmem:[#allocation23_spill] sm:$0xff] %v9478_v41  ;;  %v10930_v41 = vld [vmem:[#allocation156_spill] sm:$0xff] }
 0x52c   :  { %10889 = vst [vmem:[#allocation81_spill] sm:$0xff] %v9480_v31  ;;  %v10929_v31 = vld [vmem:[#allocation96_spill] sm:$0xff] }
 0x52d   :  { %v9484_v55 = vpop.f32.mrf.mxu1 }
 0x52e   :  { %10890 = vst [vmem:[#allocation138_spill] sm:$0xff] %v9484_v55 }
 0x52f   :  { %v9482_v54 = vpop.f32.mrf.mxu0 }
 0x530   :  { %v3691_v47 = vpop.f32.mrf.mxu3  ;;  %v3626_v33 = vpop.f32.mrf.mxu2 }
 0x531   :  { %v9490_v13 = vadd.f32 %v3691_v47, %v3027_v18  ;;  %v9492_v23 = vadd.f32 %v3626_v33, %v2962_v8  ;;  %v10908_v18 = vld [vmem:[#allocation189_spill] sm:$0xff]  ;;  %v10910_v8 = vld [vmem:[#allocation190_spill] sm:$0xff] }
 0x532   :  { %v3033_v49 = vadd.f32 %v10908_v18, %v10907_v62  ;;  %v2968_v47 = vadd.f32 %v10910_v8, %v10909_v50 }
 0x533   :  { %10895 = vst [vmem:[#allocation52_spill] sm:$0xff] %v9490_v13 }
 0x534   :  { %10896 = vst [vmem:[#allocation139_spill] sm:$0xff] %v9492_v23  ;;  %v2882_v23 = vadd.f32 %v10930_v41, %v10929_v31  ;;  %v10944_v41 = vld [vmem:[#allocation94_spill] sm:$0xff]  ;;  %v10945_v31 = vld [vmem:[#allocation171_spill] sm:$0xff] }
 0x535   :  { %v9496_v40 = vpop.f32.mrf.mxu1 }
 0x536   :  { %10898 = vst [vmem:[#allocation140_spill] sm:$0xff] %v9496_v40 }
 0x537   :  { %v9494_v5 = vpop.f32.mrf.mxu0 }
 0x538   :  { %10897 = vst [vmem:[#allocation110_spill] sm:$0xff] %v9494_v5  ;;  %v3694_v30 = vpop.f32.mrf.mxu3  ;;  %v3629_v27 = vpop.f32.mrf.mxu2 }
 0x539   :  { %v9502_v44 = vadd.f32 %v3694_v30, %v3030_v52  ;;  %v9504_v51 = vadd.f32 %v3629_v27, %v2965_v4 }
 0x53b   :  { %10903 = vst [vmem:[#allocation21_spill] sm:$0xff] %v9502_v44 }
 0x53c   :  { %10904 = vst [vmem:[#allocation141_spill] sm:$0xff] %v9504_v51  ;;  %v10932_v51 = vld [vmem:[#allocation159_spill] sm:$0xff] }
 0x53d   :  { %v9508_v32 = vpop.f32.mrf.mxu1  ;;  %v2820_v13 = vadd.f32 %v10932_v51, %v10931_v29  ;;  %v2829_v29 = vadd.f32 %v10945_v31, %v10944_v41  ;;  %v10946_v51 = vld [vmem:[#allocation11_spill] sm:$0xff]  ;;  %v10957_v41 = vld [vmem:[#allocation89_spill] sm:$0xff] }
 0x53e   :  { %10906 = vst [vmem:[#allocation142_spill] sm:$0xff] %v9508_v32  ;;  %v10958_v31 = vld [vmem:[#allocation183_spill] sm:$0xff]  ;;  %v10973_v32 = vld [vmem:[#allocation192_spill] sm:$0xff] }
 0x53f   :  { %v9506_v37 = vpop.f32.mrf.mxu0  ;;  %v9588_v56 = vadd.f32 %v10958_v31, %v10957_v41  ;;  %v10975_v31 = vld [vmem:[#allocation113_spill] sm:$0xff] }
 0x540   :  { %10905 = vst [vmem:[#allocation111_spill] sm:$0xff] %v9506_v37  ;;  %v3697_v33 = vpop.f32.mrf.mxu3  ;;  %v3632_v26 = vpop.f32.mrf.mxu2  ;;  %v10976_v37 = vld [vmem:[#allocation194_spill] sm:$0xff] }
 0x541   :  { %v9514_v24 = vadd.f32 %v3697_v33, %v3033_v49  ;;  %v9516_v57 = vadd.f32 %v3632_v26, %v2968_v47  ;;  %10959 = vst [vmem:[#allocation20_spill] sm:$0xff] %v9588_v56 }
 0x543   :  { %10911 = vst [vmem:[#allocation43_spill] sm:$0xff] %v9514_v24  ;;  %v10936_v24 = vld [vmem:[#allocation163_spill] sm:$0xff] }
 0x544   :  { %10912 = vst [vmem:[#allocation143_spill] sm:$0xff] %v9516_v57  ;;  %v10934_v57 = vld [vmem:[#allocation160_spill] sm:$0xff]  ;;  %v2823_v63 = vadd.f32 %v10936_v24, %v10935_v48  ;;  %v10950_v24 = vld [vmem:[#allocation87_spill] sm:$0xff] }
 0x545   :  { %v9520_v59 = vpop.f32.mrf.mxu1  ;;  %v2885_v44 = vadd.f32 %v10934_v57, %v10933_v21  ;;  %v10948_v57 = vld [vmem:[#allocation93_spill] sm:$0xff] }
 0x546   :  { %10914 = vst [vmem:[#allocation144_spill] sm:$0xff] %v9520_v59 }
 0x547   :  { %v9518_v52 = vpop.f32.mrf.mxu0 }
 0x548   :  { %10913 = vst [vmem:[#allocation51_spill] sm:$0xff] %v9518_v52  ;;  %v9522_v4 = vpop.f32.mrf.mxu3  ;;  %v9524_v30 = vpop.f32.mrf.mxu2  ;;  %v10993_v52 = vld [vmem:[#allocation120_spill] sm:$0xff] }
 0x549   :  { %10915 = vst [vmem:[#allocation107_spill] sm:$0xff] %v9522_v4 }
 0x54a   :  { %10916 = vst [vmem:[#allocation145_spill] sm:$0xff] %v9524_v30  ;;  %v10939_v30 = vld [vmem:[#allocation13_spill] sm:$0xff] }
 0x54b   :  { %v2826_v45 = vadd.f32 %v10940_v28, %v10939_v30  ;;  %v10953_v30 = vld [vmem:[#allocation90_spill] sm:$0xff]  ;;  %v10954_v28 = vld [vmem:[#allocation179_spill] sm:$0xff] }
 0x54c   :  { %v9580_v46 = vadd.f32 %v10954_v28, %v10953_v30  ;;  %v10969_v28 = vld [vmem:[#allocation109_spill] sm:$0xff] }
 0x54d   :  { %v9528_v62 = vpop.f32.mrf.mxu1 }
 0x54e   :  { %10918 = vst [vmem:[#allocation146_spill] sm:$0xff] %v9528_v62  ;;  %v11016_v62 = vld [vmem:[#allocation212_spill] sm:$0xff] }
 0x54f   :  { %v9526_v27 = vpop.f32.mrf.mxu0 }
 0x550   :  { %10917 = vst [vmem:[#allocation50_spill] sm:$0xff] %v9526_v27  ;;  %v9530_v18 = vpop.f32.mrf.mxu3  ;;  %v9532_v50 = vpop.f32.mrf.mxu2  ;;  %v11023_v27 = vld [vmem:[#allocation132_spill] sm:$0xff] }
 0x551   :  { %10919 = vst [vmem:[#allocation100_spill] sm:$0xff] %v9530_v18  ;;  %v10949_v18 = vld [vmem:[#allocation175_spill] sm:$0xff] }
 0x552   :  { %10920 = vst [vmem:[#allocation147_spill] sm:$0xff] %v9532_v50  ;;  %v10941_v50 = vld [vmem:[#allocation99_spill] sm:$0xff]  ;;  %v2832_v48 = vadd.f32 %v10949_v18, %v10948_v57  ;;  %v10963_v57 = vld [vmem:[#allocation86_spill] sm:$0xff] }
 0x553   :  { %v2891_v36 = vadd.f32 %v10942_v25, %v10941_v50  ;;  %v10955_v50 = vld [vmem:[#allocation104_spill] sm:$0xff] }
 0x554   :  { %v10956_v25 = vld [vmem:[#allocation180_spill] sm:$0xff] }
 0x555   :  { %v9536_v8 = vpop.f32.mrf.mxu1 }
 0x557   :  { %v9534_v49 = vpop.f32.mrf.mxu0 }
 0x558   :  { %v9538_v47 = vpop.f32.mrf.mxu3  ;;  %v9540_v33 = vpop.f32.mrf.mxu2 }
 0x559   :  { %10921 = vst [vmem:[#allocation4_spill] sm:$0xff] %v9538_v47  ;;  %v10951_v47 = vld [vmem:[#allocation176_spill] sm:$0xff] }
 0x55a   :  { %10922 = vst [vmem:[#allocation148_spill] sm:$0xff] %v9540_v33  ;;  %v10947_v33 = vld [vmem:[#allocation172_spill] sm:$0xff]  ;;  %v2897_v38 = vadd.f32 %v10951_v47, %v10950_v24  ;;  %v10964_v47 = vld [vmem:[#allocation187_spill] sm:$0xff] }
 0x55b   :  { %v2894_v21 = vadd.f32 %v10947_v33, %v10946_v51  ;;  %v10960_v33 = vld [vmem:[#allocation97_spill] sm:$0xff]  ;;  %v10961_v51 = vld [vmem:[#allocation184_spill] sm:$0xff]  ;;  %v9596_v24 = vadd.f32 %v10964_v47, %v10963_v57  ;;  %v10981_v47 = vld [vmem:[#allocation115_spill] sm:$0xff] }
 0x55c   :  { %v9592_v18 = vadd.f32 %v10961_v51, %v10960_v33  ;;  %v9612_v33 = vadd.f32 %v10976_v37, %v10975_v31  ;;  %v10978_v51 = vld [vmem:[#allocation114_spill] sm:$0xff]  ;;  %v10991_v37 = vld [vmem:[#allocation119_spill] sm:$0xff] }
 0x55d   :  { %v9544_v39 = vpop.f32.mrf.mxu1  ;;  %10965 = vst [vmem:[#allocation101_spill] sm:$0xff] %v9596_v24  ;;  %v9616_v57 = vadd.f32 %v10979_v20, %v10978_v51  ;;  %v10982_v24 = vld [vmem:[#allocation195_spill] sm:$0xff]  ;;  %v10994_v20 = vld [vmem:[#allocation200_spill] sm:$0xff] }
 0x55e   :  { %10962 = vst [vmem:[#allocation150_spill] sm:$0xff] %v9592_v18  ;;  %v10992_v31 = vld [vmem:[#allocation199_spill] sm:$0xff]  ;;  %v2915_v51 = vadd.f32 %v10994_v20, %v10993_v52  ;;  %v11008_v52 = vld [vmem:[#allocation126_spill] sm:$0xff] }
 0x55f   :  { %v9542_v26 = vpop.f32.mrf.mxu0  ;;  %10977 = vst [vmem:[#allocation154_spill] sm:$0xff] %v9612_v33  ;;  %v2850_v33 = vadd.f32 %v10992_v31, %v10991_v37  ;;  %v11005_v37 = vld [vmem:[#allocation125_spill] sm:$0xff]  ;;  %v11006_v31 = vld [vmem:[#allocation207_spill] sm:$0xff]  ;;  %v11009_v20 = vld [vmem:[#allocation206_spill] sm:$0xff] }
 0x560   :  { %v9566_v4 = vpop.f32.mrf.mxu3  ;;  %v9576_v19 = vpop.f32.mrf.mxu2  ;;  %10980 = vst [vmem:[#allocation44_spill] sm:$0xff] %v9616_v57  ;;  %v9648_v5 = vadd.f32 %v11006_v31, %v11005_v37  ;;  %v9652_v56 = vadd.f32 %v11009_v20, %v11008_v52  ;;  %v11021_v37 = vld [vmem:[#allocation131_spill] sm:$0xff]  ;;  %v11022_v31 = vld [vmem:[#allocation213_spill] sm:$0xff]  ;;  %v11024_v52 = vld [vmem:[#allocation214_spill] sm:$0xff] }
 0x561   :  { %10943 = vst [vmem:[#allocation108_spill] sm:$0xff] %v9566_v4  ;;  %v9584_v4 = vadd.f32 %v10956_v25, %v10955_v50  ;;  %v9604_v50 = vadd.f32 %v10970_v14, %v10969_v28  ;;  %v10972_v25 = vld [vmem:[#allocation112_spill] sm:$0xff]  ;;  %v10985_v14 = vld [vmem:[#allocation117_spill] sm:$0xff]  ;;  %v10986_v28 = vld [vmem:[#allocation198_spill] sm:$0xff]  ;;  %v2924_v20 = vadd.f32 %v11024_v52, %v11023_v27 }
 0x562   :  { %10952 = vst [vmem:[#allocation149_spill] sm:$0xff] %v9576_v19  ;;  %v10966_v19 = vld [vmem:[#allocation82_spill] sm:$0xff]  ;;  %v9608_v41 = vadd.f32 %v10973_v32, %v10972_v25  ;;  %v9624_v59 = vadd.f32 %v10986_v28, %v10985_v14  ;;  %v10989_v25 = vld [vmem:[#allocation197_spill] sm:$0xff]  ;;  %v11001_v28 = vld [vmem:[#allocation123_spill] sm:$0xff] }
 0x563   :  { %v9600_v30 = vadd.f32 %v10967_v0, %v10966_v19  ;;  %10971 = vst [vmem:[#allocation222_spill] sm:$0xff] %v9604_v50  ;;  %v2847_v0 = vadd.f32 %v10982_v24, %v10981_v47  ;;  %v10983_v19 = vld [vmem:[#allocation116_spill] sm:$0xff]  ;;  %v10988_v32 = vld [vmem:[#allocation118_spill] sm:$0xff]  ;;  %v10995_v24 = vld [vmem:[#allocation121_spill] sm:$0xff] }
 0x564   :  { %10974 = vst [vmem:[#allocation18_spill] sm:$0xff] %v9608_v41  ;;  %v9628_v41 = vadd.f32 %v10989_v25, %v10988_v32  ;;  %v10996_v47 = vld [vmem:[#allocation202_spill] sm:$0xff]  ;;  %v11003_v25 = vld [vmem:[#allocation124_spill] sm:$0xff]  ;;  %v11033_v27 = vld [vmem:[#allocation221_spill] sm:$0xff] }
 0x565   :  { %10968 = vst [vmem:[#allocation153_spill] sm:$0xff] %v9600_v30  ;;  %v10984_v30 = vld [vmem:[#allocation196_spill] sm:$0xff]  ;;  %v9636_v40 = vadd.f32 %v10996_v47, %v10995_v24  ;;  %v11011_v24 = vld [vmem:[#allocation127_spill] sm:$0xff] }
 0x566   :  { %v2912_v58 = vadd.f32 %v10984_v30, %v10983_v19  ;;  %10987 = vst [vmem:[#allocation157_spill] sm:$0xff] %v9624_v59  ;;  %v10998_v30 = vld [vmem:[#allocation122_spill] sm:$0xff]  ;;  %v10999_v19 = vld [vmem:[#allocation201_spill] sm:$0xff]  ;;  %v11002_v59 = vld [vmem:[#allocation203_spill] sm:$0xff] }
 0x567   :  { %10990 = vst [vmem:[#allocation12_spill] sm:$0xff] %v9628_v41  ;;  %v3520_v57 = vpop.f32.mrf.mxu0  ;;  %v3585_v50 = vpop.f32.mrf.mxu1  ;;  %v9640_v14 = vadd.f32 %v10999_v19, %v10998_v30  ;;  %v2853_v32 = vadd.f32 %v11002_v59, %v11001_v28  ;;  %v11004_v41 = vld [vmem:[#allocation204_spill] sm:$0xff]  ;;  %v11014_v30 = vld [vmem:[#allocation209_spill] sm:$0xff]  ;;  %v11018_v28 = vld [vmem:[#allocation130_spill] sm:$0xff] }
 0x568   :  { %10997 = vst [vmem:[#allocation158_spill] sm:$0xff] %v9636_v40  ;;  %v2918_v18 = vadd.f32 %v11004_v41, %v11003_v25  ;;  %v11012_v47 = vld [vmem:[#allocation208_spill] sm:$0xff]  ;;  %v2921_v19 = vadd.f32 %v11014_v30, %v11013_v22  ;;  %v11019_v41 = vld [vmem:[#allocation211_spill] sm:$0xff]  ;;  %v11028_v22 = vld [vmem:[#allocation134_spill] sm:$0xff] }
 0x569   :  { %11000 = vst [vmem:[#allocation49_spill] sm:$0xff] %v9640_v14  ;;  %v2856_v40 = vadd.f32 %v11012_v47, %v11011_v24  ;;  %v11015_v14 = vld [vmem:[#allocation129_spill] sm:$0xff]  ;;  %v9664_v25 = vadd.f32 %v11019_v41, %v11018_v28  ;;  %v11029_v30 = vld [vmem:[#allocation216_spill] sm:$0xff]  ;;  %v3765_v41 = vadd.f32 %v9458_v42, %v2829_v29  ;;  %v9704_v42 = vadd.f32 %v9355_v2, %v2820_v13 }
 0x56a   :  { %11007 = vst [vmem:[#allocation161_spill] sm:$0xff] %v9648_v5  ;;  %v9660_v59 = vadd.f32 %v11016_v62, %v11015_v14  ;;  %v2859_v5 = vadd.f32 %v11022_v31, %v11021_v37  ;;  %v11026_v24 = vld [vmem:[#allocation133_spill] sm:$0xff]  ;;  %v9678_v62 = vadd.f32 %v11029_v30, %v11028_v22  ;;  %v11030_v14 = vld [vmem:[#allocation136_spill] sm:$0xff]  ;;  %v9685_v37 = vpop.f32.mrf.mxu2  ;;  %v11032_v31 = vld [vmem:[#allocation135_spill] sm:$0xff]  ;;  %v9698_v22 = vadd.f32 %v9312_v9, %v2817_v7 }
 0x56b   :  { %11010 = vst [vmem:[#allocation210_spill] sm:$0xff] %v9652_v56  ;;  %v9670_v56 = vpop.f32.mrf.mxu3  ;;  %v11027_v47 = vld [vmem:[#allocation217_spill] sm:$0xff]  ;;  %v9689_v52 = vadd.f32 %v11033_v27, %v11032_v31  ;;  %v9707_v29 = vadd.f32 %v9357_v12, %v2885_v44  ;;  %v3773_v30 = vadd.f32 %v9470_v3, %v2832_v48  ;;  %v3838_v9 = vadd.f32 %v3585_v50, %v2921_v19  ;;  %v11041_v19 = vld [vmem:[#allocation20_spill] sm:$0xff]  ;;  %v11046_v27 = vld [vmem:[#allocation51_spill] sm:$0xff] }
 0x56c   :  { %11017 = vst [vmem:[#allocation46_spill] sm:$0xff] %v9660_v59  ;;  %v9674_v55 = vadd.f32 %v11027_v47, %v11026_v24  ;;  %v11031_v59 = vld [vmem:[#allocation220_spill] sm:$0xff]  ;;  %v11035_v24 = vld [vmem:[#allocation37_spill] sm:$0xff]  ;;  %v9717_v7 = vadd.f32 %v9433_v16, %v2826_v45  ;;  %v9723_v2 = vadd.f32 %v10851_v6, %v3765_v41  ;;  %v9726_v12 = vadd.f32 %v9460_v1, %v2894_v21  ;;  %v11037_v21 = vld [vmem:[#allocation138_spill] sm:$0xff] }
 0x56d   :  { %11020 = vst [vmem:[#allocation162_spill] sm:$0xff] %v9664_v25  ;;  %v9682_v28 = vadd.f32 %v11031_v59, %v11030_v14  ;;  %v9695_v47 = vadd.f32 %v11035_v24, %v2879_v61  ;;  %v9701_v59 = vadd.f32 %v9314_v17, %v2882_v23  ;;  %v3837_v61 = vadd.f32 %v3520_v57, %v2856_v40  ;;  %v11036_v45 = vld [vmem:[#allocation244_spill] sm:$0xff]  ;;  %v11040_v50 = vld [vmem:[#allocation233_spill] sm:$0xff]  ;;  %v11043_v41 = vld [vmem:[#allocation150_spill] sm:$0xff] }
 0x56e   :  { %11025 = vst [vmem:[#allocation218_spill] sm:$0xff] %v9670_v56  ;;  %v11034_v56 = vld [vmem:[#allocation55_spill] sm:$0xff]  ;;  %v9720_v17 = vadd.f32 %v9435_v60, %v2891_v36  ;;  %v9731_v16 = vadd.f32 %v9202_v34, %v3773_v30  ;;  %v3774_v60 = vadd.f32 %v9472_v15, %v2897_v38  ;;  %v3821_v40 = vadd.f32 %v9534_v49, %v2850_v33  ;;  %v11038_v15 = vld [vmem:[#allocation50_spill] sm:$0xff]  ;;  %v11044_v31 = vld [vmem:[#allocation140_spill] sm:$0xff] }
 0x56f   :  { %v9692_v25 = vadd.f32 %v11034_v56, %v2814_v10  ;;  %v9711_v56 = vadd.f32 %v9395_v35, %v2823_v63  ;;  %v9714_v10 = vadd.f32 %v9397_v53, %v2888_v43  ;;  %v3523_v3 = vpop.f32.mrf.mxu0  ;;  %v3588_v63 = vpop.f32.mrf.mxu1  ;;  %v3829_v35 = vadd.f32 %v9542_v26, %v2853_v32  ;;  %v11039_v49 = vld [vmem:[#allocation146_spill] sm:$0xff] }
 0x570   :  { %v3830_v53 = vadd.f32 %v9544_v39, %v2918_v18  ;;  %v3845_v13 = vadd.f32 %v3523_v3, %v2859_v5  ;;  %v3846_v23 = vadd.f32 %v3588_v63, %v2924_v20  ;;  %v3822_v44 = vadd.f32 %v9536_v8, %v2915_v51  ;;  %v11042_v20 = vld [vmem:[#allocation110_spill] sm:$0xff] }
 0x571   :  { %v4061_v1 = vadd.f32 %v8874_v11, %v3837_v61  ;;  %v4062_v43 = vadd.f32 %v8874_v11, %v3838_v9  ;;  %v3781_v5 = vadd.f32 %v9482_v54, %v9580_v46  ;;  %v3782_v48 = vadd.f32 %v11037_v21, %v9584_v4  ;;  %v11045_v54 = vld [vmem:[#allocation222_spill] sm:$0xff]  ;;  %v11053_v21 = vld [vmem:[#allocation153_spill] sm:$0xff] }
 0x572   :  { %v4069_v36 = vadd.f32 %v11036_v45, %v3845_v13  ;;  %v4070_v26 = vadd.f32 %v11036_v45, %v3846_v23  ;;  %v3813_v38 = vadd.f32 %v11038_v15, %v2847_v0  ;;  %v3814_v18 = vadd.f32 %v11039_v49, %v2912_v58  ;;  %v11047_v24 = vld [vmem:[#allocation18_spill] sm:$0xff]  ;;  %v11048_v0 = vld [vmem:[#allocation144_spill] sm:$0xff]  ;;  %v11051_v23 = vld [vmem:[#allocation101_spill] sm:$0xff] }
 0x573   :  { %v3715_v39 = vpop.f32.mrf.mxu3  ;;  %v3650_v8 = vpop.f32.mrf.mxu2  ;;  %v4053_v33 = vadd.f32 %v11040_v50, %v3829_v35  ;;  %v4054_v57 = vadd.f32 %v11040_v50, %v3830_v53  ;;  %v3789_v14 = vadd.f32 %v11042_v20, %v11041_v19  ;;  %v3790_v46 = vadd.f32 %v11044_v31, %v11043_v41  ;;  %v11049_v58 = vld [vmem:[#allocation250_spill] sm:$0xff]  ;;  %v11050_v53 = vld [vmem:[#allocation247_spill] sm:$0xff]  ;;  %v11055_v19 = vld [vmem:[#allocation241_spill] sm:$0xff] }
 0x574   :  { %v4197_v51 = vmax.f32 %v4069_v36, 0.0  ;;  %v4198_v32 = vmax.f32 %v4070_v26, 0.0  ;;  %v3805_v4 = vadd.f32 %v11046_v27, %v11045_v54  ;;  %v3806_v30 = vadd.f32 %v11048_v0, %v11047_v24  ;;  %v11052_v36 = vld [vmem:[#allocation111_spill] sm:$0xff]  ;;  %v11054_v15 = vld [vmem:[#allocation142_spill] sm:$0xff]  ;;  %v11057_v41 = vld [vmem:[#allocation240_spill] sm:$0xff] }
 0x575   :  { %v4045_v61 = vadd.f32 %v11049_v58, %v3821_v40  ;;  %v4046_v9 = vadd.f32 %v11049_v58, %v3822_v44  ;;  %v4189_v3 = vmax.f32 %v4061_v1, 0.0  ;;  %v4190_v63 = vmax.f32 %v4062_v43, 0.0  ;;  %v11059_v24 = vld [vmem:[#allocation162_spill] sm:$0xff] }
 0x576   :  { %4295 = vmatpush.msrb.mxu0 %v4197_v51  ;;  %4315 = vmatpush.msrb.mxu1 %v4198_v32  ;;  %v9759_v35 = vadd.f32 %v9202_v34, %v3774_v60  ;;  %v9762_v13 = vadd.f32 %v11050_v53, %v3781_v5  ;;  %v3797_v26 = vadd.f32 %v11052_v36, %v11051_v23  ;;  %v4181_v1 = vmax.f32 %v4053_v33, 0.0  ;;  %v11056_v51 = vld [vmem:[#allocation249_spill] sm:$0xff]  ;;  %v11058_v33 = vld [vmem:[#allocation70_spill] sm:$0xff] }
 0x577   :  { %v3798_v49 = vadd.f32 %v11054_v15, %v11053_v21  ;;  %v4037_v40 = vadd.f32 %v11055_v19, %v3813_v38  ;;  %v4038_v44 = vadd.f32 %v11055_v19, %v3814_v18  ;;  %v4182_v43 = vmax.f32 %v4054_v57, 0.0  ;;  %v11063_v23 = vld [vmem:[#allocation46_spill] sm:$0xff]  ;;  %v11064_v21 = vld [vmem:[#allocation49_spill] sm:$0xff]  ;;  %v11065_v15 = vld [vmem:[#allocation4_spill] sm:$0xff] }
 0x578   :  { %4296 = vmatpush.msrb.mxu0 %v4189_v3  ;;  %4316 = vmatpush.msrb.mxu1 %v4190_v63  ;;  %v9771_v60 = vadd.f32 %v11050_v53, %v3782_v48  ;;  %v4013_v5 = vadd.f32 %v11056_v51, %v3789_v14  ;;  %v4014_v32 = vadd.f32 %v11056_v51, %v3790_v46  ;;  %v4173_v38 = vmax.f32 %v4045_v61, 0.0  ;;  %v11060_v48 = vld [vmem:[#allocation218_spill] sm:$0xff] }
 0x579   :  { %v3840_v20 = vadd.f32 %v3715_v39, %v9678_v62  ;;  %v4029_v31 = vadd.f32 %v11057_v41, %v3805_v4  ;;  %v4030_v54 = vadd.f32 %v11057_v41, %v3806_v30  ;;  %v4174_v27 = vmax.f32 %v4046_v9, 0.0  ;;  %v11061_v61 = vld [vmem:[#allocation210_spill] sm:$0xff]  ;;  %v11062_v9 = vld [vmem:[#allocation108_spill] sm:$0xff] }
 0x57a   :  { %4297 = vmatpush.msrb.mxu0 %v4181_v1  ;;  %4317 = vmatpush.msrb.mxu1 %v4182_v43  ;;  %v4021_v57 = vadd.f32 %v11058_v33, %v3797_v26  ;;  %v3832_v0 = vadd.f32 %v11060_v48, %v11059_v24  ;;  %v3839_v14 = vadd.f32 %v3650_v8, %v9674_v55  ;;  %v4165_v39 = vmax.f32 %v4037_v40, 0.0  ;;  %v11070_v48 = vld [vmem:[#allocation158_spill] sm:$0xff] }
 0x57b   :  { %v3718_v18 = vpop.f32.mrf.mxu3  ;;  %v3653_v3 = vpop.f32.mrf.mxu2  ;;  %v4022_v62 = vadd.f32 %v11058_v33, %v3798_v49  ;;  %v4166_v4 = vmax.f32 %v4038_v44, 0.0  ;;  %v3824_v63 = vadd.f32 %v11062_v9, %v11061_v61  ;;  %v3831_v36 = vadd.f32 %v9685_v37, %v11063_v23  ;;  %v11067_v44 = vld [vmem:[#allocation149_spill] sm:$0xff]  ;;  %v11075_v61 = vld [vmem:[#allocation147_spill] sm:$0xff] }
 0x57c   :  { %v3848_v46 = vadd.f32 %v3718_v18, %v9682_v28  ;;  %v3847_v30 = vadd.f32 %v3653_v3, %v9689_v52  ;;  %4298 = vmatpush.msrb.mxu0 %v4173_v38  ;;  %4318 = vmatpush.msrb.mxu1 %v4174_v27  ;;  %v4064_v26 = vadd.f32 %v8874_v11, %v3840_v20  ;;  %v4157_v8 = vmax.f32 %v4029_v31, 0.0  ;;  %v11066_v52 = vld [vmem:[#allocation161_spill] sm:$0xff]  ;;  %v11068_v18 = vld [vmem:[#allocation12_spill] sm:$0xff] }
 0x57d   :  { %v4158_v28 = vmax.f32 %v4030_v54, 0.0  ;;  %v3816_v49 = vadd.f32 %v11065_v15, %v11064_v21  ;;  %v3823_v1 = vadd.f32 %v11067_v44, %v11066_v52  ;;  %v4056_v43 = vadd.f32 %v11040_v50, %v3832_v0  ;;  %v11069_v31 = vld [vmem:[#allocation100_spill] sm:$0xff] }
 0x57e   :  { %v4072_v55 = vadd.f32 %v11036_v45, %v3848_v46  ;;  %v4071_v40 = vadd.f32 %v11036_v45, %v3847_v30  ;;  %4299 = vmatpush.msrb.mxu0 %v4165_v39  ;;  %4319 = vmatpush.msrb.mxu1 %v4166_v4  ;;  %v4063_v37 = vadd.f32 %v8874_v11, %v3839_v14  ;;  %v4149_v20 = vmax.f32 %v4021_v57, 0.0  ;;  %v11071_v45 = vld [vmem:[#allocation148_spill] sm:$0xff]  ;;  %v11073_v57 = vld [vmem:[#allocation107_spill] sm:$0xff]  ;;  %v11074_v30 = vld [vmem:[#allocation157_spill] sm:$0xff] }
 0x57f   :  { %v4150_v27 = vmax.f32 %v4022_v62, 0.0  ;;  %v3808_v54 = vadd.f32 %v11069_v31, %v11068_v18  ;;  %v3815_v3 = vadd.f32 %v11071_v45, %v11070_v48  ;;  %v4048_v46 = vadd.f32 %v11049_v58, %v3824_v63  ;;  %v11072_v14 = vld [vmem:[#allocation44_spill] sm:$0xff]  ;;  %v11081_v31 = vld [vmem:[#allocation7_spill] sm:$0xff] }
 0x580   :  { %v4200_v38 = vmax.f32 %v4072_v55, 0.0  ;;  %v4199_v24 = vmax.f32 %v4071_v40, 0.0  ;;  %4300 = vmatpush.msrb.mxu0 %v4157_v8  ;;  %4320 = vmatpush.msrb.mxu1 %v4158_v28  ;;  %v4055_v39 = vadd.f32 %v11040_v50, %v3831_v36  ;;  %v4192_v4 = vmax.f32 %v4064_v26, 0.0  ;;  %v11076_v36 = vld [vmem:[#allocation154_spill] sm:$0xff]  ;;  %v11077_v26 = vld [vmem:[#allocation145_spill] sm:$0xff]  ;;  %v11078_v40 = vld [vmem:[#allocation8_spill] sm:$0xff] }
 0x581   :  { %v4141_v0 = vmax.f32 %v4013_v5, 0.0  ;;  %v4142_v11 = vmax.f32 %v4014_v32, 0.0  ;;  %v3800_v62 = vadd.f32 %v11073_v57, %v11072_v14  ;;  %v3807_v9 = vadd.f32 %v11075_v61, %v11074_v30  ;;  %v11083_v45 = vld [vmem:[#allocation143_spill] sm:$0xff]  ;;  %v11086_v57 = vld [vmem:[#allocation141_spill] sm:$0xff] }
 0x582   :  { %4355 = vmatpush.msrb.mxu3 %v4200_v38  ;;  %4301 = vmatpush.msrb.mxu0 %v4149_v20  ;;  %v4040_v23 = vadd.f32 %v11055_v19, %v3816_v49  ;;  %v4047_v55 = vadd.f32 %v11049_v58, %v3823_v1  ;;  %v4184_v8 = vmax.f32 %v4056_v43, 0.0  ;;  %v4191_v63 = vmax.f32 %v4063_v37, 0.0  ;;  %v11079_v37 = vld [vmem:[#allocation5_spill] sm:$0xff] }
 0x583   :  { %4321 = vmatpush.msrb.mxu1 %v4150_v27  ;;  %4335 = vmatpush.msrb.mxu2 %v4199_v24  ;;  %v3990_v50 = vadd.f32 %v10851_v6, %v9726_v12  ;;  %v4133_v5 = vmax.f32 %v9762_v13, 0.0  ;;  %v4134_v32 = vmax.f32 %v9771_v60, 0.0  ;;  %v3799_v28 = vadd.f32 %v11077_v26, %v11076_v36  ;;  %v11082_v24 = vld [vmem:[#allocation21_spill] sm:$0xff] }
 0x584   :  { %4356 = vmatpush.msrb.mxu3 %v4192_v4  ;;  %4302 = vmatpush.msrb.mxu0 %v4141_v0  ;;  %v4032_v21 = vadd.f32 %v11057_v41, %v3808_v54  ;;  %v4039_v58 = vadd.f32 %v11055_v19, %v3815_v3  ;;  %v4176_v15 = vmax.f32 %v4048_v46, 0.0  ;;  %v4183_v49 = vmax.f32 %v4055_v39, 0.0  ;;  %v11084_v39 = vld [vmem:[#allocation34_spill] sm:$0xff]  ;;  %v11087_v61 = vld [vmem:[#allocation77_spill] sm:$0xff] }
 0x585   :  { %4322 = vmatpush.msrb.mxu1 %v4142_v11  ;;  %4336 = vmatpush.msrb.mxu2 %v4191_v63  ;;  %v3981_v12 = vadd.f32 %v11078_v40, %v9717_v7  ;;  %v3982_v13 = vadd.f32 %v11078_v40, %v9720_v17  ;;  %v4125_v60 = vmax.f32 %v9731_v16, 0.0  ;;  %v4126_v52 = vmax.f32 %v9759_v35, 0.0  ;;  %v11080_v35 = vld [vmem:[#allocation43_spill] sm:$0xff]  ;;  %v11085_v11 = vld [vmem:[#allocation52_spill] sm:$0xff] }
 0x586   :  { %4357 = vmatpush.msrb.mxu3 %v4184_v8  ;;  %4303 = vmatpush.msrb.mxu0 %v4133_v5  ;;  %v4024_v44 = vadd.f32 %v11058_v33, %v3800_v62  ;;  %v4031_v19 = vadd.f32 %v11057_v41, %v3807_v9  ;;  %v4168_v1 = vmax.f32 %v4040_v23, 0.0  ;;  %v4175_v43 = vmax.f32 %v4047_v55, 0.0  ;;  %v11088_v55 = vld [vmem:[#allocation139_spill] sm:$0xff] }
 0x587   :  { %4323 = vmatpush.msrb.mxu1 %v4134_v32  ;;  %4337 = vmatpush.msrb.mxu2 %v4183_v49  ;;  %v3973_v7 = vadd.f32 %v11079_v37, %v9711_v56  ;;  %v3974_v17 = vadd.f32 %v11079_v37, %v9714_v10  ;;  %v4117_v16 = vmax.f32 %v9723_v2, 0.0  ;;  %v4118_v38 = vmax.f32 %v3990_v50, 0.0  ;;  %v11089_v32 = vld [vmem:[#allocation23_spill] sm:$0xff]  ;;  %v4205_v49 = vld [vmem:[%s9911_s5 + $0x20] sm:$0xff] }
 0x588   :  { %4358 = vmatpush.msrb.mxu3 %v4176_v15  ;;  %4304 = vmatpush.msrb.mxu0 %v4125_v60  ;;  %v4016_v20 = vadd.f32 %v11056_v51, %v11080_v35  ;;  %v4023_v41 = vadd.f32 %v11058_v33, %v3799_v28  ;;  %v4160_v27 = vmax.f32 %v4032_v21, 0.0  ;;  %v4167_v18 = vmax.f32 %v4039_v58, 0.0  ;;  %v11091_v58 = vld [vmem:[#allocation58_spill] sm:$0xff] }
 0x589   :  { %4324 = vmatpush.msrb.mxu1 %v4126_v52  ;;  %4338 = vmatpush.msrb.mxu2 %v4175_v43  ;;  %v3965_v56 = vadd.f32 %v11081_v31, %v9704_v42  ;;  %v3966_v10 = vadd.f32 %v11081_v31, %v9707_v29  ;;  %v4109_v54 = vmax.f32 %v3981_v12, 0.0  ;;  %v4110_v2 = vmax.f32 %v3982_v13, 0.0  ;;  %v11092_v12 = vld [vmem:[#allocation42_spill] sm:$0xff]  ;;  %v11093_v52 = vld [vmem:[#allocation57_spill] sm:$0xff] }
 0x58a   :  { %4359 = vmatpush.msrb.mxu3 %v4168_v1  ;;  %4305 = vmatpush.msrb.mxu0 %v4117_v16  ;;  %v4008_v48 = vadd.f32 %v11050_v53, %v11082_v24  ;;  %v4015_v33 = vadd.f32 %v11056_v51, %v11083_v45  ;;  %v4152_v3 = vmax.f32 %v4024_v44, 0.0  ;;  %v4159_v46 = vmax.f32 %v4031_v19, 0.0  ;;  %v11094_v1 = vld [vmem:[#allocation80_spill] sm:$0xff] }
 0x58b   :  { %4325 = vmatpush.msrb.mxu1 %v4118_v38  ;;  %4339 = vmatpush.msrb.mxu2 %v4167_v18  ;;  %v3957_v42 = vadd.f32 %v11084_v39, %v9698_v22  ;;  %v3958_v29 = vadd.f32 %v11084_v39, %v9701_v59  ;;  %v4101_v4 = vmax.f32 %v3973_v7, 0.0  ;;  %v4102_v0 = vmax.f32 %v3974_v17, 0.0  ;;  %v11096_v38 = vld [vmem:[#allocation41_spill] sm:$0xff] }
 0x58c   :  { %4360 = vmatpush.msrb.mxu3 %v4160_v27  ;;  %4306 = vmatpush.msrb.mxu0 %v4109_v54  ;;  %v4000_v14 = vadd.f32 %v9202_v34, %v11085_v11  ;;  %v4007_v51 = vadd.f32 %v11050_v53, %v11086_v57  ;;  %v4144_v62 = vmax.f32 %v4016_v20, 0.0  ;;  %v4151_v30 = vmax.f32 %v4023_v41, 0.0  ;;  %v11097_v41 = vld [vmem:[#allocation38_spill] sm:$0xff]  ;;  %v11099_v54 = vld [vmem:[#allocation76_spill] sm:$0xff] }
 0x58d   :  { %4326 = vmatpush.msrb.mxu1 %v4110_v2  ;;  %4340 = vmatpush.msrb.mxu2 %v4159_v46  ;;  %v3949_v22 = vadd.f32 %v11087_v61, %v9692_v25  ;;  %v3950_v59 = vadd.f32 %v11087_v61, %v9695_v47  ;;  %v4093_v9 = vmax.f32 %v3965_v56, 0.0  ;;  %v4094_v23 = vmax.f32 %v3966_v10, 0.0  ;;  %v11090_v25 = vld [vmem:[#allocation81_spill] sm:$0xff] }
 0x58e   :  { %4361 = vmatpush.msrb.mxu3 %v4152_v3  ;;  %4307 = vmatpush.msrb.mxu0 %v4101_v4  ;;  %v3999_v8 = vadd.f32 %v9202_v34, %v11088_v55  ;;  %v4136_v63 = vmax.f32 %v4008_v48, 0.0  ;;  %v4143_v50 = vmax.f32 %v4015_v33, 0.0  ;;  %v4085_v53 = vmax.f32 %v3957_v42, 0.0  ;;  %v11100_v48 = vld [vmem:[#allocation56_spill] sm:$0xff] }
 0x58f   :  { %4327 = vmatpush.msrb.mxu1 %v4102_v0  ;;  %4341 = vmatpush.msrb.mxu2 %v4151_v30  ;;  %v4086_v5 = vmax.f32 %v3958_v29, 0.0  ;;  %v3992_v36 = vadd.f32 %v10851_v6, %v11089_v32  ;;  %v3991_v47 = vadd.f32 %v10851_v6, %v11090_v25  ;;  %v4128_v26 = vmax.f32 %v4000_v14, 0.0  ;;  %v4206_v6 = vld [vmem:[%s9911_s5 + $0x28] sm:$0xff]  ;;  %v4207_v29 = vld [vmem:[%s9911_s5 + $0x30] sm:$0xff]  ;;  %v4213_v0 = vpop.permute.xlu0 %4212  ;;  %v4382_v32 = vpop.permute.xlu1 %4381 }
 0x590   :  { %4362 = vmatpush.msrb.mxu3 %v4144_v62  ;;  %4308 = vmatpush.msrb.mxu0 %v4093_v9  ;;  %v4135_v28 = vmax.f32 %v4007_v51, 0.0  ;;  %v4077_v21 = vmax.f32 %v3949_v22, 0.0  ;;  %v4078_v34 = vmax.f32 %v3950_v59, 0.0  ;;  %v3984_v15 = vadd.f32 %v11078_v40, %v11091_v58 }
 0x591   :  { %4328 = vmatpush.msrb.mxu1 %v4094_v23  ;;  %4342 = vmatpush.msrb.mxu2 %v4143_v50  ;;  %v3983_v13 = vadd.f32 %v11078_v40, %v11092_v12  ;;  %v4127_v60 = vmax.f32 %v3999_v8, 0.0  ;;  %v3976_v44 = vadd.f32 %v11079_v37, %v11093_v52  ;;  %v4120_v19 = vmax.f32 %v3992_v36, 0.0  ;;  %v11095_v40 = vld [vmem:[#allocation6_spill] sm:$0xff]  ;;  %v4387_v36 = vpop.permute.xlu2 %4386 }
 0x592   :  { %4363 = vmatpush.msrb.mxu3 %v4136_v63  ;;  %4309 = vmatpush.msrb.mxu0 %v4085_v53  ;;  %v3975_v43 = vadd.f32 %v11079_v37, %v11094_v1  ;;  %v4119_v7 = vmax.f32 %v3991_v47, 0.0  ;;  %v3968_v17 = vadd.f32 %v11081_v31, %v11095_v40  ;;  %v4112_v16 = vmax.f32 %v3984_v15, 0.0  ;;  %v11098_v37 = vld [vmem:[#allocation59_spill] sm:$0xff]  ;;  %v4375_v53 = vld [vmem:[%s9912_s7] sm:$0xff] }
 0x593   :  { %4329 = vmatpush.msrb.mxu1 %v4086_v5  ;;  %4343 = vmatpush.msrb.mxu2 %v4135_v28  ;;  %v3967_v35 = vadd.f32 %v11081_v31, %v11096_v38  ;;  %v4111_v20 = vmax.f32 %v3983_v13, 0.0  ;;  %v3960_v27 = vadd.f32 %v11084_v39, %v11097_v41  ;;  %v4104_v18 = vmax.f32 %v3976_v44, 0.0  ;;  %v4232_v4 = vpop.f32.mrf.mxu0  ;;  %v4376_v5 = vld [vmem:[%s9912_s7 + $0x8] sm:$0x1f] }
 0x594   :  { %4364 = vmatpush.msrb.mxu3 %v4128_v26  ;;  %4310 = vmatpush.msrb.mxu0 %v4077_v21  ;;  %v3959_v56 = vadd.f32 %v11084_v39, %v11098_v37  ;;  %v4103_v10 = vmax.f32 %v3975_v43, 0.0  ;;  %v3952_v2 = vadd.f32 %v11087_v61, %v11099_v54  ;;  %v4096_v24 = vmax.f32 %v3968_v17, 0.0  ;;  %v4208_v39 = vld [vmem:[%s9911_s5 + $0x38] sm:$0xff]  ;;  %v4252_v14 = vpop.f32.mrf.mxu1 }
 0x595   :  { %4330 = vmatpush.msrb.mxu1 %v4078_v34  ;;  %4344 = vmatpush.msrb.mxu2 %v4127_v60  ;;  %v3951_v31 = vadd.f32 %v11087_v61, %v11100_v48  ;;  %v4095_v45 = vmax.f32 %v3967_v35, 0.0  ;;  %v4088_v33 = vmax.f32 %v3960_v27, 0.0  ;;  %v4233_v11 = vadd.f32 %v4232_v4, %v4213_v0 }
 0x596   :  { %4311 = vmatmul.f32.vlgmr.msrb.gmra.mxu0 %v4205_v49  ;;  %4365 = vmatpush.msrb.mxu3 %v4120_v19  ;;  %v4087_v3 = vmax.f32 %v3959_v56, 0.0  ;;  %v4080_v46 = vmax.f32 %v3952_v2, 0.0 }
 0x597   :  { %4331 = vmatmul.f32.vlgmr.msrb.gmra.mxu1 %v4206_v6  ;;  %4345 = vmatpush.msrb.mxu2 %v4119_v7  ;;  %v4079_v42 = vmax.f32 %v3951_v31, 0.0  ;;  %v4253_v51 = vadd.f32 %v4252_v14, %v4233_v11 }
 0x598   :  { %4366 = vmatpush.msrb.mxu3 %v4112_v16 }
 0x599   :  { %4346 = vmatpush.msrb.mxu2 %v4111_v20 }
 0x59a   :  { %4367 = vmatpush.msrb.mxu3 %v4104_v18 }
 0x59b   :  { %4347 = vmatpush.msrb.mxu2 %v4103_v10 }
 0x59c   :  { %4368 = vmatpush.msrb.mxu3 %v4096_v24 }
 0x59d   :  { %4348 = vmatpush.msrb.mxu2 %v4095_v45 }
 0x59e   :  { %4369 = vmatpush.msrb.mxu3 %v4088_v33 }
 0x59f   :  { %4349 = vmatpush.msrb.mxu2 %v4087_v3 }
 0x5a0   :  { %4370 = vmatpush.msrb.mxu3 %v4080_v46 }
 0x5a1   :  { %4350 = vmatpush.msrb.mxu2 %v4079_v42  ;;  %4371 = vmatmul.f32.vlgmr.msrb.gmra.mxu3 %v4208_v39 }
 0x5a2   :  { %4351 = vmatmul.f32.vlgmr.msrb.gmra.mxu2 %v4207_v29 }
 0x5a4   :  { %v4272_v57 = vpop.f32.mrf.mxu2 }
 0x5a5   :  { %v4273_v62 = vadd.f32 %v4272_v57, %v4253_v51  ;;  %v4292_v30 = vpop.f32.mrf.mxu3 }
 0x5a7   :  { %v4293_v22 = vadd.f32 %v4292_v30, %v4273_v62 }
 0x613   :  { %v4312_v61 = vpop.f32.mrf.mxu0 }
 0x614   :  { %v4313_v59 = vadd.f32 %v4312_v61, %v4293_v22  ;;  %v4332_v9 = vpop.f32.mrf.mxu1 }
 0x616   :  { %v4333_v23 = vadd.f32 %v4332_v9, %v4313_v59 }
 0x624   :  { %v4372_v8 = vpop.f32.mrf.mxu3 }
 0x625   :  { %v4352_v55 = vpop.f32.mrf.mxu2 }
 0x626   :  { %v4353_v63 = vadd.f32 %v4352_v55, %v4333_v23 }
 0x628   :  { %v4373_v50 = vadd.f32 %v4372_v8, %v4353_v63 }
 0x62a   :  { %4411 = vmatpush.msra.mxu0 %v4373_v50  ;;  %5089 = vmatpush.msra.mxu1 %v4373_v50 }
 0x62b   :  { %5087 = vmatmul.msk.f32.vlgmr.msra.gmra.mxu0 %vm4389_vm1, %v4375_v53  ;;  %5088 = vmatmul.msk.f32.vlgmr.msra.gmra.mxu1 %vm4389_vm1, %v4376_v5 }
 0x6a8   :  { %v4413_v25 = vpop.f32.mrf.mxu0  ;;  %v4416_v47 = vpop.f32.mrf.mxu1 }
 0x6a9   :  { %v4414_v26 = vadd.f32 %v4413_v25, %v4382_v32  ;;  %v4417_v28 = vadd.f32 %v4416_v47, %v4387_v36 }
 0x6ab   :  { %v4419_v21 = vsub.f32 0.0, %v4414_v26  ;;  %v4420_v34 = vsub.f32 0.0, %v4417_v28 }
 0x6ad   :  { %v4421_v58 = vmul.f32 1.442695, %v4419_v21  ;;  %v4423_v15 = vmul.f32 1.442695, %v4420_v34 }
 0x6af   :  { %5095 = vpow2.f32 %v4421_v58 }
 0x6b0   :  { %5097 = vpow2.f32 %v4423_v15 }
 0x6b5   :  { %v5096_v49 = vpop.eup %5095 }
 0x6b6   :  { %v5098_v12 = vpop.eup %5097  ;;  %v4425_v13 = vadd.f32 1.0, %v5096_v49 }
 0x6b7   :  { %v4426_v60 = vadd.f32 1.0, %v5098_v12 }
 0x6b8   :  { %5099 = vrcp.f32 %v4425_v13  ;;  %v4438_v43 = vand.u32 2147483648, %v4425_v13  ;;  %v4436_v17 = vand.u32 2147483647, %v4425_v13  ;;  %vm4432_vm4 = vweird.f32 %v4425_v13 }
 0x6b9   :  { %5101 = vrcp.f32 %v4426_v60  ;;  %v4453_v16 = vand.u32 2147483648, %v4426_v60  ;;  %v4451_v35 = vand.u32 2147483647, %v4426_v60  ;;  %vm4447_vm6 = vweird.f32 %v4426_v60 }
 0x6ba   :  { %v4439_v41 = vor.u32 1.1754944e-38, %v4438_v43  ;;  %vm4437_vm7 = vcmp.eq.f32.partialorder %v4436_v17, 8.507059e+37 }
 0x6bb   :  { %v4454_v37 = vor.u32 1.1754944e-38, %v4453_v16  ;;  %vm4452_vm9 = vcmp.eq.f32.partialorder %v4451_v35, 8.507059e+37 }
 0x6be   :  { %v5100_v6 = vpop.eup %5099 }
 0x6bf   :  { %v5102_v52 = vpop.eup %5101  ;;  %v4428_v44 = vmul.f32 %v5100_v6, %v4425_v13  ;;  %vm4433_vm2 = vweird.f32 %v5100_v6 }
 0x6c0   :  { %v4443_v19 = vmul.f32 %v5102_v52, %v4426_v60  ;;  %vm4448_vm3 = vweird.f32 %v5102_v52  ;;  %vm4434_vm5 = vmor %vm4432_vm4, %vm4433_vm2 }
 0x6c1   :  { %v4429_v1 = vsub.f32 1.0, %v4428_v44  ;;  %vm4449_vm8 = vmor %vm4447_vm6, %vm4448_vm3 }
 0x6c2   :  { %v4444_v7 = vsub.f32 1.0, %v4443_v19 }
 0x6c3   :  { %v4430_v40 = vmul.f32 %v5100_v6, %v4429_v1 }
 0x6c4   :  { %v4445_v38 = vmul.f32 %v5102_v52, %v4444_v7 }
 0x6c5   :  { %v4431_v20 = vadd.f32 %v5100_v6, %v4430_v40 }
 0x6c6   :  { %v4446_v27 = vadd.f32 %v5102_v52, %v4445_v38 }
 0x6c7   :  { %v4435_v18 = vsel %vm4434_vm5, %v5100_v6, %v4431_v20 }
 0x6c8   :  { %v4440_v56 = vsel %vm4437_vm7, %v4439_v41, %v4435_v18  ;;  %v4450_v10 = vsel %vm4449_vm8, %v5102_v52, %v4446_v27 }
 0x6c9   :  { %v4441_v54 = vmul.f32 13.0, %v4440_v56  ;;  %v4455_v2 = vsel %vm4452_vm9, %v4454_v37, %v4450_v10 }
 0x6ca   :  { %v4456_v24 = vmul.f32 13.0, %v4455_v2 }
 0x6cb   :  { %4457 = vst [vmem:[%s9913_s9] sm:$0xff] %v4441_v54 }
 0x6cc   :  { %4458 = vst [vmem:[%s9913_s9 + $0x8] sm:$0x1f] %v4456_v24 }

</bundles_post_ra>
